<compile_context>
chip_gen: v7x
topology: tpu7x:2x2x1
jax: 0.10.0
libtpu: 0.0.40
codegen_flags: <defaults>
</compile_context>

<pallas_src>
import math

import jax
import jax.numpy as jnp
from jax.experimental import pallas as pl
from jax.experimental.pallas import tpu as pltpu

# ----------------------------- model hyper-params (small, config-consistent) --
D_VLM = 128           # InfinityConfig.d_vlm  (vlm_to_kv_compact input)
TEXT_CHANNELS = 2048  # InfinityConfig.text_channels (vlm_to_kv_compact output)
EMBED_DIM = 64        # reduced stand-in for InfinityConfig.embed_dim (=768)
VAE_DIM = 32          # stand-in for VAE feature channels of x_BLC_wo_prefix
CODE_BITS = 16        # d16 VAE -> 16 bit labels per token
V_OUT = 2 * CODE_BITS  # bit-label logits channels (use_bit_label=1)
SCALE_SCHEDULE = [(1, 1, 1), (1, 2, 2), (1, 4, 4)]  # small subset of cfg schedule

TN_W2 = 512           # w2 column-strip width: bf16 strip = 2 MB, 2x buffers = 4 MB
                      # (safe under the 16/32 MiB scoped VMEM on v5e/v6e/v7x)


# ------------------------------------------------------------------ kernels ---
def _gelu_tanh(x):
    # GELU(approximate='tanh'), matches torch.nn.GELU(approximate='tanh'); f32.
    c = math.sqrt(2.0 / math.pi)
    return 0.5 * x * (1.0 + jnp.tanh(c * (x + 0.044715 * x * x * x)))


def _vlm_to_kv_kernel(x_ref, w1_ref, b1_ref, w2_ref, b2_ref, o_ref):
    """Fused Linear(128->2048) + GELU(tanh) + Linear(2048->2048) column strip."""
    # h is tiny ([M, 2048]); recompute it per strip so the single grid axis has
    # no cross-step dependency and can be marked "parallel".
    h = jnp.dot(x_ref[...], w1_ref[...], preferred_element_type=jnp.float32)
    h = _gelu_tanh(h + b1_ref[...])                     # f32 epilogue (v5e-safe)
    y = jnp.dot(h.astype(w2_ref.dtype), w2_ref[...],
                preferred_element_type=jnp.float32)     # bf16 MXU, f32 acc
    o_ref[...] = (y + b2_ref[...]).astype(o_ref.dtype)


def vlm_to_kv_compact(v_flat, w1, b1, w2, b2, tn=TN_W2):
    """kv_compact = Linear(GELU_tanh(Linear(v_flat)))  — one pallas_call."""
    M, K = v_flat.shape                      # [B*S, 128]
    N = w2.shape[1]                          # 2048
    assert K == w1.shape[0] and w1.shape[1] == w2.shape[0] and N % tn == 0
    x16 = v_flat.astype(jnp.bfloat16)
    w1_16 = w1.astype(jnp.bfloat16)
    w2_16 = w2.astype(jnp.bfloat16)
    b1_2d = b1.reshape(1, -1).astype(jnp.float32)
    b2_2d = b2.reshape(1, -1).astype(jnp.float32)
    return pl.pallas_call(
        _vlm_to_kv_kernel,
        out_shape=jax.ShapeDtypeStruct((M, N), jnp.bfloat16),
        grid_spec=pltpu.PrefetchScalarGridSpec(
            num_scalar_prefetch=0,
            grid=(N // tn,),
            in_specs=[
                pl.BlockSpec((M, K), lambda j: (0, 0)),                  # x (resident)
                pl.BlockSpec((K, TEXT_CHANNELS), lambda j: (0, 0)),      # w1 (resident)
                pl.BlockSpec((1, TEXT_CHANNELS), lambda j: (0, 0)),      # b1 (resident)
                pl.BlockSpec((TEXT_CHANNELS, tn), lambda j: (0, j)),     # w2 strip
                pl.BlockSpec((1, tn), lambda j: (0, j)),                 # b2 strip
            ],
            out_specs=pl.BlockSpec((M, tn), lambda j: (0, j)),           # lane-dense
        ),
        compiler_params=pltpu.CompilerParams(
            dimension_semantics=("parallel",)),
    )(x16, w1_16, b1_2d, w2_16, b2_2d)


def _cond_proj_kernel(kv_ref, wkvs_ref, bkvs_ref, x_ref, ww_ref, bw_ref,
                      kvs_out_ref, xe_out_ref):
    """Packed [K|V|SOS] projection of kv_compact + VAE word embedding."""
    kvs = jnp.dot(kv_ref[...], wkvs_ref[...], preferred_element_type=jnp.float32)
    kvs_out_ref[...] = (kvs + bkvs_ref[...]).astype(kvs_out_ref.dtype)
    xe = jnp.dot(x_ref[...], ww_ref[...], preferred_element_type=jnp.float32)
    xe_out_ref[...] = (xe + bw_ref[...]).astype(xe_out_ref.dtype)


def cond_projections(kv_compact, wkvs, bkvs, x_flat, wword, bword):
    """Single pallas_call with two independent tiny matmul outputs."""
    M, C = kv_compact.shape                  # [B*S, 2048]
    P = wkvs.shape[1]                        # 3 * EMBED_DIM
    Mx, Kx = x_flat.shape                    # [B*Lw, VAE_DIM]
    return pl.pallas_call(
        _cond_proj_kernel,
        out_shape=(jax.ShapeDtypeStruct((M, P), jnp.float32),
                   jax.ShapeDtypeStruct((Mx, EMBED_DIM), jnp.float32)),
        grid_spec=pltpu.PrefetchScalarGridSpec(
            num_scalar_prefetch=0,
            grid=(1,),
            in_specs=[
                pl.BlockSpec((M, C), lambda i: (0, 0)),
                pl.BlockSpec((C, P), lambda i: (0, 0)),
                pl.BlockSpec((1, P), lambda i: (0, 0)),
                pl.BlockSpec((Mx, Kx), lambda i: (0, 0)),
                pl.BlockSpec((Kx, EMBED_DIM), lambda i: (0, 0)),
                pl.BlockSpec((1, EMBED_DIM), lambda i: (0, 0)),
            ],
            out_specs=[
                pl.BlockSpec((M, P), lambda i: (0, 0)),
                pl.BlockSpec((Mx, EMBED_DIM), lambda i: (0, 0)),
            ],
        ),
        compiler_params=pltpu.CompilerParams(
            dimension_semantics=("arbitrary",)),
    )(kv_compact.astype(jnp.bfloat16), wkvs.astype(jnp.bfloat16),
      bkvs.reshape(1, -1).astype(jnp.float32),
      x_flat.astype(jnp.float32), wword.astype(jnp.float32),
      bword.reshape(1, -1).astype(jnp.float32))


def _cross_attn_head_kernel(tok_ref, wq_ref, k_ref, v_ref, wh_ref, bh_ref, o_ref):
    """Cross-attention conditioning block (+residual) fused with bit-label head.

    Processes ALL batches in one grid step (B is tiny); batch loop is a static
    Python unroll over pure 2-D matmuls.
    """
    wq = wq_ref[...].astype(jnp.float32)
    wh = wh_ref[...].astype(jnp.float32)
    bh = bh_ref[...].astype(jnp.float32)
    inv_sqrt_d = 1.0 / math.sqrt(tok_ref.shape[-1])
    for b in range(tok_ref.shape[0]):                        # B=2: static unroll
        t = tok_ref[b].astype(jnp.float32)                   # [L, D]
        q = jnp.dot(t, wq, preferred_element_type=jnp.float32)
        k = k_ref[b].astype(jnp.float32)                     # [S, D]
        v = v_ref[b].astype(jnp.float32)                     # [S, D]
        s = jax.lax.dot_general(q, k, (((1,), (1,)), ((), ())),
                                preferred_element_type=jnp.float32)
        s = s * inv_sqrt_d                                   # [L, S]
        m = jnp.max(s, axis=-1, keepdims=True)
        p = jnp.exp(s - m)                                   # f32 softmax (v5e-safe)
        p = p * pl.reciprocal(jnp.sum(p, axis=-1, keepdims=True), approx=True)
        a = jnp.dot(p, v, preferred_element_type=jnp.float32)  # [L, D]
        y = t + a                                            # residual
        logits = jnp.dot(y, wh, preferred_element_type=jnp.float32) + bh
        o_ref[b] = logits.astype(o_ref.dtype)


def cross_attention_with_head(tokens, wq, k_cond, v_cond, whead, bhead):
    B, L, D = tokens.shape
    S = k_cond.shape[1]
    return pl.pallas_call(
        _cross_attn_head_kernel,
        out_shape=jax.ShapeDtypeStruct((B, L, V_OUT), jnp.float32),
        grid_spec=pltpu.PrefetchScalarGridSpec(
            num_scalar_prefetch=0,
            grid=(1,),
            in_specs=[
                pl.BlockSpec((B, L, D), lambda i: (0, 0, 0)),
                pl.BlockSpec((D, D), lambda i: (0, 0)),
                pl.BlockSpec((B, S, D), lambda i: (0, 0, 0)),
                pl.BlockSpec((B, S, D), lambda i: (0, 0, 0)),
                pl.BlockSpec((D, V_OUT), lambda i: (0, 0)),
                pl.BlockSpec((1, V_OUT), lambda i: (0, 0)),
            ],
            out_specs=pl.BlockSpec((B, L, V_OUT), lambda i: (0, 0, 0)),
        ),
        compiler_params=pltpu.CompilerParams(
            dimension_semantics=("arbitrary",)),
    )(tokens, wq, k_cond, v_cond, whead, bhead.reshape(1, -1))


# ----------------------------------------------------------------- params -----
def init_params(key):
    ks = jax.random.split(key, 12)
    s = 0.02

    def nrm(k, shape):
        return (s * jax.random.normal(k, shape)).astype(jnp.float32)

    wk = nrm(ks[2], (TEXT_CHANNELS, EMBED_DIM))
    wv = nrm(ks[3], (TEXT_CHANNELS, EMBED_DIM))
    wsos = nrm(ks[4], (TEXT_CHANNELS, EMBED_DIM))

    return {
        # EXACT vlm_to_kv_compact: Linear(128,2048) -> GELU(tanh) -> Linear(2048,2048)
        "w1": nrm(ks[0], (D_VLM, TEXT_CHANNELS)),
        "b1": jnp.zeros((TEXT_CHANNELS,), jnp.float32),
        "w2": nrm(ks[1], (TEXT_CHANNELS, TEXT_CHANNELS)),
        "b2": jnp.zeros((TEXT_CHANNELS,), jnp.float32),
        # Infinity conditioning projections packed as one weight: [wk | wv | wsos]
        "wkvs": jnp.concatenate([wk, wv, wsos], axis=1),        # [2048, 3*EMBED_DIM]
        "bkvs": jnp.zeros((3 * EMBED_DIM,), jnp.float32),
        "wword": nrm(ks[5], (VAE_DIM, EMBED_DIM)),
        "bword": jnp.zeros((EMBED_DIM,), jnp.float32),
        "wq": nrm(ks[6], (EMBED_DIM, EMBED_DIM)),
        "whead": nrm(ks[7], (EMBED_DIM, V_OUT)),
        "bhead": jnp.zeros((V_OUT,), jnp.float32),
        # deterministic stand-in projections for the VAE tokenizer path
        "w_vae_stub": nrm(ks[8], (3, VAE_DIM)),
        "w_bits_stub": nrm(ks[9], (3, CODE_BITS)),
    }


# --------------------------------------------------------------- forward ------
def tokenize_image_with_vae_stub(next_frame, scale_schedule, params):
    # TODO(synk): vae.encode_for_raw_features + BitwiseSelfCorrection.flip_requant
    # have no Pallas equivalent (external pretrained VAE); this deterministic
    # mean-pooling stand-in only preserves the output shapes / dataflow.
    B, C, H, W = next_frame.shape  # NCHW
    per_scale_tok = []
    gt_ms_idx_Bl = []
    for (pt, ph, pw) in scale_schedule:
        pooled = next_frame.reshape(B, C, ph, H // ph, pw, W // pw).mean(axis=(3, 5))
        tok = pooled.reshape(B, C, ph * pw).transpose(0, 2, 1)        # [B, l, 3]
        per_scale_tok.append(tok)
        bits = (jnp.dot(tok, params["w_bits_stub"]) > 0).astype(jnp.int32)  # [B, l, 16]
        gt_ms_idx_Bl.append(bits)
    # x_BLC_wo_prefix excludes the first scale (it becomes the SOS/prefix)
    x = jnp.concatenate(per_scale_tok[1:], axis=1)                    # [B, Lw, 3]
    x_BLC_wo_prefix = jnp.dot(x, params["w_vae_stub"]).astype(jnp.float32)  # [B, Lw, 32]
    return x_BLC_wo_prefix, gt_ms_idx_Bl


def infinity_vlm_forward(params, v_of_last_layer, next_frame,
                         scale_schedule=SCALE_SCHEDULE):
    B, S, d_vlm = v_of_last_layer.shape
    assert d_vlm == D_VLM

    # ---- prepare_condition_input ------------------------------------------
    # TODO(synk): the LlavaOnevision .generate() that produces past_key_values
    # is an external pretrained model; `v_of_last_layer` is taken as the input.
    lens = [S] * B
    max_len = max(lens)
    cu_seqlens_k = (jnp.arange(B + 1) * max_len).astype(jnp.int32)
    v_flat = v_of_last_layer.reshape(B * S, d_vlm)

    # ---- Infinity.vlm_to_kv_compact (trainable path, exact) -- 1 pallas_call
    kv_compact = vlm_to_kv_compact(v_flat, params["w1"], params["b1"],
                                   params["w2"], params["b2"])   # [B*S, 2048] bf16

    # ---- tokenize_image_with_vae (stand-in) --------------------------------
    x_BLC_wo_prefix, gt_ms_idx_Bl = tokenize_image_with_vae_stub(
        next_frame, scale_schedule, params)
    Lw = x_BLC_wo_prefix.shape[1]

    # ---- Infinity forward (conditioning + one cross-attn block + head) -----
    # TODO(synk): the full depth-12 Infinity block stack (shared AdaLN, RoPE2d,
    # self-attn) is not reproduced; one cross-attention conditioning block and
    # the bit-label head stand in for it.
    # Packed K/V/SOS projections + word embedding -- 1 pallas_call, 2 outputs.
    kvs, xe_flat = cond_projections(
        kv_compact, params["wkvs"], params["bkvs"],
        x_BLC_wo_prefix.reshape(B * Lw, VAE_DIM),
        params["wword"], params["bword"])
    kvs = kvs.reshape(B, S, 3 * EMBED_DIM)
    k_cond = kvs[:, :, 0 * EMBED_DIM:1 * EMBED_DIM]                  # [B, S, D]
    v_cond = kvs[:, :, 1 * EMBED_DIM:2 * EMBED_DIM]                  # [B, S, D]
    # mean-pool after the linear projection == project the mean (linearity)
    sos = kvs[:, :, 2 * EMBED_DIM:3 * EMBED_DIM].mean(axis=1, keepdims=True)
    xe = xe_flat.reshape(B, Lw, EMBED_DIM)
    tokens = jnp.concatenate([sos, xe], axis=1)                      # [B, L, D]

    # Cross-attention + residual + bit-label head -- 1 pallas_call.
    logits_BLV = cross_attention_with_head(
        tokens, params["wq"], k_cond, v_cond, params["whead"], params["bhead"])
    return logits_BLV, gt_ms_idx_Bl, (lens, cu_seqlens_k, max_len)


# ------------------------------------------------------------------- main -----
if __name__ == "__main__":
    key = jax.random.PRNGKey(0)
    k_v, k_img = jax.random.split(key)

    B, S = 2, 8
    # stand-in for the reshaped last-layer V cache of the VLM: [B, seq, 128]
    v_of_last_layer = jax.random.normal(k_v, (B, S, D_VLM), jnp.float32)
    # next video frame, NCHW like PyTorch
    next_frame = jax.random.normal(k_img, (B, 3, 16, 16), jnp.float32)

    params = init_params(jax.random.PRNGKey(42))

    logits_BLV, gt_ms_idx_Bl, _ = infinity_vlm_forward(
        params, v_of_last_layer, next_frame)

    jax.block_until_ready(logits_BLV)
    for g in gt_ms_idx_Bl:
        jax.block_until_ready(g)

    # sanity: [B, 1 + sum(l_i for scales[1:]), 2*CODE_BITS]
    expected_L = 1 + sum(ph * pw for _, ph, pw in SCALE_SCHEDULE[1:])
    assert logits_BLV.shape == (B, expected_L, V_OUT), logits_BLV.shape
    assert len(gt_ms_idx_Bl) == len(SCALE_SCHEDULE)
    assert bool(jnp.all(jnp.isfinite(logits_BLV)))

    print("KERNEL_OK")
</pallas_src>

<mosaic_0001>
module attributes {stable_mosaic.version = 11 : i64} {
  func.func @_vlm_to_kv_kernel(%arg0: i32, %arg1: memref<16x128xbf16, #tpu.memory_space<vmem>>, %arg2: memref<128x2048xbf16, #tpu.memory_space<vmem>>, %arg3: memref<1x2048xf32, #tpu.memory_space<vmem>>, %arg4: memref<2048x512xbf16, #tpu.memory_space<vmem>>, %arg5: memref<1x512xf32, #tpu.memory_space<vmem>>, %arg6: memref<16x512xbf16, #tpu.memory_space<vmem>>) attributes {dimension_semantics = [#tpu.dimension_semantics<parallel>], iteration_bounds = array<i64: 4>, scalar_prefetch = 0 : i64, scratch_operands = 0 : i64, tpu.core_type = #tpu.core_type<tc>, window_params = [{pipeline_mode = #tpu.pipeline_mode<synchronous>, transform_indices = @transform_0, window_bounds = array<i64: 16, 128>}, {pipeline_mode = #tpu.pipeline_mode<synchronous>, transform_indices = @transform_1, window_bounds = array<i64: 128, 2048>}, {pipeline_mode = #tpu.pipeline_mode<synchronous>, transform_indices = @transform_2, window_bounds = array<i64: 1, 2048>}, {transform_indices = @transform_3, window_bounds = array<i64: 2048, 512>}, {transform_indices = @transform_4, window_bounds = array<i64: 1, 512>}, {transform_indices = @transform_5, window_bounds = array<i64: 16, 512>}]} {
    %c0 = arith.constant 0 : index
    %c0_0 = arith.constant 0 : index
    %0 = vector.load %arg1[%c0, %c0_0] : memref<16x128xbf16, #tpu.memory_space<vmem>>, vector<16x128xbf16>
    %c0_1 = arith.constant 0 : index
    %c0_2 = arith.constant 0 : index
    %1 = vector.load %arg2[%c0_1, %c0_2] : memref<128x2048xbf16, #tpu.memory_space<vmem>>, vector<128x2048xbf16>
    %cst = arith.constant dense<0.000000e+00> : vector<16x2048xf32>
    %2 = tpu.matmul %0, %1, %cst {dimension_numbers = #tpu.dot_dimension_numbers<[1], [0], [0], [1], [0, 0, 1, 1], [], []>} : vector<16x128xbf16>, vector<128x2048xbf16>, vector<16x2048xf32> -> vector<16x2048xf32>
    %c0_3 = arith.constant 0 : index
    %c0_4 = arith.constant 0 : index
    %3 = vector.load %arg3[%c0_3, %c0_4] : memref<1x2048xf32, #tpu.memory_space<vmem>>, vector<1x2048xf32>
    %4 = vector.broadcast %3 : vector<1x2048xf32> to vector<16x2048xf32>
    %5 = arith.addf %2, %4 : vector<16x2048xf32>
    %cst_5 = arith.constant 5.000000e-01 : f32
    %6 = vector.broadcast %cst_5 : f32 to vector<16x2048xf32>
    %7 = arith.mulf %6, %5 : vector<16x2048xf32>
    %cst_6 = arith.constant 4.471500e-02 : f32
    %8 = vector.broadcast %cst_6 : f32 to vector<16x2048xf32>
    %9 = arith.mulf %8, %5 : vector<16x2048xf32>
    %10 = arith.mulf %9, %5 : vector<16x2048xf32>
    %11 = arith.mulf %10, %5 : vector<16x2048xf32>
    %12 = arith.addf %5, %11 : vector<16x2048xf32>
    %cst_7 = arith.constant 0.797884583 : f32
    %13 = vector.broadcast %cst_7 : f32 to vector<16x2048xf32>
    %14 = arith.mulf %13, %12 : vector<16x2048xf32>
    %15 = math.tanh %14 : vector<16x2048xf32>
    %cst_8 = arith.constant 1.000000e+00 : f32
    %16 = vector.broadcast %cst_8 : f32 to vector<16x2048xf32>
    %17 = arith.addf %16, %15 : vector<16x2048xf32>
    %18 = arith.mulf %7, %17 : vector<16x2048xf32>
    %19 = arith.truncf %18 : vector<16x2048xf32> to vector<16x2048xbf16>
    %c0_9 = arith.constant 0 : index
    %c0_10 = arith.constant 0 : index
    %20 = vector.load %arg4[%c0_9, %c0_10] : memref<2048x512xbf16, #tpu.memory_space<vmem>>, vector<2048x512xbf16>
    %cst_11 = arith.constant dense<0.000000e+00> : vector<16x512xf32>
    %21 = tpu.matmul %19, %20, %cst_11 {dimension_numbers = #tpu.dot_dimension_numbers<[1], [0], [0], [1], [0, 0, 1, 1], [], []>} : vector<16x2048xbf16>, vector<2048x512xbf16>, vector<16x512xf32> -> vector<16x512xf32>
    %c0_12 = arith.constant 0 : index
    %c0_13 = arith.constant 0 : index
    %22 = vector.load %arg5[%c0_12, %c0_13] : memref<1x512xf32, #tpu.memory_space<vmem>>, vector<1x512xf32>
    %23 = vector.broadcast %22 : vector<1x512xf32> to vector<16x512xf32>
    %24 = arith.addf %21, %23 : vector<16x512xf32>
    %25 = arith.truncf %24 : vector<16x512xf32> to vector<16x512xbf16>
    %c0_14 = arith.constant 0 : index
    %c0_15 = arith.constant 0 : index
    %26 = vector.load %arg6[%c0_14, %c0_15] : memref<16x512xbf16, #tpu.memory_space<vmem>>, vector<16x512xbf16>
    tpu.vector_store %arg6[%c0_14, %c0_15], %25 {strides = array<i32>} : memref<16x512xbf16, #tpu.memory_space<vmem>>, vector<16x512xbf16>,
    return
  }
  func.func @transform_0(%arg0: i32) -> (i32, i32) {
    %c0_i32 = arith.constant 0 : i32
    %c0_i32_0 = arith.constant 0 : i32
    %c0_i32_1 = arith.constant 0 : i32
    return %c0_i32, %c0_i32_0 : i32, i32
  }
  func.func @transform_1(%arg0: i32) -> (i32, i32) {
    %c0_i32 = arith.constant 0 : i32
    %c0_i32_0 = arith.constant 0 : i32
    %c0_i32_1 = arith.constant 0 : i32
    return %c0_i32, %c0_i32_0 : i32, i32
  }
  func.func @transform_2(%arg0: i32) -> (i32, i32) {
    %c0_i32 = arith.constant 0 : i32
    %c0_i32_0 = arith.constant 0 : i32
    %c0_i32_1 = arith.constant 0 : i32
    return %c0_i32, %c0_i32_0 : i32, i32
  }
  func.func @transform_3(%arg0: i32) -> (i32, i32) {
    %c0_i32 = arith.constant 0 : i32
    %c0_i32_0 = arith.constant 0 : i32
    return %c0_i32, %arg0 : i32, i32
  }
  func.func @transform_4(%arg0: i32) -> (i32, i32) {
    %c0_i32 = arith.constant 0 : i32
    %c0_i32_0 = arith.constant 0 : i32
    return %c0_i32, %arg0 : i32, i32
  }
  func.func @transform_5(%arg0: i32) -> (i32, i32) {
    %c0_i32 = arith.constant 0 : i32
    %c0_i32_0 = arith.constant 0 : i32
    return %c0_i32, %arg0 : i32, i32
  }
}

</mosaic_0001>

<bundles_post_ra>
// kernel: tpu_custom_call.1
= control target key start
LH: loop header
LB: loop body
LE: loop exit
PB: predicated region body
PF: predicated region fallthrough
CT: control target
= control target key end

     0   :  { %s8864_s0 = inlined_call_operand.hbm [shape: bf16[16,128], index: 0, kind: input, shape index: {}]   ;;  %s8865_s1 = inlined_call_operand.hbm [shape: bf16[128,2048], index: 1, kind: input, shape index: {}]   ;;  %s8866_s2 = inlined_call_operand.hbm [shape: f32[1,2048], index: 2, kind: input, shape index: {}]   ;;  %s8867_s3 = inlined_call_operand.hbm [shape: bf16[2048,2048], index: 3, kind: input, shape index: {}]   ;;  %s8868_s4 = inlined_call_operand.hbm [shape: f32[1,2048], index: 4, kind: input, shape index: {}]   ;;  %s8869_s5 = inlined_call_operand.hbm [shape: bf16[16,2048], index: 5, kind: output, shape index: {}]  }
   0x1   :  { %8883 = sst [smem:[#allocation18_spill]] %s8865_s1 }
   0x2   :  { %8884 = sst [smem:[#allocation19_spill]] %s8867_s3 }
   0x3   :  { %10 = vsyncpa [#allocation3], 0 }
   0x4   :  { %11 = vsyncpa [#allocation6], 0 }
   0x5   :  { %12 = vsyncpa [#allocation9], 0 }
   0x6   :  { %14 = vsyncpa [#allocation9 + $0x1], 0 }
   0x7   :  { %15 = vsyncpa [#allocation4], 0 }
   0x8   :  { %17 = vsyncpa [#allocation4 + $0x1], 0  ;;  %s7710_s18 = smov 0   ;;  %s7712_s19 = smov 0  }
   0x9   :  { %s7714_s20 = smov 0   ;;  %s7716_s21 = smov 0  }
   0xa LB: > { %s7731_s22 = sadd.s32 4294967295, %s7663_s21   ;;  %s5780_s23 = sadd.s32 4294967294, %s7663_s21   ;;  %s7663_s21 = sphi %s7716_s21, %s8913_s21   ;;  %s7659_s20 = sphi %s7714_s20, %s8917_s20   ;;  %s7655_s19 = sphi %s7712_s19, %s8916_s19   ;;  %s7651_s18 = sphi %s7710_s18, %s8915_s18  }
   0xb   : > { %s7735_s24 = sadd.s32 1, %s7663_s21   ;;  %s93_s25 = sadd.s32 1, %s7659_s20 }
   0xc   : > { %8885 = sst [smem:[#allocation16_spill]] %s7735_s24  ;;  %s90_s26 = ssub.s32 %s7663_s21, %s7735_s24 }
   0xd   : > { %p100_p0 = scmp.ne.s32.totalorder %s7659_s20, %s7655_s19  ;;  %p91_p1 = scmp.eq.s32.totalorder %s90_s26, 0 }
   0xe   : > { %p101_p2 = scmp.eq.s32.totalorder %s7663_s21, 0  ;;  %p106_p3 = scmp.ne.s32.totalorder %s7655_s19, %s7651_s18 }
   0xf   : > { %p8870_p4 = scmp.eq.s32.totalorder %s7731_s22, 0  ;;  %p156_p7 = scmp.eq.s32.totalorder %s7731_s22, 3 }
  0x10   : > { %s7747_s27 = scalar_select %p91_p1, %s7659_s20, %s93_s25  }
  0x11   : > { %p7749_p5 = por %p101_p2, %p100_p0  ;;  %p7755_p6 = por %p8870_p4, %p106_p3 }
  0x12   : > { %8886 = sst [smem:[#allocation17_spill]] %s7747_s27  ;;  %p162_p8 = scmp.eq.s32.totalorder %s5780_s23, 3 }
  0x13   : > { %s8887_s28 = scalar_select %p7749_p5, 1, 0 }
  0x14   : > { %s8888_s29 = scalar_select %p7755_p6, 1, 0 }
  0x15   : > { %p5781_p9 = scmp.ge.s32.totalorder %s7663_s21, 1  ;;  %p169_p10 = scmp.lt.s32.totalorder %s7663_s21, 5 }
  0x16   : > { %p7762_p11 = por %p156_p7, %p100_p0  ;;  %p7766_p12 = por %p162_p8, %p106_p3 }
  0x17   : > { %p7770_p13 = pnand %p5781_p9, %p169_p10  ;;  %s7665_s8 = smov [#allocation5]  }
  0x18   : > { %s8889_s30 = scalar_select %p7762_p11, 1, 0 }
  0x19   : > { %s8890_s6 = scalar_select %p7766_p12, 1, 0 }
  0x1a   : > { %s8891_s7 = scalar_select %p7770_p13, 1, 0 }
  0x1b   : > { %p6538_p1 = pneg %p7770_p13  ;;  %s194_s9 = sshll.u32 %s7665_s8, 4  ;;  %s195_s9 = int_to_ptr.vmem [resolvable:$true] %s194_s9 }
  0x1c   : > { %s219_s11 = sand.u32 1, %s7663_s21   ;;  %s8893_s1 = sld [smem:[#allocation18_spill]] }
  0x1d   : > { %p7778_p2 = pnand %p6538_p1, %p8870_p4 }
  0x1f   : > { %s8892_s10 = scalar_select %p7778_p2, 1, 0 }
  0x20   : > { %p7792_p7 = pneg %p7778_p2 }
  0x22   : > { %s7445_s14 = scalar_lea.hbm %s8893_s1, 16384 }
  0x23   : > { %p7446_p3 = scmp.ne.s32.totalorder %s8893_s1, %s7445_s14  ;;  %p7452_p10 = scmp.lt.u32.totalorder %s7445_s14, %s8893_s1 }
  0x25   : > { %p7448_p8 = pnand %p7792_p7, %p7446_p3 }
  0x27   : > { %p7449_p9 = pneg %p7448_p8 }
  0x29   : > { %p7454_p1 = pnand %p7452_p10, %p7449_p9 }
  0x2b   : > { %7457 = shalt.err (!%p7454_p1)
}
  0x2c   : > { %s7458_s26 = scalar_lea.vmem %s195_s9, 16384  ;;  %p7466_p11 = scmp.lt.s32.totalorder %s195_s9, %s195_s9 }
  0x2d   : > { %p7459_p4 = scmp.ne.s32.totalorder %s195_s9, %s7458_s26  ;;  %p7467_p6 = scmp.lt.s32.totalorder %s7458_s26, %s7458_s26 }
  0x2f   : > { %p7461_p0 = pnand %p7459_p4, %p7792_p7  ;;  %p7468_p13 = por %p7467_p6, %p7466_p11 }
  0x31   : > { %p7462_p12 = pneg %p7461_p0 }
  0x33   : > { %p7469_p5 = pnand %p7468_p13, %p7462_p12 }
  0x35   : > { %7472 = shalt.err (!%p7469_p5)
}
  0x36   : > { %s7666_s8 = smov 1024   ;;  %s8877_s12 = smov 64  }
  0x37   : > { %6544 = dma.hbm_to_vmem [thread:$0]  (!%p7778_p2), %s8893_s1, 16384, %s195_s9, [#allocation6], %s7666_s8, %s7666_s8, %s8877_s12  }
  0x38   : > { %p8895_p4 = scmp.ne.s32.totalorder %s8887_s28, 0  ;;  %p8896_p6 = scmp.lt.s32.totalorder %s7663_s21, 4 }
  0x39   : > { %s8876_s16 = sand.u32 1, %s7659_s20   ;;  %s6449_s25 = sshll.u32 %s7663_s21, 8 }
  0x3a   : > { %p7815_p11 = pnand %p8896_p6, %p8895_p4  ;;  %s5786_s23 = sshll.u32 %s8876_s16, 12 }
  0x3b   : > { %s8898_s3 = sld [smem:[#allocation19_spill]]  ;;  %s223_s28 = scalar_lea.vmem [#allocation8], %s5786_s23 }
  0x3c   : > { %s8897_s15 = scalar_select %p7815_p11, 1, 0 }
  0x3d   : > { %s230_s9 = sshll.u32 %s223_s28, 4  ;;  %s7830_s13 = scalar_lea.sflag [#allocation9], %s219_s11  ;;  %s7828_s9 = int_to_ptr.vmem [resolvable:$true] %s230_s9 }
  0x3e   : > { %p8880_p12 = pneg %p7815_p11 }
  0x41   : > { %s7826_s24 = scalar_lea.hbm %s8898_s3, %s6449_s25  ;;  %s7478_s26 = scalar_lea.hbm %s8898_s3, 262144 }
  0x42   : > { %s7473_s14 = scalar_lea.hbm %s7826_s24, 65536  ;;  %p7479_p3 = scmp.lt.u32.totalorder %s7826_s24, %s8898_s3 }
  0x43   : > { %p7474_p5 = scmp.ne.s32.totalorder %s7826_s24, %s7473_s14  ;;  %p7480_p8 = scmp.lt.u32.totalorder %s7478_s26, %s7473_s14 }
  0x44   : > { %p7482_p10 = scmp.lt.u32.totalorder %s7473_s14, %s7826_s24 }
  0x45   : > { %p7476_p13 = pnand %p8880_p12, %p7474_p5  ;;  %p7481_p9 = por %p7480_p8, %p7479_p3 }
  0x47   : > { %p7477_p0 = pneg %p7476_p13  ;;  %p7483_p1 = por %p7482_p10, %p7481_p9 }
  0x49   : > { %p7484_p4 = pnand %p7483_p1, %p7477_p0 }
  0x4b   : > { %7487 = shalt.err (!%p7484_p4)
}
  0x4c   : > { %s7488_s11 = scalar_lea.vmem %s7828_s9, 65536  ;;  %s7668_s23 = smov [#allocation8]  }
  0x4d   : > { %p7489_p6 = scmp.ne.s32.totalorder %s7828_s9, %s7488_s11  ;;  %s7493_s28 = sshll.u32 %s7668_s23, 4  ;;  %s7494_s28 = int_to_ptr.vmem [resolvable:$false] %s7493_s28 }
  0x4e   : > { %s7495_s12 = scalar_lea.vmem %s7494_s28, 131072  ;;  %p7496_p2 = scmp.lt.s32.totalorder %s7828_s9, %s7494_s28 }
  0x4f   : > { %p7491_p5 = pnand %p7489_p6, %p8880_p12  ;;  %p7497_p3 = scmp.lt.s32.totalorder %s7495_s12, %s7488_s11 }
  0x51   : > { %p7492_p13 = pneg %p7491_p5  ;;  %p7498_p8 = por %p7497_p3, %p7496_p2 }
  0x53   : > { %p7499_p9 = pnand %p7498_p8, %p7492_p13 }
  0x55   : > { %7502 = shalt.err (!%p7499_p9)
}
  0x56   : > { %s7669_s16 = smov 256   ;;  %s7670_s14 = smov 16  }
  0x57   : > { %6551 = dma.hbm_to_vmem [thread:$0]  (!%p7815_p11), %s7826_s24, 65536, %s7828_s9, %s7830_s13, %s7666_s8, %s7669_s16, %s7670_s14  }
  0x58   : > { %s7671_s27 = smov [#allocation2]   ;;  %s7503_s11 = scalar_lea.hbm %s8864_s0, 128 }
  0x59   : > { %s181_s25 = sshll.u32 %s7671_s27, 4  ;;  %p7504_p2 = scmp.ne.s32.totalorder %s8864_s0, %s7503_s11  ;;  %s182_s25 = int_to_ptr.vmem [resolvable:$true] %s181_s25 }
  0x5a   : > { %p7510_p1 = scmp.lt.u32.totalorder %s7503_s11, %s8864_s0 }
  0x5b   : > { %p7506_p0 = pnand %p7504_p2, %p7792_p7 }
  0x5d   : > { %p7507_p10 = pneg %p7506_p0 }
  0x5f   : > { %p7512_p4 = pnand %p7510_p1, %p7507_p10 }
  0x61   : > { %7515 = shalt.err (!%p7512_p4)
}
  0x62   : > { %s7516_s24 = scalar_lea.vmem %s182_s25, 128  ;;  %p7524_p3 = scmp.lt.s32.totalorder %s182_s25, %s182_s25 }
  0x63   : > { %p7517_p6 = scmp.ne.s32.totalorder %s182_s25, %s7516_s24  ;;  %p7525_p8 = scmp.lt.s32.totalorder %s7516_s24, %s7516_s24 }
  0x65   : > { %p7519_p5 = pnand %p7517_p6, %p7792_p7  ;;  %p7526_p9 = por %p7525_p8, %p7524_p3 }
  0x67   : > { %p7520_p13 = pneg %p7519_p5 }
  0x69   : > { %p7527_p12 = pnand %p7526_p9, %p7520_p13 }
  0x6b   : > { %7530 = shalt.err (!%p7527_p12)
}
  0x6c   : > { %s7672_s8 = smov 4   ;;  %p8899_p2 = scmp.ne.s32.totalorder %s8892_s10, 0 }
  0x6d   : > { %s8900_s9 = smov 64   ;;  %s7673_s16 = smov [#allocation7]  }
  0x6e   : > { %6541 = dma.hbm_to_vmem [thread:$0]  (!%p8899_p2), %s8864_s0, 128, %s182_s25, [#allocation3], %s8900_s9, %s8900_s9, %s7672_s8  }
  0x6f   : > { %s208_s14 = sshll.u32 %s7673_s16, 4  ;;  %s8901_s27 = sand.u32 1, %s7659_s20   ;;  %s209_s14 = int_to_ptr.vmem [resolvable:$true] %s208_s14 }
  0x70   : > { %s5789_s26 = sshll.u32 %s8901_s27, 2  ;;  %s7531_s28 = scalar_lea.hbm %s8866_s2, 256 }
  0x71   : > { %p7532_p12 = scmp.ne.s32.totalorder %s8866_s2, %s7531_s28  ;;  %p7538_p1 = scmp.lt.u32.totalorder %s7531_s28, %s8866_s2 }
  0x73   : > { %p7534_p0 = pnand %p7532_p12, %p7792_p7 }
  0x75   : > { %p7535_p10 = pneg %p7534_p0 }
  0x77   : > { %p7540_p4 = pnand %p7538_p1, %p7535_p10 }
  0x79   : > { %7543 = shalt.err (!%p7540_p4)
}
  0x7a   : > { %s7544_s25 = scalar_lea.vmem %s209_s14, 256  ;;  %p7552_p3 = scmp.lt.s32.totalorder %s209_s14, %s209_s14 }
  0x7b   : > { %p7545_p6 = scmp.ne.s32.totalorder %s209_s14, %s7544_s25  ;;  %p7553_p8 = scmp.lt.s32.totalorder %s7544_s25, %s7544_s25 }
  0x7d   : > { %p7547_p5 = pnand %p7545_p6, %p7792_p7  ;;  %p7554_p9 = por %p7553_p8, %p7552_p3 }
  0x7f   : > { %p7548_p13 = pneg %p7547_p5 }
  0x81   : > { %p7555_p11 = pnand %p7554_p9, %p7548_p13 }
  0x83   : > { %7558 = shalt.err (!%p7555_p11)
}
  0x84   : > { %6547 = dma.hbm_to_vmem [thread:$0]  (!%p8899_p2), %s8866_s2, 256, %s209_s14, [#allocation6]  }
  0x85   : > { %s6450_s16 = sshll.u32 %s7663_s21, 6  ;;  %s244_s27 = scalar_lea.vmem [#allocation10], %s5789_s26 }
  0x86   : > { %s252_s23 = sshll.u32 %s244_s27, 4  ;;  %s250_s28 = scalar_lea.hbm %s8868_s4, %s6450_s16  ;;  %s253_s23 = int_to_ptr.vmem [resolvable:$true] %s252_s23 }
  0x87   : > { %s7559_s12 = scalar_lea.hbm %s250_s28, 64  ;;  %p8902_p12 = scmp.ne.s32.totalorder %s8897_s15, 0 }
  0x88   : > { %p7560_p7 = scmp.ne.s32.totalorder %s250_s28, %s7559_s12  ;;  %s7564_s1 = scalar_lea.hbm %s8868_s4, 256 }
  0x89   : > { %p8903_p11 = pneg %p8902_p12  ;;  %p7565_p2 = scmp.lt.u32.totalorder %s250_s28, %s8868_s4 }
  0x8a   : > { %p7566_p1 = scmp.lt.u32.totalorder %s7564_s1, %s7559_s12  ;;  %p7568_p6 = scmp.lt.u32.totalorder %s7559_s12, %s250_s28 }
  0x8b   : > { %p7562_p0 = pnand %p7560_p7, %p8903_p11 }
  0x8c   : > { %p7567_p4 = por %p7566_p1, %p7565_p2 }
  0x8d   : > { %p7563_p10 = pneg %p7562_p0 }
  0x8e   : > { %p7569_p5 = por %p7568_p6, %p7567_p4 }
  0x90   : > { %p7570_p13 = pnand %p7569_p5, %p7563_p10 }
  0x92   : > { %7573 = shalt.err (!%p7570_p13)
}
  0x93   : > { %s7574_s26 = scalar_lea.vmem %s253_s23, 64  ;;  %p8904_p8 = pmov %p8903_p11 }
  0x94   : > { %p7575_p3 = scmp.ne.s32.totalorder %s253_s23, %s7574_s26  ;;  %s7674_s25 = smov [#allocation10]  }
  0x95   : > { %s7579_s8 = sshll.u32 %s7674_s25, 4  ;;  %s7580_s8 = int_to_ptr.vmem [resolvable:$false] %s7579_s8 }
  0x96   : > { %p7577_p9 = pnand %p7575_p3, %p8904_p8  ;;  %s7581_s9 = scalar_lea.vmem %s7580_s8, 128 }
  0x97   : > { %p7582_p11 = scmp.lt.s32.totalorder %s253_s23, %s7580_s8  ;;  %p7583_p0 = scmp.lt.s32.totalorder %s7581_s9, %s7574_s26 }
  0x98   : > { %p7578_p7 = pneg %p7577_p9 }
  0x99   : > { %p7584_p1 = por %p7583_p0, %p7582_p11 }
  0x9b   : > { %p7585_p2 = pnand %p7584_p1, %p7578_p7 }
  0x9d   : > { %7588 = shalt.err (!%p7585_p2)
}
  0x9e   : > { %6554 = dma.hbm_to_vmem [thread:$0]  (!%p8902_p12), %s250_s28, 64, %s253_s23, %s7830_s13  }
  0x9f   : > { %p8905_p10 = scmp.ne.s32.totalorder %s8891_s7, 0 }
  0xa0   : > { %p8906_p4 = scmp.eq.s32.totalorder (!%p8905_p10), %s7731_s22, 0 }
  0xa1   : > { %261 = sbr.rel (%p8905_p10) target bundleno = 1142 (0x476), region = 40 }
  0xa8   : > { %7634 = dma.done.wait (%p8906_p4), [#allocation3], 128   ;;  %p8907_p6 = pmov %p8906_p4 }
  0xa9   : > { %p8908_p5 = pmov %p8906_p4 }
  0xaa   : > { %7636 = vsyncadd (%p8907_p6), [#allocation3], 4294967168 }
  0xab   : > { %7638 = dma.done.wait (%p8908_p5), [#allocation6], 16640   ;;  %p8909_p13 = pmov %p8906_p4 }
  0xac   : > { %s275_s15 = sand.u32 1, %s7731_s22   ;;  %s7930_s13 = sand.u32 1, %s7655_s19  }
  0xad   : > { %7640 = vsyncadd (%p8909_p13), [#allocation6], 4294950656  ;;  %s5796_s7 = sshll.u32 %s7930_s13, 12  ;;  %s276_s16 = scalar_lea.sflag [#allocation9], %s275_s15 }
  0xae   : > { %s7933_s27 = scalar_lea.vmem [#allocation8], %s5796_s7  ;;  %p8910_p12 = scmp.ne.s32.totalorder %s8888_s29, 0 }
  0xb0   : > { %7642 = dma.done.wait (%p8910_p12), %s276_s16, 65600  }
  0xb1   : > { %7644 = vsyncadd (%p8910_p12), %s276_s16, 4294901696  ;;  %v7675_v0 = vmov 0   ;;  %v326_v1 = vld [vmem:[#allocation5] sm:$0xff]  ;;  %v327_v14 = vld [vmem:[#allocation5 + $0x8] sm:$0xff]  ;;  %s5797_s29 = sshll.u32 %s7930_s13, 2  ;;  %s5798_s11 = sshll.u32 %s7930_s13, 5 }
  0xb2   : > { %1216 = vmatprep.mubr.bf16.mxu0 %v7675_v0  ;;  %1259 = vmatprep.mubr.bf16.mxu1 %v7675_v0  ;;  %v334_v2 = vld [vmem:[#allocation5 + $0x40] sm:$0xff]  ;;  %v335_v15 = vld [vmem:[#allocation5 + $0x48] sm:$0xff]  ;;  %v328_v58 = vld [vmem:[#allocation5 + $0x10] sm:$0xff]  ;;  %s288_s23 = scalar_lea.vmem [#allocation10], %s5797_s29  ;;  %s319_s17 = scalar_lea.vmem [#allocation11], %s5798_s11 }
  0xb3   : > { %v342_v3 = vld [vmem:[#allocation5 + $0x80] sm:$0xff]  ;;  %v5801_v4 = vcombine.high %v326_v1, %v334_v2  ;;  %v5800_v5 = vcombine.low %v326_v1, %v334_v2  ;;  %v5803_v16 = vcombine.high %v327_v14, %v335_v15  ;;  %v5802_v17 = vcombine.low %v327_v14, %v335_v15  ;;  %v343_v18 = vld [vmem:[#allocation5 + $0x88] sm:$0xff]  ;;  %v336_v59 = vld [vmem:[#allocation5 + $0x50] sm:$0xff]  ;;  %s5656_s28 = sshll.u32 %s319_s17, 4  ;;  %s6455_s12 = sshll.u32 %s7731_s22, 8  ;;  %s8816_s28 = int_to_ptr.vmem [resolvable:$true] %s5656_s28 }
  0xb4   : > { %v350_v6 = vld [vmem:[#allocation5 + $0xc0] sm:$0xff]  ;;  %v351_v19 = vld [vmem:[#allocation5 + $0xc8] sm:$0xff]  ;;  %v5805_v1 = vcombine.high %v328_v58, %v336_v59  ;;  %s8821_s1 = scalar_lea.hbm %s8869_s5, %s6455_s12  ;;  %s5643_s22 = scalar_lea.sflag [#allocation4], %s7930_s13 }
  0xb5   : > { %v5817_v7 = vcombine.high %v342_v3, %v350_v6  ;;  %v358_v8 = vld [vmem:[#allocation5 + $0x100] sm:$0xff]  ;;  %1184 = vmatprep.subr.bf16.mxu0 %v5801_v4  ;;  %v5816_v10 = vcombine.low %v342_v3, %v350_v6  ;;  %v5819_v21 = vcombine.high %v343_v18, %v351_v19  ;;  %v359_v22 = vld [vmem:[#allocation5 + $0x108] sm:$0xff]  ;;  %1227 = vmatprep.subr.bf16.mxu1 %v5803_v16  ;;  %v344_v3 = vld [vmem:[#allocation5 + $0x90] sm:$0xff]  ;;  %s7589_s3 = scalar_lea.vmem %s8816_s28, 512  ;;  %p8911_p8 = scmp.ne.s32.totalorder %s8889_s30, 0 }
  0xb6   : > { %v366_v9 = vld [vmem:[#allocation5 + $0x140] sm:$0xff]  ;;  %1185 = vmatpush1.bf16.msra.mxu0 %v5800_v5  ;;  %v367_v23 = vld [vmem:[#allocation5 + $0x148] sm:$0xff]  ;;  %1228 = vmatpush1.bf16.msra.mxu1 %v5802_v17  ;;  %v5818_v27 = vcombine.low %v343_v18, %v351_v19  ;;  %v352_v4 = vld [vmem:[#allocation5 + $0xd0] sm:$0xff]  ;;  %p7590_p3 = scmp.ne.s32.totalorder %s8816_s28, %s7589_s3  ;;  %s7676_s14 = smov [#allocation11]  }
  0xb7   : > { %1186 = vmatprep.subr.bf16.mxu0 %v5817_v7  ;;  %v5833_v11 = vcombine.high %v358_v8, %v366_v9  ;;  %v374_v12 = vld [vmem:[#allocation5 + $0x180] sm:$0xff]  ;;  %v5832_v20 = vcombine.low %v358_v8, %v366_v9  ;;  %1229 = vmatprep.subr.bf16.mxu1 %v5819_v21  ;;  %v5835_v28 = vcombine.high %v359_v22, %v367_v23  ;;  %v375_v30 = vld [vmem:[#allocation5 + $0x188] sm:$0xff]  ;;  %v7941_v5 = vld [vmem:[#allocation2] sm:$0xff]   ;;  %s7593_s26 = sshll.u32 %s7676_s14, 4  ;;  %s7594_s26 = int_to_ptr.vmem [resolvable:$false] %s7593_s26 }
  0xb8   : > { %v382_v13 = vld [vmem:[#allocation5 + $0x1c0] sm:$0xff]  ;;  %v383_v31 = vld [vmem:[#allocation5 + $0x1c8] sm:$0xff]  ;;  %v5834_v35 = vcombine.low %v359_v22, %v367_v23  ;;  %v5804_v7 = vcombine.low %v328_v58, %v336_v59  ;;  %v329_v8 = vld [vmem:[#allocation5 + $0x18] sm:$0xff]  ;;  %v5820_v15 = vcombine.low %v344_v3, %v352_v4  ;;  %p7591_p9 = pnand %p7590_p3, %p8911_p8  ;;  %s7595_s25 = scalar_lea.vmem %s7594_s26, 1024 }
  0xb9   : > { %v5849_v24 = vcombine.high %v374_v12, %v382_v13  ;;  %v390_v25 = vld [vmem:[#allocation5 + $0x200] sm:$0xff]  ;;  %v5848_v29 = vcombine.low %v374_v12, %v382_v13  ;;  %v5851_v36 = vcombine.high %v375_v30, %v383_v31  ;;  %v391_v38 = vld [vmem:[#allocation5 + $0x208] sm:$0xff]  ;;  %v5850_v43 = vcombine.low %v375_v30, %v383_v31  ;;  %v337_v9 = vld [vmem:[#allocation5 + $0x58] sm:$0xff]  ;;  %p7596_p11 = scmp.lt.s32.totalorder %s8816_s28, %s7594_s26  ;;  %p7597_p0 = scmp.lt.s32.totalorder %s7595_s25, %s7589_s3 }
  0xba   : > { %1187 = vmatpush1.bf16.msra.mxu0 %v5816_v10  ;;  %v398_v26 = vld [vmem:[#allocation5 + $0x240] sm:$0xff]  ;;  %1230 = vmatpush1.bf16.msra.mxu1 %v5818_v27  ;;  %v399_v39 = vld [vmem:[#allocation5 + $0x248] sm:$0xff]  ;;  %v5821_v10 = vcombine.high %v344_v3, %v352_v4  ;;  %v360_v12 = vld [vmem:[#allocation5 + $0x110] sm:$0xff]  ;;  %v5807_v14 = vcombine.high %v329_v8, %v337_v9  ;;  %v5806_v19 = vcombine.low %v329_v8, %v337_v9  ;;  %p7592_p7 = pneg %p7591_p9 }
  0xbb   : > { %1188 = vmatprep.subr.bf16.mxu0 %v5833_v11  ;;  %v5865_v32 = vcombine.high %v390_v25, %v398_v26  ;;  %v406_v33 = vld [vmem:[#allocation5 + $0x280] sm:$0xff]  ;;  %1231 = vmatprep.subr.bf16.mxu1 %v5835_v28  ;;  %v5864_v37 = vcombine.low %v390_v25, %v398_v26  ;;  %v5867_v44 = vcombine.high %v391_v38, %v399_v39  ;;  %v407_v46 = vld [vmem:[#allocation5 + $0x288] sm:$0xff]  ;;  %v368_v13 = vld [vmem:[#allocation5 + $0x150] sm:$0xff]  ;;  %p7598_p1 = por %p7597_p0, %p7596_p11 }
  0xbc   : > { %v414_v34 = vld [vmem:[#allocation5 + $0x2c0] sm:$0xff]  ;;  %v415_v47 = vld [vmem:[#allocation5 + $0x2c8] sm:$0xff]  ;;  %v5866_v51 = vcombine.low %v391_v38, %v399_v39  ;;  %v345_v16 = vld [vmem:[#allocation5 + $0x98] sm:$0xff]  ;;  %v5837_v18 = vcombine.high %v360_v12, %v368_v13  ;;  %v5836_v23 = vcombine.low %v360_v12, %v368_v13 }
  0xbd   : > { %v5881_v40 = vcombine.high %v406_v33, %v414_v34  ;;  %v422_v41 = vld [vmem:[#allocation5 + $0x300] sm:$0xff]  ;;  %v5880_v45 = vcombine.low %v406_v33, %v414_v34  ;;  %v5883_v52 = vcombine.high %v407_v46, %v415_v47  ;;  %v423_v54 = vld [vmem:[#allocation5 + $0x308] sm:$0xff]  ;;  %v5882_v57 = vcombine.low %v407_v46, %v415_v47  ;;  %v353_v17 = vld [vmem:[#allocation5 + $0xd8] sm:$0xff]  ;;  %p7599_p2 = pnand %p7598_p1, %p7592_p7 }
  0xbe   : > { %1189 = vmatpush1.bf16.msra.mxu0 %v5832_v20  ;;  %v430_v42 = vld [vmem:[#allocation5 + $0x340] sm:$0xff]  ;;  %1232 = vmatpush1.bf16.msra.mxu1 %v5834_v35  ;;  %v431_v55 = vld [vmem:[#allocation5 + $0x348] sm:$0xff]  ;;  %v376_v20 = vld [vmem:[#allocation5 + $0x190] sm:$0xff]  ;;  %v5823_v22 = vcombine.high %v345_v16, %v353_v17  ;;  %v5822_v27 = vcombine.low %v345_v16, %v353_v17 }
  0xbf   : > { %1190 = vmatprep.subr.bf16.mxu0 %v5849_v24  ;;  %1233 = vmatprep.subr.bf16.mxu1 %v5851_v36  ;;  %v5897_v48 = vcombine.high %v422_v41, %v430_v42  ;;  %v438_v49 = vld [vmem:[#allocation5 + $0x380] sm:$0xff]  ;;  %v5896_v53 = vcombine.low %v422_v41, %v430_v42  ;;  %v5899_v60 = vcombine.high %v423_v54, %v431_v55  ;;  %v439_v62 = vld [vmem:[#allocation5 + $0x388] sm:$0xff]  ;;  %v384_v21 = vld [vmem:[#allocation5 + $0x1d0] sm:$0xff] }
  0xc0   : > { %v446_v50 = vld [vmem:[#allocation5 + $0x3c0] sm:$0xff]  ;;  %v447_v63 = vld [vmem:[#allocation5 + $0x3c8] sm:$0xff]  ;;  %v5898_v2 = vcombine.low %v423_v54, %v431_v55  ;;  %v361_v24 = vld [vmem:[#allocation5 + $0x118] sm:$0xff]  ;;  %v5853_v26 = vcombine.high %v376_v20, %v384_v21  ;;  %v5852_v31 = vcombine.low %v376_v20, %v384_v21 }
  0xc1   : > { %v5913_v56 = vcombine.high %v438_v49, %v446_v50  ;;  %v5912_v61 = vcombine.low %v438_v49, %v446_v50  ;;  %v5915_v6 = vcombine.high %v439_v62, %v447_v63  ;;  %v5914_v11 = vcombine.low %v439_v62, %v447_v63  ;;  %v369_v25 = vld [vmem:[#allocation5 + $0x158] sm:$0xff]  ;;  %v392_v28 = vld [vmem:[#allocation5 + $0x210] sm:$0xff]  ;;  %v330_v59 = vld [vmem:[#allocation5 + $0x20] sm:$0xff] }
  0xc2   : > { %1191 = vmatpush1.bf16.msra.mxu0 %v5848_v29  ;;  %1234 = vmatpush1.bf16.msra.mxu1 %v5850_v43  ;;  %v400_v29 = vld [vmem:[#allocation5 + $0x250] sm:$0xff]  ;;  %v5839_v30 = vcombine.high %v361_v24, %v369_v25  ;;  %v385_v33 = vld [vmem:[#allocation5 + $0x1d8] sm:$0xff]  ;;  %v5838_v36 = vcombine.low %v361_v24, %v369_v25  ;;  %v346_v4 = vld [vmem:[#allocation5 + $0xa0] sm:$0xff] }
  0xc3   : > { %1192 = vmatprep.subr.bf16.mxu0 %v5865_v32  ;;  %1235 = vmatprep.subr.bf16.mxu1 %v5867_v44  ;;  %v377_v32 = vld [vmem:[#allocation5 + $0x198] sm:$0xff]  ;;  %v5869_v34 = vcombine.high %v392_v28, %v400_v29  ;;  %v408_v35 = vld [vmem:[#allocation5 + $0x290] sm:$0xff]  ;;  %v5868_v39 = vcombine.low %v392_v28, %v400_v29  ;;  %v331_v9 = vld [vmem:[#allocation5 + $0x28] sm:$0xff] }
  0xc4   : > { %v5855_v38 = vcombine.high %v377_v32, %v385_v33  ;;  %v401_v41 = vld [vmem:[#allocation5 + $0x258] sm:$0xff]  ;;  %v424_v43 = vld [vmem:[#allocation5 + $0x310] sm:$0xff]  ;;  %v5854_v44 = vcombine.low %v377_v32, %v385_v33  ;;  %v362_v12 = vld [vmem:[#allocation5 + $0x120] sm:$0xff] }
  0xc5   : > { %v417_v49 = vld [vmem:[#allocation5 + $0x2d8] sm:$0xff]  ;;  %v347_v16 = vld [vmem:[#allocation5 + $0xa8] sm:$0xff]  ;;  %v378_v20 = vld [vmem:[#allocation5 + $0x1a0] sm:$0xff] }
  0xc6   : > { %1193 = vmatpush1.bf16.msra.mxu0 %v5864_v37  ;;  %1236 = vmatpush1.bf16.msra.mxu1 %v5866_v51  ;;  %v416_v37 = vld [vmem:[#allocation5 + $0x2d0] sm:$0xff]  ;;  %v355_v17 = vld [vmem:[#allocation5 + $0xe8] sm:$0xff]  ;;  %v386_v21 = vld [vmem:[#allocation5 + $0x1e0] sm:$0xff] }
  0xc7   : > { %1194 = vmatprep.subr.bf16.mxu0 %v5881_v40  ;;  %1237 = vmatprep.subr.bf16.mxu1 %v5883_v52  ;;  %v393_v40 = vld [vmem:[#allocation5 + $0x218] sm:$0xff]  ;;  %v5885_v42 = vcombine.high %v408_v35, %v416_v37  ;;  %v5884_v47 = vcombine.low %v408_v35, %v416_v37  ;;  %v440_v51 = vld [vmem:[#allocation5 + $0x390] sm:$0xff]  ;;  %v363_v24 = vld [vmem:[#allocation5 + $0x128] sm:$0xff]  ;;  %v5856_v35 = vcombine.low %v378_v20, %v386_v21 }
  0xc8   : > { %v5871_v46 = vcombine.high %v393_v40, %v401_v41  ;;  %v5870_v52 = vcombine.low %v393_v40, %v401_v41  ;;  %v371_v25 = vld [vmem:[#allocation5 + $0x168] sm:$0xff]  ;;  %v394_v28 = vld [vmem:[#allocation5 + $0x220] sm:$0xff] }
  0xc9   : > { %v402_v29 = vld [vmem:[#allocation5 + $0x260] sm:$0xff]  ;;  %v379_v32 = vld [vmem:[#allocation5 + $0x1a8] sm:$0xff] }
  0xca   : > { %1195 = vmatpush1.bf16.msra.mxu0 %v5880_v45  ;;  %1238 = vmatpush1.bf16.msra.mxu1 %v5882_v57  ;;  %v432_v45 = vld [vmem:[#allocation5 + $0x350] sm:$0xff]  ;;  %v433_v57 = vld [vmem:[#allocation5 + $0x358] sm:$0xff]  ;;  %v387_v33 = vld [vmem:[#allocation5 + $0x1e8] sm:$0xff] }
  0xcb   : > { %1196 = vmatprep.subr.bf16.mxu0 %v5897_v48  ;;  %1239 = vmatprep.subr.bf16.mxu1 %v5899_v60  ;;  %v409_v48 = vld [vmem:[#allocation5 + $0x298] sm:$0xff]  ;;  %v5901_v50 = vcombine.high %v424_v43, %v432_v45  ;;  %v5900_v55 = vcombine.low %v424_v43, %v432_v45  ;;  %v418_v37 = vld [vmem:[#allocation5 + $0x2e0] sm:$0xff]  ;;  %v395_v40 = vld [vmem:[#allocation5 + $0x228] sm:$0xff]  ;;  %v5872_v43 = vcombine.low %v394_v28, %v402_v29 }
  0xcc   : > { %v5887_v54 = vcombine.high %v409_v48, %v417_v49  ;;  %v5886_v60 = vcombine.low %v409_v48, %v417_v49  ;;  %v403_v41 = vld [vmem:[#allocation5 + $0x268] sm:$0xff]  ;;  %v434_v45 = vld [vmem:[#allocation5 + $0x360] sm:$0xff] }
  0xcd   : > { %v411_v48 = vld [vmem:[#allocation5 + $0x2a8] sm:$0xff] }
  0xce   : > { %1197 = vmatpush1.bf16.msra.mxu0 %v5896_v53  ;;  %1240 = vmatpush1.bf16.msra.mxu1 %v5898_v2  ;;  %v448_v53 = vld [vmem:[#allocation5 + $0x3d0] sm:$0xff]  ;;  %v449_v2 = vld [vmem:[#allocation5 + $0x3d8] sm:$0xff]  ;;  %v419_v49 = vld [vmem:[#allocation5 + $0x2e8] sm:$0xff] }
  0xcf   : > { %1198 = vmatprep.subr.bf16.mxu0 %v5913_v56  ;;  %1241 = vmatprep.subr.bf16.mxu1 %v5915_v6  ;;  %v425_v56 = vld [vmem:[#allocation5 + $0x318] sm:$0xff]  ;;  %v5917_v58 = vcombine.high %v440_v51, %v448_v53  ;;  %v5916_v63 = vcombine.low %v440_v51, %v448_v53  ;;  %v450_v53 = vld [vmem:[#allocation5 + $0x3e0] sm:$0xff] }
  0xd0   : > { %v5903_v62 = vcombine.high %v425_v56, %v433_v57  ;;  %v5902_v6 = vcombine.low %v425_v56, %v433_v57  ;;  %v427_v56 = vld [vmem:[#allocation5 + $0x328] sm:$0xff] }
  0xd1   : > { %v435_v57 = vld [vmem:[#allocation5 + $0x368] sm:$0xff] }
  0xd2   : > { %1199 = vmatpush1.bf16.msra.mxu0 %v5912_v61  ;;  %1242 = vmatpush1.bf16.msra.mxu1 %v5914_v11  ;;  %v338_v61 = vld [vmem:[#allocation5 + $0x60] sm:$0xff]  ;;  %v339_v11 = vld [vmem:[#allocation5 + $0x68] sm:$0xff] }
  0xd3   : > { %1270 = vmatprep.subr.bf16.mxu0 %v5805_v1  ;;  %1313 = vmatprep.subr.bf16.mxu1 %v5807_v14  ;;  %v441_v1 = vld [vmem:[#allocation5 + $0x398] sm:$0xff]  ;;  %v5809_v3 = vcombine.high %v330_v59, %v338_v61  ;;  %v370_v14 = vld [vmem:[#allocation5 + $0x160] sm:$0xff] }
  0xd4   : > { %v5919_v8 = vcombine.high %v441_v1, %v449_v2 }
  0xd5   : > { %1217 = vmatmul.mubr.bf16.vlgmr.msra.gmra.mrb[0].mxu0 %v7941_v5  ;;  %1260 = vmatmul.mubr.bf16.vlgmr.msra.gmra.mrb[0].mxu1 %v7941_v5 }
  0xd6   : > { %1271 = vmatpush1.bf16.msra.mxu0 %v5804_v7  ;;  %1302 = vmatprep.mubr.bf16.mxu0 %v7675_v0  ;;  %v354_v7 = vld [vmem:[#allocation5 + $0xe0] sm:$0xff] }
  0xd7   : > { %1272 = vmatprep.subr.bf16.mxu0 %v5821_v10  ;;  %1314 = vmatpush1.bf16.msra.mxu1 %v5806_v19  ;;  %v5808_v10 = vcombine.low %v330_v59, %v338_v61  ;;  %v5825_v13 = vcombine.high %v346_v4, %v354_v7  ;;  %v5824_v19 = vcombine.low %v346_v4, %v354_v7  ;;  %v340_v61 = vld [vmem:[#allocation5 + $0x70] sm:$0xff] }
  0xd8   : > { %1345 = vmatprep.mubr.bf16.mxu1 %v7675_v0  ;;  %1315 = vmatprep.subr.bf16.mxu1 %v5823_v22  ;;  %v5841_v22 = vcombine.high %v362_v12, %v370_v14  ;;  %v356_v7 = vld [vmem:[#allocation5 + $0xf0] sm:$0xff] }
  0xda   : > { %1273 = vmatpush1.bf16.msra.mxu0 %v5820_v15  ;;  %v5918_v15 = vcombine.low %v441_v1, %v449_v2  ;;  %v443_v1 = vld [vmem:[#allocation5 + $0x3a8] sm:$0xff] }
  0xdb   : > { %1274 = vmatprep.subr.bf16.mxu0 %v5837_v18  ;;  %1316 = vmatpush1.bf16.msra.mxu1 %v5822_v27  ;;  %v5811_v18 = vcombine.high %v331_v9, %v339_v11  ;;  %v5840_v27 = vcombine.low %v362_v12, %v370_v14  ;;  %v451_v2 = vld [vmem:[#allocation5 + $0x3e8] sm:$0xff]  ;;  %v364_v14 = vld [vmem:[#allocation5 + $0x130] sm:$0xff] }
  0xdc   : > { %1317 = vmatprep.subr.bf16.mxu1 %v5839_v30  ;;  %v5857_v30 = vcombine.high %v378_v20, %v386_v21  ;;  %v5923_v12 = vcombine.high %v443_v1, %v451_v2 }
  0xde   : > { %1275 = vmatpush1.bf16.msra.mxu0 %v5836_v23  ;;  %v5810_v23 = vcombine.low %v331_v9, %v339_v11  ;;  %v5906_v9 = vcombine.low %v427_v56, %v435_v57  ;;  %v341_v11 = vld [vmem:[#allocation5 + $0x78] sm:$0xff] }
  0xdf   : > { %1276 = vmatprep.subr.bf16.mxu0 %v5853_v26  ;;  %1318 = vmatpush1.bf16.msra.mxu1 %v5838_v36  ;;  %v5827_v26 = vcombine.high %v347_v16, %v355_v17  ;;  %v410_v36 = vld [vmem:[#allocation5 + $0x2a0] sm:$0xff] }
  0xe0   : > { %1319 = vmatprep.subr.bf16.mxu1 %v5855_v38  ;;  %v5873_v38 = vcombine.high %v394_v28, %v402_v29  ;;  %v5888_v51 = vcombine.low %v410_v36, %v418_v37 }
  0xe2   : > { %1277 = vmatpush1.bf16.msra.mxu0 %v5852_v31  ;;  %v5826_v31 = vcombine.low %v347_v16, %v355_v17  ;;  %v5922_v17 = vcombine.low %v443_v1, %v451_v2 }
  0xe3   : > { %1278 = vmatprep.subr.bf16.mxu0 %v5869_v34  ;;  %1320 = vmatpush1.bf16.msra.mxu1 %v5854_v44  ;;  %v5843_v34 = vcombine.high %v363_v24, %v371_v25  ;;  %v426_v44 = vld [vmem:[#allocation5 + $0x320] sm:$0xff] }
  0xe4   : > { %1321 = vmatprep.subr.bf16.mxu1 %v5871_v46  ;;  %v5889_v46 = vcombine.high %v410_v36, %v418_v37  ;;  %v5904_v59 = vcombine.low %v426_v44, %v434_v45 }
  0xe6   : > { %1279 = vmatpush1.bf16.msra.mxu0 %v5868_v39  ;;  %v5842_v39 = vcombine.low %v363_v24, %v371_v25 }
  0xe7   : > { %1280 = vmatprep.subr.bf16.mxu0 %v5885_v42  ;;  %1322 = vmatpush1.bf16.msra.mxu1 %v5870_v52  ;;  %v5859_v42 = vcombine.high %v379_v32, %v387_v33  ;;  %v442_v52 = vld [vmem:[#allocation5 + $0x3a0] sm:$0xff] }
  0xe8   : > { %1323 = vmatprep.subr.bf16.mxu1 %v5887_v54  ;;  %v5905_v54 = vcombine.high %v426_v44, %v434_v45  ;;  %v5920_v4 = vcombine.low %v442_v52, %v450_v53  ;;  %v428_v45 = vld [vmem:[#allocation5 + $0x330] sm:$0xff] }
  0xea   : > { %1281 = vmatpush1.bf16.msra.mxu0 %v5884_v47  ;;  %v5858_v47 = vcombine.low %v379_v32, %v387_v33 }
  0xeb   : > { %1282 = vmatprep.subr.bf16.mxu0 %v5901_v50  ;;  %1324 = vmatpush1.bf16.msra.mxu1 %v5886_v60  ;;  %v5875_v50 = vcombine.high %v395_v40, %v403_v41  ;;  %v332_v60 = vld [vmem:[#allocation5 + $0x30] sm:$0xff] }
  0xec   : > { %1325 = vmatprep.subr.bf16.mxu1 %v5903_v62  ;;  %v5921_v62 = vcombine.high %v442_v52, %v450_v53 }
  0xee   : > { %1283 = vmatpush1.bf16.msra.mxu0 %v5900_v55  ;;  %v5874_v55 = vcombine.low %v395_v40, %v403_v41 }
  0xef   : > { %1284 = vmatprep.subr.bf16.mxu0 %v5917_v58  ;;  %1326 = vmatpush1.bf16.msra.mxu1 %v5902_v6  ;;  %v5891_v58 = vcombine.high %v411_v48, %v419_v49  ;;  %v348_v6 = vld [vmem:[#allocation5 + $0xb0] sm:$0xff] }
  0xf0   : > { %1327 = vmatprep.subr.bf16.mxu1 %v5919_v8  ;;  %v5813_v8 = vcombine.high %v332_v60, %v340_v61  ;;  %v5829_v16 = vcombine.high %v348_v6, %v356_v7  ;;  %v5828_v21 = vcombine.low %v348_v6, %v356_v7  ;;  %v6612_v6 = vld [vmem:[%s7933_s27] ss:$16 sps:$4 sm:$0xff]  }
  0xf2   : > { %1285 = vmatpush1.bf16.msra.mxu0 %v5916_v63  ;;  %v5890_v63 = vcombine.low %v411_v48, %v419_v49  ;;  %v413_v48 = vld [vmem:[#allocation5 + $0x2b8] sm:$0xff] }
  0xf3   : > { %1356 = vmatprep.subr.bf16.mxu0 %v5809_v3  ;;  %1328 = vmatpush1.bf16.msra.mxu1 %v5918_v15  ;;  %v5907_v3 = vcombine.high %v427_v56, %v435_v57  ;;  %v372_v15 = vld [vmem:[#allocation5 + $0x170] sm:$0xff]  ;;  %v421_v49 = vld [vmem:[#allocation5 + $0x2f8] sm:$0xff] }
  0xf4   : > { %1399 = vmatprep.subr.bf16.mxu1 %v5811_v18  ;;  %v349_v18 = vld [vmem:[#allocation5 + $0xb8] sm:$0xff]  ;;  %v5845_v24 = vcombine.high %v364_v14, %v372_v15  ;;  %v5844_v29 = vcombine.low %v364_v14, %v372_v15  ;;  %v444_v56 = vld [vmem:[#allocation5 + $0x3b0] sm:$0xff] }
  0xf5   : > { %1303 = vmatmul.mubr.bf16.vlgmr.msra.gmra.mrb[4].mxu0 %v7941_v5  ;;  %v452_v57 = vld [vmem:[#allocation5 + $0x3f0] sm:$0xff]  ;;  %v6615_v14 = vld [vmem:[%s7933_s27 + $0x8] ss:$16 sps:$4 sm:$0xff]   ;;  %v6623_v15 = vld [vmem:[%s7933_s27 + $0x2c] ss:$16 sps:$4 sm:$0xff]  }
  0xf6   : > { %1357 = vmatpush1.bf16.msra.mxu0 %v5808_v10  ;;  %1388 = vmatprep.mubr.bf16.mxu0 %v7675_v0  ;;  %v333_v10 = vld [vmem:[#allocation5 + $0x38] sm:$0xff]  ;;  %v5924_v2 = vcombine.low %v444_v56, %v452_v57 }
  0xf7   : > { %1358 = vmatprep.subr.bf16.mxu0 %v5825_v13  ;;  %1346 = vmatmul.mubr.bf16.vlgmr.msra.gmra.mrb[4].mxu1 %v7941_v5  ;;  %v5812_v13 = vcombine.low %v332_v60, %v340_v61  ;;  %v5815_v20 = vcombine.high %v333_v10, %v341_v11  ;;  %v5814_v25 = vcombine.low %v333_v10, %v341_v11  ;;  %v6617_v10 = vld [vmem:[%s7933_s27 + $0xc] ss:$16 sps:$4 sm:$0xff]   ;;  %v6618_v11 = vld [vmem:[%s7933_s27 + $0x20] ss:$16 sps:$4 sm:$0xff]  }
  0xf8   : > { %1400 = vmatpush1.bf16.msra.mxu1 %v5810_v23  ;;  %1431 = vmatprep.mubr.bf16.mxu1 %v7675_v0  ;;  %v388_v23 = vld [vmem:[#allocation5 + $0x1f0] sm:$0xff]  ;;  %v5925_v60 = vcombine.high %v444_v56, %v452_v57  ;;  %v5894_v61 = vcombine.low %v413_v48, %v421_v49  ;;  %v6689_v57 = vld [vmem:[%s7933_s27 + $0x18c] ss:$16 sps:$4 sm:$0xff]  }
  0xf9   : > { %1401 = vmatprep.subr.bf16.mxu1 %v5827_v26  ;;  %v365_v26 = vld [vmem:[#allocation5 + $0x138] sm:$0xff]  ;;  %v6692_v56 = vld [vmem:[%s7933_s27 + $0x1a4] ss:$16 sps:$4 sm:$0xff]  }
  0xfa   : > { %1359 = vmatpush1.bf16.msra.mxu0 %v5824_v19  ;;  %v357_v19 = vld [vmem:[#allocation5 + $0xf8] sm:$0xff] }
  0xfb   : > { %1360 = vmatprep.subr.bf16.mxu0 %v5841_v22  ;;  %v380_v22 = vld [vmem:[#allocation5 + $0x1b0] sm:$0xff]  ;;  %v5831_v28 = vcombine.high %v349_v18, %v357_v19  ;;  %v5830_v33 = vcombine.low %v349_v18, %v357_v19  ;;  %v6629_v18 = vld [vmem:[%s7933_s27 + $0x4c] ss:$16 sps:$4 sm:$0xff]  }
  0xfc   : > { %1402 = vmatpush1.bf16.msra.mxu1 %v5826_v31  ;;  %v404_v31 = vld [vmem:[#allocation5 + $0x270] sm:$0xff]  ;;  %v5861_v32 = vcombine.high %v380_v22, %v388_v23  ;;  %v5860_v37 = vcombine.low %v380_v22, %v388_v23  ;;  %v6627_v22 = vld [vmem:[%s7933_s27 + $0x48] ss:$16 sps:$4 sm:$0xff]   ;;  %v6635_v23 = vld [vmem:[%s7933_s27 + $0x6c] ss:$16 sps:$4 sm:$0xff]  }
  0xfd   : > { %1403 = vmatprep.subr.bf16.mxu1 %v5843_v34  ;;  %v381_v34 = vld [vmem:[#allocation5 + $0x1b8] sm:$0xff]  ;;  %v6632_v19 = vld [vmem:[%s7933_s27 + $0x64] ss:$16 sps:$4 sm:$0xff]  }
  0xfe   : > { %1361 = vmatpush1.bf16.msra.mxu0 %v5840_v27  ;;  %v373_v27 = vld [vmem:[#allocation5 + $0x178] sm:$0xff] }
  0xff   : > { %1362 = vmatprep.subr.bf16.mxu0 %v5857_v30  ;;  %v396_v30 = vld [vmem:[#allocation5 + $0x230] sm:$0xff]  ;;  %v5847_v36 = vcombine.high %v365_v26, %v373_v27  ;;  %v5846_v41 = vcombine.low %v365_v26, %v373_v27  ;;  %v6633_v26 = vld [vmem:[%s7933_s27 + $0x68] ss:$16 sps:$4 sm:$0xff]   ;;  %v6641_v27 = vld [vmem:[%s7933_s27 + $0x8c] ss:$16 sps:$4 sm:$0xff]  }
 0x100   : > { %1404 = vmatpush1.bf16.msra.mxu1 %v5842_v39  ;;  %v420_v39 = vld [vmem:[#allocation5 + $0x2f0] sm:$0xff]  ;;  %v5877_v40 = vcombine.high %v396_v30, %v404_v31  ;;  %v5876_v44 = vcombine.low %v396_v30, %v404_v31  ;;  %v6647_v31 = vld [vmem:[%s7933_s27 + $0xac] ss:$16 sps:$4 sm:$0xff]  }
 0x101   : > { %1405 = vmatprep.subr.bf16.mxu1 %v5859_v42  ;;  %v397_v42 = vld [vmem:[#allocation5 + $0x238] sm:$0xff]  ;;  %v6650_v30 = vld [vmem:[%s7933_s27 + $0xc4] ss:$16 sps:$4 sm:$0xff]  }
 0x102   : > { %1363 = vmatpush1.bf16.msra.mxu0 %v5856_v35  ;;  %v389_v35 = vld [vmem:[#allocation5 + $0x1f8] sm:$0xff] }
 0x103   : > { %1364 = vmatprep.subr.bf16.mxu0 %v5873_v38  ;;  %v412_v38 = vld [vmem:[#allocation5 + $0x2b0] sm:$0xff] }
 0x104   : > { %1406 = vmatpush1.bf16.msra.mxu1 %v5858_v47  ;;  %v5862_v47 = vcombine.low %v381_v34, %v389_v35 }
 0x105   : > { %1407 = vmatprep.subr.bf16.mxu1 %v5875_v50 }
 0x106   : > { %1365 = vmatpush1.bf16.msra.mxu0 %v5872_v43  ;;  %v5863_v43 = vcombine.high %v381_v34, %v389_v35  ;;  %v6656_v34 = vld [vmem:[%s7933_s27 + $0xe4] ss:$16 sps:$4 sm:$0xff]   ;;  %v6653_v35 = vld [vmem:[%s7933_s27 + $0xcc] ss:$16 sps:$4 sm:$0xff]  }
 0x107   : > { %1366 = vmatprep.subr.bf16.mxu0 %v5889_v46  ;;  %v436_v46 = vld [vmem:[#allocation5 + $0x370] sm:$0xff] }
 0x108   : > { %1408 = vmatpush1.bf16.msra.mxu1 %v5874_v55  ;;  %v5909_v52 = vcombine.high %v428_v45, %v436_v46  ;;  %v437_v55 = vld [vmem:[#allocation5 + $0x378] sm:$0xff] }
 0x109   : > { %1409 = vmatprep.subr.bf16.mxu1 %v5891_v58  ;;  %v5895_v58 = vcombine.high %v413_v48, %v421_v49  ;;  %v6680_v48 = vld [vmem:[%s7933_s27 + $0x164] ss:$16 sps:$4 sm:$0xff]   ;;  %v6677_v49 = vld [vmem:[%s7933_s27 + $0x14c] ss:$16 sps:$4 sm:$0xff]  }
 0x10a   : > { %1367 = vmatpush1.bf16.msra.mxu0 %v5888_v51  ;;  %v5892_v51 = vcombine.low %v412_v38, %v420_v39 }
 0x10b   : > { %1368 = vmatprep.subr.bf16.mxu0 %v5905_v54  ;;  %v429_v54 = vld [vmem:[#allocation5 + $0x338] sm:$0xff] }
 0x10c   : > { %1410 = vmatpush1.bf16.msra.mxu1 %v5890_v63  ;;  %v453_v63 = vld [vmem:[#allocation5 + $0x3f8] sm:$0xff]  ;;  %v5911_v1 = vcombine.high %v429_v54, %v437_v55 }
 0x10d   : > { %1411 = vmatprep.subr.bf16.mxu1 %v5907_v3  ;;  %v6614_v3 = vld [vmem:[%s7933_s27 + $0x4] ss:$16 sps:$4 sm:$0xff]  }
 0x10e   : > { %1369 = vmatpush1.bf16.msra.mxu0 %v5904_v59  ;;  %v5908_v59 = vcombine.low %v428_v45, %v436_v46  ;;  %v6674_v45 = vld [vmem:[%s7933_s27 + $0x144] ss:$16 sps:$4 sm:$0xff]   ;;  %v6671_v46 = vld [vmem:[%s7933_s27 + $0x12c] ss:$16 sps:$4 sm:$0xff]  }
 0x10f   : > { %1370 = vmatprep.subr.bf16.mxu0 %v5921_v62  ;;  %v445_v62 = vld [vmem:[#allocation5 + $0x3b8] sm:$0xff] }
 0x110   : > { %1412 = vmatpush1.bf16.msra.mxu1 %v5906_v9  ;;  %v5927_v7 = vcombine.high %v445_v62, %v453_v63  ;;  %v5926_v9 = vcombine.low %v445_v62, %v453_v63  ;;  %v6696_v62 = vld [vmem:[%s7933_s27 + $0x1c0] ss:$16 sps:$4 sm:$0xff]   ;;  %v6693_v63 = vld [vmem:[%s7933_s27 + $0x1a8] ss:$16 sps:$4 sm:$0xff]  }
 0x111   : > { %1413 = vmatprep.subr.bf16.mxu1 %v5923_v12  ;;  %v7444_v12 = vld [vmem:[#allocation2] sm:$0xff]  }
 0x112   : > { %1371 = vmatpush1.bf16.msra.mxu0 %v5920_v4  ;;  %v5910_v4 = vcombine.low %v429_v54, %v437_v55  ;;  %v6684_v54 = vld [vmem:[%s7933_s27 + $0x180] ss:$16 sps:$4 sm:$0xff]   ;;  %v6681_v55 = vld [vmem:[%s7933_s27 + $0x168] ss:$16 sps:$4 sm:$0xff]  }
 0x113   : > { %1442 = vmatprep.subr.bf16.mxu0 %v5813_v8  ;;  %v6620_v8 = vld [vmem:[%s7933_s27 + $0x24] ss:$16 sps:$4 sm:$0xff]  }
 0x114   : > { %1414 = vmatpush1.bf16.msra.mxu1 %v5922_v17  ;;  %v6621_v17 = vld [vmem:[%s7933_s27 + $0x28] ss:$16 sps:$4 sm:$0xff]  }
 0x115   : > { %1389 = vmatmul.mubr.bf16.vlgmr.msra.gmra.mrb[8].mxu0 %v7941_v5  ;;  %1485 = vmatprep.subr.bf16.mxu1 %v5815_v20  ;;  %v6630_v20 = vld [vmem:[%s7933_s27 + $0x60] ss:$16 sps:$4 sm:$0xff]  }
 0x116   : > { %1443 = vmatpush1.bf16.msra.mxu0 %v5812_v13  ;;  %1474 = vmatprep.mubr.bf16.mxu0 %v7675_v0  ;;  %v6626_v13 = vld [vmem:[%s7933_s27 + $0x44] ss:$16 sps:$4 sm:$0xff]  }
 0x117   : > { %1444 = vmatprep.subr.bf16.mxu0 %v5829_v16  ;;  %1432 = vmatmul.mubr.bf16.vlgmr.msra.gmra.mrb[8].mxu1 %v7941_v5  ;;  %v405_v5 = vld [vmem:[#allocation5 + $0x278] sm:$0xff]  ;;  %v6624_v16 = vld [vmem:[%s7933_s27 + $0x40] ss:$16 sps:$4 sm:$0xff]  }
 0x118   : > { %1486 = vmatpush1.bf16.msra.mxu1 %v5814_v25  ;;  %1517 = vmatprep.mubr.bf16.mxu1 %v7675_v0  ;;  %v5893_v0 = vcombine.high %v412_v38, %v420_v39  ;;  %v5879_v50 = vcombine.high %v397_v42, %v405_v5  ;;  %v5878_v53 = vcombine.low %v397_v42, %v405_v5  ;;  %v6644_v25 = vld [vmem:[%s7933_s27 + $0xa4] ss:$16 sps:$4 sm:$0xff]   ;;  %v6659_v39 = vld [vmem:[%s7933_s27 + $0xec] ss:$16 sps:$4 sm:$0xff]  }
 0x119   : > { %1487 = vmatprep.subr.bf16.mxu1 %v5831_v28  ;;  %v6642_v28 = vld [vmem:[%s7933_s27 + $0xa0] ss:$16 sps:$4 sm:$0xff]   ;;  %v6662_v38 = vld [vmem:[%s7933_s27 + $0x104] ss:$16 sps:$4 sm:$0xff]   ;;  %v6665_v5 = vld [vmem:[%s7933_s27 + $0x10c] ss:$16 sps:$4 sm:$0xff]  }
 0x11a   : > { %1445 = vmatpush1.bf16.msra.mxu0 %v5828_v21  ;;  %v6638_v21 = vld [vmem:[%s7933_s27 + $0x84] ss:$16 sps:$4 sm:$0xff]  }
 0x11b   : > { %1446 = vmatprep.subr.bf16.mxu0 %v5845_v24  ;;  %v6636_v24 = vld [vmem:[%s7933_s27 + $0x80] ss:$16 sps:$4 sm:$0xff]   ;;  %v6668_v42 = vld [vmem:[%s7933_s27 + $0x124] ss:$16 sps:$4 sm:$0xff]  }
 0x11c   : > { %1488 = vmatpush1.bf16.msra.mxu1 %v5830_v33  ;;  %v6645_v33 = vld [vmem:[%s7933_s27 + $0xa8] ss:$16 sps:$4 sm:$0xff]  }
 0x11d   : > { %1489 = vmatprep.subr.bf16.mxu1 %v5847_v36  ;;  %v6654_v36 = vld [vmem:[%s7933_s27 + $0xe0] ss:$16 sps:$4 sm:$0xff]  }
 0x11e   : > { %1447 = vmatpush1.bf16.msra.mxu0 %v5844_v29  ;;  %v6639_v29 = vld [vmem:[%s7933_s27 + $0x88] ss:$16 sps:$4 sm:$0xff]  }
 0x11f   : > { %1448 = vmatprep.subr.bf16.mxu0 %v5861_v32  ;;  %v6648_v32 = vld [vmem:[%s7933_s27 + $0xc0] ss:$16 sps:$4 sm:$0xff]  }
 0x120   : > { %1490 = vmatpush1.bf16.msra.mxu1 %v5846_v41  ;;  %v6657_v41 = vld [vmem:[%s7933_s27 + $0xe8] ss:$16 sps:$4 sm:$0xff]  }
 0x121   : > { %1491 = vmatprep.subr.bf16.mxu1 %v5863_v43  ;;  %v6666_v43 = vld [vmem:[%s7933_s27 + $0x120] ss:$16 sps:$4 sm:$0xff]  }
 0x122   : > { %1449 = vmatpush1.bf16.msra.mxu0 %v5860_v37  ;;  %v6651_v37 = vld [vmem:[%s7933_s27 + $0xc8] ss:$16 sps:$4 sm:$0xff]  }
 0x123   : > { %1450 = vmatprep.subr.bf16.mxu0 %v5877_v40  ;;  %v6660_v40 = vld [vmem:[%s7933_s27 + $0x100] ss:$16 sps:$4 sm:$0xff]  }
 0x124   : > { %1492 = vmatpush1.bf16.msra.mxu1 %v5862_v47  ;;  %v6669_v47 = vld [vmem:[%s7933_s27 + $0x128] ss:$16 sps:$4 sm:$0xff]  }
 0x125   : > { %1493 = vmatprep.subr.bf16.mxu1 %v5879_v50  ;;  %v6678_v50 = vld [vmem:[%s7933_s27 + $0x160] ss:$16 sps:$4 sm:$0xff]  }
 0x126   : > { %1451 = vmatpush1.bf16.msra.mxu0 %v5876_v44  ;;  %v6663_v44 = vld [vmem:[%s7933_s27 + $0x108] ss:$16 sps:$4 sm:$0xff]  }
 0x127   : > { %1452 = vmatprep.subr.bf16.mxu0 %v5893_v0  ;;  %v6672_v0 = vld [vmem:[%s7933_s27 + $0x140] ss:$16 sps:$4 sm:$0xff]  }
 0x128   : > { %1494 = vmatpush1.bf16.msra.mxu1 %v5878_v53  ;;  %v6683_v53 = vld [vmem:[%s7933_s27 + $0x16c] ss:$16 sps:$4 sm:$0xff]  }
 0x129   : > { %1495 = vmatprep.subr.bf16.mxu1 %v5895_v58  ;;  %v6690_v58 = vld [vmem:[%s7933_s27 + $0x1a0] ss:$16 sps:$4 sm:$0xff]  }
 0x12a   : > { %1453 = vmatpush1.bf16.msra.mxu0 %v5892_v51  ;;  %v6675_v51 = vld [vmem:[%s7933_s27 + $0x148] ss:$16 sps:$4 sm:$0xff]  }
 0x12b   : > { %1454 = vmatprep.subr.bf16.mxu0 %v5909_v52  ;;  %v6686_v52 = vld [vmem:[%s7933_s27 + $0x184] ss:$16 sps:$4 sm:$0xff]  }
 0x12c   : > { %1496 = vmatpush1.bf16.msra.mxu1 %v5894_v61  ;;  %v6695_v61 = vld [vmem:[%s7933_s27 + $0x1ac] ss:$16 sps:$4 sm:$0xff]  }
 0x12d   : > { %1497 = vmatprep.subr.bf16.mxu1 %v5911_v1  ;;  %v6704_v1 = vld [vmem:[%s7933_s27 + $0x1e4] ss:$16 sps:$4 sm:$0xff]  }
 0x12e   : > { %1455 = vmatpush1.bf16.msra.mxu0 %v5908_v59  ;;  %v6687_v59 = vld [vmem:[%s7933_s27 + $0x188] ss:$16 sps:$4 sm:$0xff]  }
 0x12f   : > { %1456 = vmatprep.subr.bf16.mxu0 %v5925_v60  ;;  %v6698_v60 = vld [vmem:[%s7933_s27 + $0x1c4] ss:$16 sps:$4 sm:$0xff]  }
 0x130   : > { %1498 = vmatpush1.bf16.msra.mxu1 %v5910_v4  ;;  %v6710_v4 = vld [vmem:[%s7933_s27 + $0x204] ss:$16 sps:$4 sm:$0xff]  }
 0x131   : > { %1499 = vmatprep.subr.bf16.mxu1 %v5927_v7  ;;  %v6707_v7 = vld [vmem:[%s7933_s27 + $0x1ec] ss:$16 sps:$4 sm:$0xff]  }
 0x132   : > { %1457 = vmatpush1.bf16.msra.mxu0 %v5924_v2  ;;  %v6701_v2 = vld [vmem:[%s7933_s27 + $0x1cc] ss:$16 sps:$4 sm:$0xff]  }
 0x133   : > { %4926 = vmatprep.subr.bf16.mxu0 %v6614_v3  ;;  %v6702_v3 = vld [vmem:[%s7933_s27 + $0x1e0] ss:$16 sps:$4 sm:$0xff]  }
 0x134   : > { %1500 = vmatpush1.bf16.msra.mxu1 %v5926_v9  ;;  %v6713_v9 = vld [vmem:[%s7933_s27 + $0x20c] ss:$16 sps:$4 sm:$0xff]  }
 0x135   : > { %1475 = vmatmul.mubr.bf16.vlgmr.msra.gmra.mrb[12].mxu0 %v7444_v12  ;;  %5270 = vmatprep.subr.bf16.mxu1 %v6617_v10  ;;  %v458_v10 = vlaneseq }
 0x136   : > { %4927 = vmatpush1.bf16.msra.mxu0 %v6612_v6  ;;  %v6699_v6 = vld [vmem:[%s7933_s27 + $0x1c8] ss:$16 sps:$4 sm:$0xff]  }
 0x137   : > { %4928 = vmatprep.subr.bf16.mxu0 %v6620_v8  ;;  %1518 = vmatmul.mubr.bf16.vlgmr.msra.gmra.mrb[12].mxu1 %v7444_v12  ;;  %v6705_v8 = vld [vmem:[%s7933_s27 + $0x1e8] ss:$16 sps:$4 sm:$0xff]   ;;  %v8023_v12 = vld [vmem:[#allocation7] sm:$0xff] }
 0x138   : > { %5271 = vmatpush1.bf16.msra.mxu1 %v6615_v14 }
 0x139   : > { %5272 = vmatprep.subr.bf16.mxu1 %v6623_v15 }
 0x13a   : > { %4929 = vmatpush1.bf16.msra.mxu0 %v6618_v11  ;;  %v8021_v11 = vshrl.u32 %v458_v10, 7 }
 0x13b   : > { %4930 = vmatprep.subr.bf16.mxu0 %v6626_v13 }
 0x13c   : > { %5273 = vmatpush1.bf16.msra.mxu1 %v6621_v17  ;;  %v8026_v13 = vsub.s32 0, %v8021_v11  ;;  %v8029_v14 = vsub.s32 1, %v8021_v11  ;;  %v8036_v17 = vsub.s32 2, %v8021_v11 }
 0x13d   : > { %5274 = vmatprep.subr.bf16.mxu1 %v6629_v18 }
 0x13e   : > { %4931 = vmatpush1.bf16.msra.mxu0 %v6624_v16  ;;  %v461_v15 = vrot.slane %v8023_v12, %v8026_v13  ;;  %v465_v16 = vrot.slane %v8023_v12, %v8029_v14 }
 0x13f   : > { %4932 = vmatprep.subr.bf16.mxu0 %v6632_v19  ;;  %v8039_v19 = vsub.s32 3, %v8021_v11 }
 0x140   : > { %5275 = vmatpush1.bf16.msra.mxu1 %v6627_v22 }
 0x141   : > { %5276 = vmatprep.subr.bf16.mxu1 %v6635_v23 }
 0x142   : > { %4933 = vmatpush1.bf16.msra.mxu0 %v6630_v20 }
 0x143   : > { %4934 = vmatprep.subr.bf16.mxu0 %v6638_v21 }
 0x144   : > { %5277 = vmatpush1.bf16.msra.mxu1 %v6633_v26 }
 0x145   : > { %5278 = vmatprep.subr.bf16.mxu1 %v6641_v27  ;;  %v469_v27 = vrot.slane %v8023_v12, %v8036_v17 }
 0x146   : > { %4935 = vmatpush1.bf16.msra.mxu0 %v6636_v24 }
 0x147   : > { %4936 = vmatprep.subr.bf16.mxu0 %v6644_v25 }
 0x148   : > { %5279 = vmatpush1.bf16.msra.mxu1 %v6639_v29 }
 0x149   : > { %5280 = vmatprep.subr.bf16.mxu1 %v6647_v31 }
 0x14a   : > { %4937 = vmatpush1.bf16.msra.mxu0 %v6642_v28 }
 0x14b   : > { %4938 = vmatprep.subr.bf16.mxu0 %v6650_v30  ;;  %v473_v30 = vrot.slane %v8023_v12, %v8039_v19 }
 0x14c   : > { %5281 = vmatpush1.bf16.msra.mxu1 %v6645_v33 }
 0x14d   : > { %5282 = vmatprep.subr.bf16.mxu1 %v6653_v35 }
 0x14e   : > { %4939 = vmatpush1.bf16.msra.mxu0 %v6648_v32 }
 0x14f   : > { %4940 = vmatprep.subr.bf16.mxu0 %v6656_v34 }
 0x150   : > { %5283 = vmatpush1.bf16.msra.mxu1 %v6651_v37 }
 0x151   : > { %5284 = vmatprep.subr.bf16.mxu1 %v6659_v39 }
 0x152   : > { %4941 = vmatpush1.bf16.msra.mxu0 %v6654_v36 }
 0x153   : > { %4942 = vmatprep.subr.bf16.mxu0 %v6662_v38 }
 0x154   : > { %5285 = vmatpush1.bf16.msra.mxu1 %v6657_v41 }
 0x155   : > { %5286 = vmatprep.subr.bf16.mxu1 %v6665_v5 }
 0x156   : > { %4943 = vmatpush1.bf16.msra.mxu0 %v6660_v40 }
 0x157   : > { %4944 = vmatprep.subr.bf16.mxu0 %v6668_v42 }
 0x158   : > { %5287 = vmatpush1.bf16.msra.mxu1 %v6663_v44 }
 0x159   : > { %5288 = vmatprep.subr.bf16.mxu1 %v6671_v46 }
 0x15a   : > { %4945 = vmatpush1.bf16.msra.mxu0 %v6666_v43 }
 0x15b   : > { %4946 = vmatprep.subr.bf16.mxu0 %v6674_v45 }
 0x15c   : > { %5289 = vmatpush1.bf16.msra.mxu1 %v6669_v47 }
 0x15d   : > { %5290 = vmatprep.subr.bf16.mxu1 %v6677_v49 }
 0x15e   : > { %4947 = vmatpush1.bf16.msra.mxu0 %v6672_v0 }
 0x15f   : > { %4948 = vmatprep.subr.bf16.mxu0 %v6680_v48 }
 0x160   : > { %5291 = vmatpush1.bf16.msra.mxu1 %v6675_v51 }
 0x161   : > { %5292 = vmatprep.subr.bf16.mxu1 %v6683_v53 }
 0x162   : > { %4949 = vmatpush1.bf16.msra.mxu0 %v6678_v50 }
 0x163   : > { %4950 = vmatprep.subr.bf16.mxu0 %v6686_v52 }
 0x164   : > { %5293 = vmatpush1.bf16.msra.mxu1 %v6681_v55 }
 0x165   : > { %5294 = vmatprep.subr.bf16.mxu1 %v6689_v57 }
 0x166   : > { %4951 = vmatpush1.bf16.msra.mxu0 %v6684_v54 }
 0x167   : > { %4952 = vmatprep.subr.bf16.mxu0 %v6692_v56 }
 0x168   : > { %5295 = vmatpush1.bf16.msra.mxu1 %v6687_v59 }
 0x169   : > { %5296 = vmatprep.subr.bf16.mxu1 %v6695_v61 }
 0x16a   : > { %4953 = vmatpush1.bf16.msra.mxu0 %v6690_v58 }
 0x16b   : > { %4954 = vmatprep.subr.bf16.mxu0 %v6698_v60 }
 0x16c   : > { %5297 = vmatpush1.bf16.msra.mxu1 %v6693_v63 }
 0x16d   : > { %5298 = vmatprep.subr.bf16.mxu1 %v6701_v2 }
 0x16e   : > { %4955 = vmatpush1.bf16.msra.mxu0 %v6696_v62 }
 0x16f   : > { %4956 = vmatprep.subr.bf16.mxu0 %v6704_v1 }
 0x170   : > { %5299 = vmatpush1.bf16.msra.mxu1 %v6699_v6 }
 0x171   : > { %5300 = vmatprep.subr.bf16.mxu1 %v6707_v7 }
 0x172   : > { %4957 = vmatpush1.bf16.msra.mxu0 %v6702_v3 }
 0x173   : > { %4969 = vmatprep.subr.bf16.mxu0 %v6710_v4 }
 0x174   : > { %5301 = vmatpush1.bf16.msra.mxu1 %v6705_v8 }
 0x175   : > { %5313 = vmatprep.subr.bf16.mxu1 %v6713_v9 }
 0x1a8   : > { %v1218_v18 = vpop.f32.mrb[0].mxu0  ;;  %v1261_v35 = vpop.f32.mrb[0].mxu1 }
 0x1a9   : > { %v8041_v20 = vadd.f32 %v1218_v18, %v461_v15  ;;  %v1220_v21 = vpop.f32.mrb[1].mxu0  ;;  %v8061_v38 = vadd.f32 %v1261_v35, %v469_v27  ;;  %v1263_v39 = vpop.f32.mrb[1].mxu1 }
 0x1aa   : > { %v8043_v22 = vadd.f32 %v1220_v21, %v465_v16  ;;  %v1222_v23 = vpop.f32.mrb[2].mxu0  ;;  %v8065_v42 = vadd.f32 %v1263_v39, %v473_v30  ;;  %v1265_v5 = vpop.f32.mrb[2].mxu1  ;;  %v476_v21 = vsub.s32 4, %v8021_v11 }
 0x1ab   : > { %v1560_v24 = vmul.f32 0.044715, %v8041_v20  ;;  %v8046_v25 = vadd.f32 %v1222_v23, %v461_v15  ;;  %v1224_v26 = vpop.f32.mrb[3].mxu0  ;;  %v1562_v45 = vmul.f32 0.044715, %v8061_v38  ;;  %v8070_v46 = vadd.f32 %v1265_v5, %v469_v27  ;;  %v1267_v0 = vpop.f32.mrb[3].mxu1 }
 0x1ac   : > { %v1561_v28 = vmul.f32 0.044715, %v8043_v22  ;;  %v8051_v29 = vadd.f32 %v1224_v26, %v465_v16  ;;  %v1563_v49 = vmul.f32 0.044715, %v8065_v42  ;;  %v8075_v50 = vadd.f32 %v1267_v0, %v473_v30  ;;  %v8097_v30 = vld [vmem:[#allocation7 + $0x8] sm:$0xff] }
 0x1ad   : > { %v1592_v31 = vmul.f32 %v1560_v24, %v8041_v20  ;;  %v1576_v32 = vmul.f32 0.044715, %v8046_v25  ;;  %v1594_v53 = vmul.f32 %v1562_v45, %v8061_v38  ;;  %v1578_v54 = vmul.f32 0.044715, %v8070_v46  ;;  %v6708_v0 = vld [vmem:[%s7933_s27 + $0x200] ss:$16 sps:$4 sm:$0xff]  }
 0x1ae   : > { %v1593_v33 = vmul.f32 %v1561_v28, %v8043_v22  ;;  %v1577_v34 = vmul.f32 0.044715, %v8051_v29  ;;  %v1595_v57 = vmul.f32 %v1563_v49, %v8065_v42  ;;  %v1579_v58 = vmul.f32 0.044715, %v8075_v50 }
 0x1af   : > { %v1624_v36 = vmul.f32 %v1592_v31, %v8041_v20  ;;  %v1608_v37 = vmul.f32 %v1576_v32, %v8046_v25  ;;  %v1626_v60 = vmul.f32 %v1594_v53, %v8061_v38  ;;  %v1610_v61 = vmul.f32 %v1578_v54, %v8070_v46 }
 0x1b0   : > { %v1625_v40 = vmul.f32 %v1593_v33, %v8043_v22  ;;  %v1609_v41 = vmul.f32 %v1577_v34, %v8051_v29  ;;  %v1627_v63 = vmul.f32 %v1595_v57, %v8065_v42  ;;  %v1611_v1 = vmul.f32 %v1579_v58, %v8075_v50 }
 0x1b1   : > { %v1656_v43 = vadd.f32 %v1624_v36, %v8041_v20  ;;  %v1640_v44 = vmul.f32 %v1608_v37, %v8046_v25  ;;  %v1658_v2 = vadd.f32 %v1626_v60, %v8061_v38  ;;  %v1642_v3 = vmul.f32 %v1610_v61, %v8070_v46  ;;  %v6716_v61 = vld [vmem:[%s7933_s27 + $0x224] ss:$16 sps:$4 sm:$0xff]  }
 0x1b2   : > { %v1641_v47 = vmul.f32 %v1609_v41, %v8051_v29  ;;  %v1657_v48 = vadd.f32 %v1625_v40, %v8043_v22  ;;  %v1643_v4 = vmul.f32 %v1611_v1, %v8075_v50  ;;  %v1659_v6 = vadd.f32 %v1627_v63, %v8065_v42 }
 0x1b3   : > { %v1688_v51 = vmul.f32 0.7978846, %v1656_v43  ;;  %v1672_v52 = vadd.f32 %v1640_v44, %v8046_v25  ;;  %v1690_v7 = vmul.f32 0.7978846, %v1658_v2  ;;  %v1674_v8 = vadd.f32 %v1642_v3, %v8070_v46  ;;  %v6714_v2 = vld [vmem:[%s7933_s27 + $0x220] ss:$16 sps:$4 sm:$0xff]  }
 0x1b4   : > { %v1673_v55 = vadd.f32 %v1641_v47, %v8051_v29  ;;  %v1689_v56 = vmul.f32 0.7978846, %v1657_v48  ;;  %v1675_v9 = vadd.f32 %v1643_v4, %v8075_v50  ;;  %v1691_v10 = vmul.f32 0.7978846, %v1659_v6  ;;  %v6711_v47 = vld [vmem:[%s7933_s27 + $0x208] ss:$16 sps:$4 sm:$0xff]  }
 0x1b5   : > { %7380 = vtanh.f32 %v1688_v51  ;;  %v1704_v59 = vmul.f32 0.7978846, %v1672_v52  ;;  %v1706_v15 = vmul.f32 0.7978846, %v1674_v8  ;;  %v484_v26 = vsub.s32 6, %v8021_v11 }
 0x1b6   : > { %v1705_v62 = vmul.f32 0.7978846, %v1673_v55  ;;  %7382 = vtanh.f32 %v1689_v56  ;;  %v1707_v16 = vmul.f32 0.7978846, %v1675_v9  ;;  %v480_v27 = vsub.s32 5, %v8021_v11 }
 0x1b7   : > { %7384 = vtanh.f32 %v1704_v59  ;;  %v488_v28 = vsub.s32 7, %v8021_v11  ;;  %v1529_v32 = vmul.f32 0.5, %v8043_v22  ;;  %v1528_v34 = vmul.f32 0.5, %v8041_v20  ;;  %v6717_v3 = vld [vmem:[%s7933_s27 + $0x228] ss:$16 sps:$4 sm:$0xff]  }
 0x1b8   : > { %7386 = vtanh.f32 %v1705_v62  ;;  %v1545_v36 = vmul.f32 0.5, %v8051_v29  ;;  %v1544_v37 = vmul.f32 0.5, %v8046_v25  ;;  %v1530_v41 = vmul.f32 0.5, %v8061_v38  ;;  %v6723_v11 = vld [vmem:[%s7933_s27 + $0x248] ss:$16 sps:$4 sm:$0xff]  }
 0x1b9   : > { %7388 = vtanh.f32 %v1690_v7  ;;  %v8105_v5 = vrot.slane %v8097_v30, %v476_v21  ;;  %v8108_v43 = vrot.slane %v8097_v30, %v484_v26  ;;  %v8111_v20 = vrot.slane %v8097_v30, %v480_v27 }
 0x1ba   : > { %7390 = vtanh.f32 %v1691_v10  ;;  %v8116_v29 = vrot.slane %v8097_v30, %v488_v28  ;;  %v1531_v48 = vmul.f32 0.5, %v8065_v42  ;;  %v477_v49 = vrot.slane %v8023_v12, %v476_v21  ;;  %v6719_v42 = vld [vmem:[%s7933_s27 + $0x22c] ss:$16 sps:$4 sm:$0xff]  }
 0x1bb   : > { %7392 = vtanh.f32 %v1706_v15  ;;  %v481_v53 = vrot.slane %v8023_v12, %v480_v27  ;;  %v1546_v54 = vmul.f32 0.5, %v8070_v46  ;;  %v1547_v58 = vmul.f32 0.5, %v8075_v50  ;;  %v6722_v50 = vld [vmem:[%s7933_s27 + $0x244] ss:$16 sps:$4 sm:$0xff]  }
 0x1bc   : > { %7394 = vtanh.f32 %v1707_v16 }
 0x1bf   : > { %v7381_v18 = vpop.eup %7380 }
 0x1c0   : > { %v7383_v23 = vpop.eup %7382  ;;  %v1752_v24 = vadd.f32 1.0, %v7381_v18  ;;  %v485_v18 = vrot.slane %v8023_v12, %v484_v26 }
 0x1c1   : > { %v7385_v31 = vpop.eup %7384  ;;  %v1753_v33 = vadd.f32 1.0, %v7383_v23 }
 0x1c2   : > { %v7387_v35 = vpop.eup %7386  ;;  %v1768_v39 = vadd.f32 1.0, %v7385_v31  ;;  %v1784_v22 = vmul.f32 %v1752_v24, %v1528_v34  ;;  %v6725_v24 = vld [vmem:[%s7933_s27 + $0x24c] ss:$16 sps:$4 sm:$0xff]   ;;  %v489_v31 = vrot.slane %v8023_v12, %v488_v28 }
 0x1c3   : > { %v1769_v40 = vadd.f32 1.0, %v7387_v35  ;;  %v7389_v25 = vpop.eup %7388  ;;  %v1785_v45 = vmul.f32 %v1753_v33, %v1529_v32 }
 0x1c4   : > { %v1800_v44 = vmul.f32 %v1768_v39, %v1544_v37  ;;  %v7391_v51 = vpop.eup %7390  ;;  %v1754_v55 = vadd.f32 1.0, %v7389_v25  ;;  %v6731_v25 = vld [vmem:[%s7933_s27 + $0x26c] ss:$16 sps:$4 sm:$0xff]  }
 0x1c5   : > { %v1801_v38 = vmul.f32 %v1769_v40, %v1545_v36  ;;  %v7393_v56 = vpop.eup %7392  ;;  %v1755_v59 = vadd.f32 1.0, %v7391_v51  ;;  %v6720_v36 = vld [vmem:[%s7933_s27 + $0x240] ss:$16 sps:$4 sm:$0xff]  }
 0x1c6   : > { %v1816_v52 = vpack.c.bf16 %v1800_v44, %v1784_v22  ;;  %v7395_v60 = vpop.eup %7394  ;;  %v1770_v63 = vadd.f32 1.0, %v7393_v56  ;;  %v1786_v1 = vmul.f32 %v1754_v55, %v1530_v41  ;;  %v6728_v44 = vld [vmem:[%s7933_s27 + $0x264] ss:$16 sps:$4 sm:$0xff]  }
 0x1c7   : > { %v1817_v57 = vpack.c.bf16 %v1801_v38, %v1785_v45  ;;  %v1771_v4 = vadd.f32 1.0, %v7395_v60  ;;  %v1787_v6 = vmul.f32 %v1755_v59, %v1531_v48  ;;  %v6726_v48 = vld [vmem:[%s7933_s27 + $0x260] ss:$16 sps:$4 sm:$0xff]   ;;  %v6734_v56 = vld [vmem:[%s7933_s27 + $0x284] ss:$16 sps:$4 sm:$0xff]  }
 0x1c8   : > { %v1304_v62 = vpop.f32.mrb[4].mxu0  ;;  %v1802_v10 = vmul.f32 %v1770_v63, %v1546_v54 }
 0x1c9   : > { %4958 = vmatprep.mubr.bf16.mxu0 %v1817_v57  ;;  %5302 = vmatprep.mubr.bf16.mxu1 %v1817_v57  ;;  %v8129_v46 = vadd.f32 %v1304_v62, %v477_v49  ;;  %v1306_v7 = vpop.f32.mrb[5].mxu0  ;;  %v1803_v15 = vmul.f32 %v1771_v4, %v1547_v58 }
 0x1ca   : > { %4959 = vmatmul.mubr.bf16.vlgmr.msra.gmra.mrb[16].mxu0 %v1816_v52  ;;  %5303 = vmatmul.mubr.bf16.vlgmr.msra.gmra.mrb[16].mxu1 %v1816_v52  ;;  %v8132_v8 = vadd.f32 %v1306_v7, %v481_v53  ;;  %v1308_v9 = vpop.f32.mrb[6].mxu0  ;;  %v8145_v33 = vpack.c.bf16 %v1802_v10, %v1786_v1  ;;  %v1347_v37 = vpop.f32.mrb[4].mxu1  ;;  %v6737_v1 = vld [vmem:[%s7933_s27 + $0x28c] ss:$16 sps:$4 sm:$0xff]   ;;  %v6732_v7 = vld [vmem:[%s7933_s27 + $0x280] ss:$16 sps:$4 sm:$0xff]  }
 0x1cb   : > { %4970 = vmatpush1.bf16.msra.mxu0 %v6708_v0  ;;  %5314 = vmatpush1.bf16.msra.mxu1 %v6711_v47  ;;  %v1564_v16 = vmul.f32 0.044715, %v8129_v46  ;;  %v8136_v21 = vadd.f32 %v1308_v9, %v477_v49  ;;  %v1310_v23 = vpop.f32.mrb[7].mxu0  ;;  %v1819_v34 = vpack.c.bf16 %v1803_v15, %v1787_v6  ;;  %v8154_v28 = vadd.f32 %v1347_v37, %v485_v18  ;;  %v1349_v41 = vpop.f32.mrb[5].mxu1  ;;  %v6729_v49 = vld [vmem:[%s7933_s27 + $0x268] ss:$16 sps:$4 sm:$0xff]  }
 0x1cc   : > { %4971 = vmatprep.subr.bf16.mxu0 %v6716_v61  ;;  %5315 = vmatprep.subr.bf16.mxu1 %v6719_v42  ;;  %v1565_v27 = vmul.f32 0.044715, %v8132_v8  ;;  %v8143_v32 = vadd.f32 %v1310_v23, %v481_v53  ;;  %v8160_v38 = vadd.f32 %v1349_v41, %v489_v31  ;;  %v1351_v0 = vpop.f32.mrb[6].mxu1  ;;  %v6735_v15 = vld [vmem:[%s7933_s27 + $0x288] ss:$16 sps:$4 sm:$0xff]  }
 0x1cd   : > { %v1596_v26 = vmul.f32 %v1564_v16, %v8129_v46  ;;  %v1580_v35 = vmul.f32 0.044715, %v8136_v21  ;;  %5001 = vmatprep.mubr.bf16.mxu0 %v1819_v34  ;;  %5345 = vmatprep.mubr.bf16.mxu1 %v1819_v34  ;;  %v1566_v52 = vmul.f32 0.044715, %v8154_v28  ;;  %v8168_v54 = vadd.f32 %v1351_v0, %v485_v18  ;;  %v1353_v55 = vpop.f32.mrb[7].mxu1 }
 0x1ce   : > { %v1597_v39 = vmul.f32 %v1565_v27, %v8132_v8  ;;  %v1581_v40 = vmul.f32 0.044715, %v8143_v32  ;;  %v1567_v57 = vmul.f32 0.044715, %v8160_v38  ;;  %v8173_v59 = vadd.f32 %v1353_v55, %v489_v31  ;;  %v6740_v31 = vld [vmem:[%s7933_s27 + $0x2a4] ss:$16 sps:$4 sm:$0xff]  }
 0x1cf   : > { %4972 = vmatpush1.bf16.msra.mxu0 %v6714_v2  ;;  %5316 = vmatpush1.bf16.msra.mxu1 %v6717_v3  ;;  %v1628_v12 = vmul.f32 %v1596_v26, %v8129_v46  ;;  %v1612_v22 = vmul.f32 %v1580_v35, %v8136_v21  ;;  %v1598_v42 = vmul.f32 %v1566_v52, %v8154_v28  ;;  %v1582_v63 = vmul.f32 0.044715, %v8168_v54  ;;  %v6743_v34 = vld [vmem:[%s7933_s27 + $0x2ac] ss:$16 sps:$4 sm:$0xff]   ;;  %v6752_v52 = vld [vmem:[%s7933_s27 + $0x2e4] ss:$16 sps:$4 sm:$0xff]  }
 0x1d0   : > { %4973 = vmatprep.subr.bf16.mxu0 %v6722_v50  ;;  %5317 = vmatprep.subr.bf16.mxu1 %v6725_v24  ;;  %v1629_v45 = vmul.f32 %v1597_v39, %v8132_v8  ;;  %v1613_v47 = vmul.f32 %v1581_v40, %v8143_v32  ;;  %v1599_v2 = vmul.f32 %v1567_v57, %v8160_v38  ;;  %v1583_v3 = vmul.f32 0.044715, %v8173_v59 }
 0x1d1   : > { %v1660_v51 = vadd.f32 %v1628_v12, %v8129_v46  ;;  %v1644_v53 = vmul.f32 %v1612_v22, %v8136_v21  ;;  %v1630_v50 = vmul.f32 %v1598_v42, %v8154_v28  ;;  %v1614_v10 = vmul.f32 %v1582_v63, %v8168_v54  ;;  %v6741_v12 = vld [vmem:[%s7933_s27 + $0x2a8] ss:$16 sps:$4 sm:$0xff]   ;;  %v6746_v22 = vld [vmem:[%s7933_s27 + $0x2c4] ss:$16 sps:$4 sm:$0xff]  }
 0x1d2   : > { %v1645_v58 = vmul.f32 %v1613_v47, %v8143_v32  ;;  %v1661_v60 = vadd.f32 %v1629_v45, %v8132_v8  ;;  %v1631_v16 = vmul.f32 %v1599_v2, %v8160_v38  ;;  %v1615_v18 = vmul.f32 %v1583_v3, %v8173_v59  ;;  %v6744_v47 = vld [vmem:[%s7933_s27 + $0x2c0] ss:$16 sps:$4 sm:$0xff]   ;;  %v6758_v2 = vld [vmem:[%s7933_s27 + $0x304] ss:$16 sps:$4 sm:$0xff]  }
 0x1d3   : > { %4974 = vmatpush1.bf16.msra.mxu0 %v6720_v36  ;;  %5318 = vmatpush1.bf16.msra.mxu1 %v6723_v11  ;;  %v1692_v61 = vmul.f32 0.7978846, %v1660_v51  ;;  %v1676_v62 = vadd.f32 %v1644_v53, %v8136_v21  ;;  %v1662_v24 = vadd.f32 %v1630_v50, %v8154_v28  ;;  %v1646_v27 = vmul.f32 %v1614_v10, %v8168_v54  ;;  %v6738_v11 = vld [vmem:[%s7933_s27 + $0x2a0] ss:$16 sps:$4 sm:$0xff]   ;;  %v6755_v53 = vld [vmem:[%s7933_s27 + $0x2ec] ss:$16 sps:$4 sm:$0xff]  }
 0x1d4   : > { %4975 = vmatprep.subr.bf16.mxu0 %v6728_v44  ;;  %5319 = vmatprep.subr.bf16.mxu1 %v6731_v25  ;;  %v1677_v4 = vadd.f32 %v1645_v58, %v8143_v32  ;;  %v1693_v6 = vmul.f32 0.7978846, %v1661_v60  ;;  %v1647_v26 = vmul.f32 %v1615_v18, %v8173_v59  ;;  %v1663_v35 = vadd.f32 %v1631_v16, %v8160_v38  ;;  %v6749_v44 = vld [vmem:[%s7933_s27 + $0x2cc] ss:$16 sps:$4 sm:$0xff]  }
 0x1d5   : > { %7396 = vtanh.f32 %v1692_v61  ;;  %v1708_v9 = vmul.f32 0.7978846, %v1676_v62  ;;  %v1694_v36 = vmul.f32 0.7978846, %v1662_v24  ;;  %v1678_v37 = vadd.f32 %v1646_v27, %v8168_v54  ;;  %v6753_v62 = vld [vmem:[%s7933_s27 + $0x2e8] ss:$16 sps:$4 sm:$0xff]  }
 0x1d6   : > { %v1709_v23 = vmul.f32 0.7978846, %v1677_v4  ;;  %7398 = vtanh.f32 %v1693_v6  ;;  %v1679_v39 = vadd.f32 %v1647_v26, %v8173_v59  ;;  %v1695_v40 = vmul.f32 0.7978846, %v1663_v35  ;;  %v6759_v24 = vld [vmem:[%s7933_s27 + $0x308] ss:$16 sps:$4 sm:$0xff]  }
 0x1d7   : > { %4976 = vmatpush1.bf16.msra.mxu0 %v6726_v48  ;;  %5320 = vmatpush1.bf16.msra.mxu1 %v6729_v49  ;;  %7400 = vtanh.f32 %v1708_v9  ;;  %v1710_v41 = vmul.f32 0.7978846, %v1678_v37  ;;  %v1532_v45 = vmul.f32 0.5, %v8129_v46  ;;  %v6747_v48 = vld [vmem:[%s7933_s27 + $0x2c8] ss:$16 sps:$4 sm:$0xff]   ;;  %v1533_v49 = vmul.f32 0.5, %v8132_v8 }
 0x1d8   : > { %4977 = vmatprep.subr.bf16.mxu0 %v6734_v56  ;;  %5321 = vmatprep.subr.bf16.mxu1 %v6737_v1  ;;  %7402 = vtanh.f32 %v1709_v23  ;;  %v1711_v25 = vmul.f32 0.7978846, %v1679_v39  ;;  %v1548_v55 = vmul.f32 0.5, %v8136_v21  ;;  %v1549_v57 = vmul.f32 0.5, %v8143_v32  ;;  %v6750_v8 = vld [vmem:[%s7933_s27 + $0x2e0] ss:$16 sps:$4 sm:$0xff]  }
 0x1d9   : > { %7404 = vtanh.f32 %v1694_v36  ;;  %v6761_v21 = vld [vmem:[%s7933_s27 + $0x30c] ss:$16 sps:$4 sm:$0xff]   ;;  %v1534_v4 = vmul.f32 0.5, %v8154_v28  ;;  %v493_v6 = vrot.slane %v8097_v30, %v8026_v13  ;;  %v1535_v50 = vmul.f32 0.5, %v8160_v38  ;;  %v6756_v28 = vld [vmem:[%s7933_s27 + $0x300] ss:$16 sps:$4 sm:$0xff]  }
 0x1da   : > { %7406 = vtanh.f32 %v1695_v40  ;;  %v497_v10 = vrot.slane %v8097_v30, %v8029_v14  ;;  %v1550_v16 = vmul.f32 0.5, %v8168_v54  ;;  %v1551_v38 = vmul.f32 0.5, %v8173_v59  ;;  %v6764_v26 = vld [vmem:[%s7933_s27 + $0x324] ss:$16 sps:$4 sm:$0xff]   ;;  %v6767_v35 = vld [vmem:[%s7933_s27 + $0x32c] ss:$16 sps:$4 sm:$0xff]  }
 0x1db   : > { %4978 = vmatpush1.bf16.msra.mxu0 %v6732_v7  ;;  %5322 = vmatpush1.bf16.msra.mxu1 %v6735_v15  ;;  %7408 = vtanh.f32 %v1710_v41  ;;  %v6762_v41 = vld [vmem:[%s7933_s27 + $0x320] ss:$16 sps:$4 sm:$0xff]  }
 0x1dc   : > { %4979 = vmatprep.subr.bf16.mxu0 %v6740_v31  ;;  %5323 = vmatprep.subr.bf16.mxu1 %v6743_v34  ;;  %7410 = vtanh.f32 %v1711_v25  ;;  %v6765_v25 = vld [vmem:[%s7933_s27 + $0x328] ss:$16 sps:$4 sm:$0xff]  }
 0x1df   : > { %v7397_v0 = vpop.eup %7396  ;;  %4980 = vmatpush1.bf16.msra.mxu0 %v6738_v11  ;;  %5324 = vmatpush1.bf16.msra.mxu1 %v6741_v12 }
 0x1e0   : > { %v7399_v51 = vpop.eup %7398  ;;  %4981 = vmatprep.subr.bf16.mxu0 %v6746_v22  ;;  %5325 = vmatprep.subr.bf16.mxu1 %v6749_v44  ;;  %v1756_v56 = vadd.f32 1.0, %v7397_v0  ;;  %v501_v0 = vrot.slane %v8097_v30, %v8036_v17 }
 0x1e1   : > { %v7401_v46 = vpop.eup %7400  ;;  %v1757_v58 = vadd.f32 1.0, %v7399_v51  ;;  %v6770_v51 = vld [vmem:[%s7933_s27 + $0x344] ss:$16 sps:$4 sm:$0xff]  }
 0x1e2   : > { %v7403_v60 = vpop.eup %7402  ;;  %v1772_v61 = vadd.f32 1.0, %v7401_v46  ;;  %v1788_v42 = vmul.f32 %v1756_v56, %v1532_v45 }
 0x1e3   : > { %4982 = vmatpush1.bf16.msra.mxu0 %v6744_v47  ;;  %5326 = vmatpush1.bf16.msra.mxu1 %v6747_v48  ;;  %v1773_v63 = vadd.f32 1.0, %v7403_v60  ;;  %v1789_v1 = vmul.f32 %v1757_v58, %v1533_v49  ;;  %v7405_v32 = vpop.eup %7404 }
 0x1e4   : > { %4983 = vmatprep.subr.bf16.mxu0 %v6752_v52  ;;  %5327 = vmatprep.subr.bf16.mxu1 %v6755_v53  ;;  %v1804_v3 = vmul.f32 %v1772_v61, %v1548_v55  ;;  %v7407_v9 = vpop.eup %7406  ;;  %v1758_v18 = vadd.f32 1.0, %v7405_v32  ;;  %v6773_v52 = vld [vmem:[%s7933_s27 + $0x34c] ss:$16 sps:$4 sm:$0xff]   ;;  %v505_v55 = vrot.slane %v8097_v30, %v8039_v19  ;;  %v6768_v30 = vld [vmem:[%s7933_s27 + $0x340] ss:$16 sps:$4 sm:$0xff]  }
 0x1e5   : > { %v1805_v7 = vmul.f32 %v1773_v63, %v1549_v57  ;;  %v7409_v23 = vpop.eup %7408  ;;  %v1759_v31 = vadd.f32 1.0, %v7407_v9 }
 0x1e6   : > { %v8219_v15 = vpack.c.bf16 %v1804_v3, %v1788_v42  ;;  %v7411_v34 = vpop.eup %7410  ;;  %v1774_v54 = vadd.f32 1.0, %v7409_v23  ;;  %v1790_v37 = vmul.f32 %v1758_v18, %v1534_v4  ;;  %v6776_v3 = vld [vmem:[%s7933_s27 + $0x364] ss:$16 sps:$4 sm:$0xff]   ;;  %v6779_v4 = vld [vmem:[%s7933_s27 + $0x36c] ss:$16 sps:$4 sm:$0xff]  }
 0x1e7   : > { %4984 = vmatpush1.bf16.msra.mxu0 %v6750_v8  ;;  %5328 = vmatpush1.bf16.msra.mxu1 %v6753_v62  ;;  %v8224_v27 = vpack.c.bf16 %v1805_v7, %v1789_v1  ;;  %v1775_v11 = vadd.f32 1.0, %v7411_v34  ;;  %v1791_v12 = vmul.f32 %v1759_v31, %v1535_v50  ;;  %v6771_v62 = vld [vmem:[%s7933_s27 + $0x348] ss:$16 sps:$4 sm:$0xff]  }
 0x1e8   : > { %4985 = vmatprep.subr.bf16.mxu0 %v6758_v2  ;;  %5329 = vmatprep.subr.bf16.mxu1 %v6761_v21  ;;  %v1390_v36 = vpop.f32.mrb[8].mxu0  ;;  %v1806_v44 = vmul.f32 %v1774_v54, %v1550_v16 }
 0x1e9   : > { %v8229_v39 = vadd.f32 %v1390_v36, %v493_v6  ;;  %v1392_v40 = vpop.f32.mrb[9].mxu0  ;;  %v1807_v49 = vmul.f32 %v1775_v11, %v1551_v38  ;;  %v6785_v11 = vld [vmem:[%s7933_s27 + $0x38c] ss:$16 sps:$4 sm:$0xff]  }
 0x1ea   : > { %v8232_v22 = vadd.f32 %v1392_v40, %v497_v10  ;;  %v1394_v59 = vpop.f32.mrb[10].mxu0  ;;  %v8247_v46 = vpack.c.bf16 %v1806_v44, %v1790_v37  ;;  %v1433_v61 = vpop.f32.mrb[8].mxu1  ;;  %v6782_v40 = vld [vmem:[%s7933_s27 + $0x384] ss:$16 sps:$4 sm:$0xff]  }
 0x1eb   : > { %4986 = vmatpush1.bf16.msra.mxu0 %v6756_v28  ;;  %5330 = vmatpush1.bf16.msra.mxu1 %v6759_v24  ;;  %v1568_v45 = vmul.f32 0.044715, %v8229_v39  ;;  %v8238_v47 = vadd.f32 %v1394_v59, %v493_v6  ;;  %v1396_v48 = vpop.f32.mrb[11].mxu0  ;;  %v8251_v60 = vpack.c.bf16 %v1807_v49, %v1791_v12  ;;  %v8258_v1 = vadd.f32 %v1433_v61, %v501_v0  ;;  %v1435_v2 = vpop.f32.mrb[9].mxu1  ;;  %v6774_v28 = vld [vmem:[%s7933_s27 + $0x360] ss:$16 sps:$4 sm:$0xff]  }
 0x1ec   : > { %4987 = vmatprep.subr.bf16.mxu0 %v6764_v26  ;;  %5331 = vmatprep.subr.bf16.mxu1 %v6767_v35  ;;  %v1569_v53 = vmul.f32 0.044715, %v8232_v22  ;;  %v8245_v56 = vadd.f32 %v1396_v48, %v497_v10  ;;  %v8264_v6 = vadd.f32 %v1435_v2, %v505_v55  ;;  %v1437_v7 = vpop.f32.mrb[10].mxu1  ;;  %v6777_v26 = vld [vmem:[%s7933_s27 + $0x368] ss:$16 sps:$4 sm:$0xff]  }
 0x1ed   : > { %v1600_v57 = vmul.f32 %v1568_v45, %v8229_v39  ;;  %v1584_v58 = vmul.f32 0.044715, %v8238_v47  ;;  %v1570_v10 = vmul.f32 0.044715, %v8258_v1  ;;  %v8270_v18 = vadd.f32 %v1437_v7, %v501_v0  ;;  %v1439_v23 = vpop.f32.mrb[11].mxu1 }
 0x1ee   : > { %v1601_v42 = vmul.f32 %v1569_v53, %v8232_v22  ;;  %v1585_v8 = vmul.f32 0.044715, %v8245_v56  ;;  %v1571_v24 = vmul.f32 0.044715, %v8264_v6  ;;  %v8275_v31 = vadd.f32 %v1439_v23, %v505_v55  ;;  %v6783_v53 = vld [vmem:[%s7933_s27 + $0x388] ss:$16 sps:$4 sm:$0xff]  }
 0x1ef   : > { %4988 = vmatpush1.bf16.msra.mxu0 %v6762_v41  ;;  %5332 = vmatpush1.bf16.msra.mxu1 %v6765_v25  ;;  %v1632_v63 = vmul.f32 %v1600_v57, %v8229_v39  ;;  %v1616_v21 = vmul.f32 %v1584_v58, %v8238_v47  ;;  %v1602_v36 = vmul.f32 %v1570_v10, %v8258_v1  ;;  %v1586_v37 = vmul.f32 0.044715, %v8270_v18  ;;  %v6788_v58 = vld [vmem:[%s7933_s27 + $0x3a4] ss:$16 sps:$4 sm:$0xff]   ;;  %v6791_v61 = vld [vmem:[%s7933_s27 + $0x3ac] ss:$16 sps:$4 sm:$0xff]  }
 0x1f0   : > { %4989 = vmatprep.subr.bf16.mxu0 %v6770_v51  ;;  %5333 = vmatprep.subr.bf16.mxu1 %v6773_v52  ;;  %v1633_v32 = vmul.f32 %v1601_v42, %v8232_v22  ;;  %v1617_v50 = vmul.f32 %v1585_v8, %v8245_v56  ;;  %v1603_v12 = vmul.f32 %v1571_v24, %v8264_v6  ;;  %v1587_v41 = vmul.f32 0.044715, %v8275_v31  ;;  %v6780_v52 = vld [vmem:[%s7933_s27 + $0x380] ss:$16 sps:$4 sm:$0xff]   ;;  %v6797_v7 = vld [vmem:[%s7933_s27 + $0x3cc] ss:$16 sps:$4 sm:$0xff]  }
 0x1f1   : > { %v1664_v9 = vadd.f32 %v1632_v63, %v8229_v39  ;;  %v1648_v16 = vmul.f32 %v1616_v21, %v8238_v47  ;;  %v1634_v44 = vmul.f32 %v1602_v36, %v8258_v1  ;;  %v1618_v45 = vmul.f32 %v1586_v37, %v8270_v18  ;;  %v6786_v21 = vld [vmem:[%s7933_s27 + $0x3a0] ss:$16 sps:$4 sm:$0xff]   ;;  %v6803_v24 = vld [vmem:[%s7933_s27 + $0x3ec] ss:$16 sps:$4 sm:$0xff]  }
 0x1f2   : > { %v1649_v38 = vmul.f32 %v1617_v50, %v8245_v56  ;;  %v1665_v34 = vadd.f32 %v1633_v32, %v8232_v22  ;;  %v1635_v0 = vmul.f32 %v1603_v12, %v8264_v6  ;;  %v1619_v48 = vmul.f32 %v1587_v41, %v8275_v31  ;;  %v6794_v32 = vld [vmem:[%s7933_s27 + $0x3c4] ss:$16 sps:$4 sm:$0xff]   ;;  %v6792_v10 = vld [vmem:[%s7933_s27 + $0x3c0] ss:$16 sps:$4 sm:$0xff]  }
 0x1f3   : > { %4990 = vmatpush1.bf16.msra.mxu0 %v6768_v30  ;;  %5334 = vmatpush1.bf16.msra.mxu1 %v6771_v62  ;;  %v1696_v35 = vmul.f32 0.7978846, %v1664_v9  ;;  %v1680_v54 = vadd.f32 %v1648_v16, %v8238_v47  ;;  %v1666_v55 = vadd.f32 %v1634_v44, %v8258_v1  ;;  %v1650_v57 = vmul.f32 %v1618_v45, %v8270_v18  ;;  %v6795_v16 = vld [vmem:[%s7933_s27 + $0x3c8] ss:$16 sps:$4 sm:$0xff]  }
 0x1f4   : > { %4991 = vmatprep.subr.bf16.mxu0 %v6776_v3  ;;  %5335 = vmatprep.subr.bf16.mxu1 %v6779_v4  ;;  %v1681_v59 = vadd.f32 %v1649_v38, %v8245_v56  ;;  %v1697_v49 = vmul.f32 0.7978846, %v1665_v34  ;;  %v1651_v42 = vmul.f32 %v1619_v48, %v8275_v31  ;;  %v1667_v8 = vadd.f32 %v1635_v0, %v8264_v6  ;;  %v6789_v3 = vld [vmem:[%s7933_s27 + $0x3a8] ss:$16 sps:$4 sm:$0xff]  }
 0x1f5   : > { %7412 = vtanh.f32 %v1696_v35  ;;  %v1712_v25 = vmul.f32 0.7978846, %v1680_v54  ;;  %v1698_v30 = vmul.f32 0.7978846, %v1666_v55  ;;  %v1682_v62 = vadd.f32 %v1650_v57, %v8270_v18  ;;  %v6807_v57 = vld [vmem:[%s7933_s27 + $0x408] ss:$16 sps:$4 sm:$0xff]  }
 0x1f6   : > { %v1713_v51 = vmul.f32 0.7978846, %v1681_v59  ;;  %v1683_v63 = vadd.f32 %v1651_v42, %v8275_v31  ;;  %v1699_v2 = vmul.f32 0.7978846, %v1667_v8  ;;  %v1536_v23 = vmul.f32 0.5, %v8229_v39 }
 0x1f7   : > { %4992 = vmatpush1.bf16.msra.mxu0 %v6774_v28  ;;  %5336 = vmatpush1.bf16.msra.mxu1 %v6777_v26  ;;  %7414 = vtanh.f32 %v1712_v25  ;;  %v1714_v4 = vmul.f32 0.7978846, %v1682_v62  ;;  %v6800_v28 = vld [vmem:[%s7933_s27 + $0x3e4] ss:$16 sps:$4 sm:$0xff]   ;;  %v1552_v38 = vmul.f32 0.5, %v8238_v47  ;;  %v1537_v26 = vmul.f32 0.5, %v8232_v22 }
 0x1f8   : > { %4993 = vmatprep.subr.bf16.mxu0 %v6782_v40  ;;  %5337 = vmatprep.subr.bf16.mxu1 %v6785_v11  ;;  %7416 = vtanh.f32 %v1697_v49  ;;  %v1715_v50 = vmul.f32 0.7978846, %v1683_v63  ;;  %v6798_v39 = vld [vmem:[%s7933_s27 + $0x3e0] ss:$16 sps:$4 sm:$0xff]   ;;  %v6801_v40 = vld [vmem:[%s7933_s27 + $0x3e8] ss:$16 sps:$4 sm:$0xff]  }
 0x1f9   : > { %7418 = vtanh.f32 %v1713_v51  ;;  %v1553_v11 = vmul.f32 0.5, %v8245_v56  ;;  %v6806_v47 = vld [vmem:[%s7933_s27 + $0x404] ss:$16 sps:$4 sm:$0xff]   ;;  %v6809_v59 = vld [vmem:[%s7933_s27 + $0x40c] ss:$16 sps:$4 sm:$0xff]   ;;  %v1538_v44 = vmul.f32 0.5, %v8258_v1 }
 0x1fa   : > { %7420 = vtanh.f32 %v1698_v30  ;;  %v6804_v49 = vld [vmem:[%s7933_s27 + $0x400] ss:$16 sps:$4 sm:$0xff]   ;;  %v1539_v56 = vmul.f32 0.5, %v8264_v6  ;;  %v6815_v42 = vld [vmem:[%s7933_s27 + $0x42c] ss:$16 sps:$4 sm:$0xff]   ;;  %v1555_v30 = vmul.f32 0.5, %v8275_v31 }
 0x1fb   : > { %4994 = vmatpush1.bf16.msra.mxu0 %v6780_v52  ;;  %5338 = vmatpush1.bf16.msra.mxu1 %v6783_v53  ;;  %7422 = vtanh.f32 %v1699_v2  ;;  %v1554_v52 = vmul.f32 0.5, %v8270_v18 }
 0x1fc   : > { %4995 = vmatprep.subr.bf16.mxu0 %v6788_v58  ;;  %5339 = vmatprep.subr.bf16.mxu1 %v6791_v61  ;;  %7424 = vtanh.f32 %v1714_v4  ;;  %v6812_v58 = vld [vmem:[%s7933_s27 + $0x424] ss:$16 sps:$4 sm:$0xff]  }
 0x1fd   : > { %7426 = vtanh.f32 %v1715_v50 }
 0x1ff   : > { %v7413_v9 = vpop.eup %7412  ;;  %4996 = vmatpush1.bf16.msra.mxu0 %v6786_v21  ;;  %5340 = vmatpush1.bf16.msra.mxu1 %v6789_v3  ;;  %v6810_v3 = vld [vmem:[%s7933_s27 + $0x420] ss:$16 sps:$4 sm:$0xff]  }
 0x200   : > { %4997 = vmatprep.subr.bf16.mxu0 %v6794_v32  ;;  %5341 = vmatprep.subr.bf16.mxu1 %v6797_v7  ;;  %v1760_v35 = vadd.f32 1.0, %v7413_v9  ;;  %v6813_v9 = vld [vmem:[%s7933_s27 + $0x428] ss:$16 sps:$4 sm:$0xff]  }
 0x201   : > { %v7415_v34 = vpop.eup %7414 }
 0x202   : > { %v7417_v36 = vpop.eup %7416  ;;  %v1776_v54 = vadd.f32 1.0, %v7415_v34  ;;  %v1792_v41 = vmul.f32 %v1760_v35, %v1536_v23 }
 0x203   : > { %v7419_v37 = vpop.eup %7418  ;;  %4998 = vmatpush1.bf16.msra.mxu0 %v6792_v10  ;;  %5342 = vmatpush1.bf16.msra.mxu1 %v6795_v16  ;;  %v1761_v12 = vadd.f32 1.0, %v7417_v36 }
 0x204   : > { %4999 = vmatprep.subr.bf16.mxu0 %v6800_v28  ;;  %5343 = vmatprep.subr.bf16.mxu1 %v6803_v24  ;;  %v1808_v22 = vmul.f32 %v1776_v54, %v1552_v38  ;;  %v7421_v25 = vpop.eup %7420  ;;  %v1777_v45 = vadd.f32 1.0, %v7419_v37  ;;  %v6821_v28 = vld [vmem:[%s7933_s27 + $0x44c] ss:$16 sps:$4 sm:$0xff]  }
 0x205   : > { %v1793_v0 = vmul.f32 %v1761_v12, %v1537_v26  ;;  %v7423_v48 = vpop.eup %7422  ;;  %v1762_v53 = vadd.f32 1.0, %v7421_v25 }
 0x206   : > { %v8319_v51 = vpack.c.bf16 %v1808_v22, %v1792_v41  ;;  %v7425_v55 = vpop.eup %7424  ;;  %v1809_v1 = vmul.f32 %v1777_v45, %v1553_v11  ;;  %v1763_v61 = vadd.f32 1.0, %v7423_v48 }
 0x207   : > { %5000 = vmatpush1.bf16.msra.mxu0 %v6798_v39  ;;  %5344 = vmatpush1.bf16.msra.mxu1 %v6801_v40  ;;  %v1778_v62 = vadd.f32 1.0, %v7425_v55  ;;  %v1794_v6 = vmul.f32 %v1762_v53, %v1538_v44  ;;  %v7427_v63 = vpop.eup %7426  ;;  %v6816_v39 = vld [vmem:[%s7933_s27 + $0x440] ss:$16 sps:$4 sm:$0xff]   ;;  %v6819_v40 = vld [vmem:[%s7933_s27 + $0x448] ss:$16 sps:$4 sm:$0xff]  }
 0x208   : > { %5012 = vmatprep.subr.bf16.mxu0 %v6806_v47  ;;  %5356 = vmatprep.subr.bf16.mxu1 %v6809_v59  ;;  %v1476_v8 = vpop.f32.mrb[12].mxu0  ;;  %v8330_v21 = vpack.c.bf16 %v1809_v1, %v1793_v0  ;;  %v1779_v32 = vadd.f32 1.0, %v7427_v63  ;;  %v1795_v7 = vmul.f32 %v1763_v61, %v1539_v56  ;;  %v6824_v47 = vld [vmem:[%s7933_s27 + $0x464] ss:$16 sps:$4 sm:$0xff]   ;;  %v6827_v59 = vld [vmem:[%s7933_s27 + $0x46c] ss:$16 sps:$4 sm:$0xff]  }
 0x209   : > { %v8328_v18 = vadd.f32 %v1476_v8, %v8105_v5  ;;  %v1478_v2 = vpop.f32.mrb[13].mxu0  ;;  %v1810_v50 = vmul.f32 %v1778_v62, %v1554_v52  ;;  %v6822_v53 = vld [vmem:[%s7933_s27 + $0x460] ss:$16 sps:$4 sm:$0xff]   ;;  %v6825_v61 = vld [vmem:[%s7933_s27 + $0x468] ss:$16 sps:$4 sm:$0xff]  }
 0x20a   : > { %5002 = vmatmul.mubr.bf16.vlgmr.msra.gmra.mrb[16].mxu0 %v8145_v33  ;;  %5346 = vmatmul.mubr.bf16.vlgmr.msra.gmra.mrb[16].mxu1 %v8145_v33  ;;  %v8336_v4 = vadd.f32 %v1478_v2, %v8111_v20  ;;  %v1480_v31 = vpop.f32.mrb[14].mxu0  ;;  %v6818_v33 = vld [vmem:[%s7933_s27 + $0x444] ss:$16 sps:$4 sm:$0xff]   ;;  %v1811_v34 = vmul.f32 %v1779_v32, %v1555_v30  ;;  %v1519_v36 = vpop.f32.mrb[12].mxu1 }
 0x20b   : > { %5013 = vmatpush1.bf16.msra.mxu0 %v6804_v49  ;;  %5357 = vmatpush1.bf16.msra.mxu1 %v6807_v57  ;;  %v1572_v10 = vmul.f32 0.044715, %v8328_v18  ;;  %v8341_v16 = vadd.f32 %v1480_v31, %v8105_v5  ;;  %v1482_v23 = vpop.f32.mrb[15].mxu0  ;;  %v8349_v26 = vpack.c.bf16 %v1810_v50, %v1794_v6  ;;  %v1521_v12 = vpop.f32.mrb[13].mxu1  ;;  %v6830_v62 = vld [vmem:[%s7933_s27 + $0x484] ss:$16 sps:$4 sm:$0xff]  }
 0x20c   : > { %5014 = vmatprep.subr.bf16.mxu0 %v6812_v58  ;;  %5358 = vmatprep.subr.bf16.mxu1 %v6815_v42  ;;  %v1573_v24 = vmul.f32 0.044715, %v8336_v4  ;;  %v8347_v38 = vadd.f32 %v1482_v23, %v8111_v20  ;;  %v8357_v20 = vpack.c.bf16 %v1811_v34, %v1795_v7  ;;  %v8370_v44 = vadd.f32 %v1521_v12, %v8116_v29  ;;  %v1523_v25 = vpop.f32.mrb[14].mxu1  ;;  %v6833_v6 = vld [vmem:[%s7933_s27 + $0x48c] ss:$16 sps:$4 sm:$0xff]  }
 0x20d   : > { %5044 = vmatprep.mubr.bf16.mxu0 %v8224_v27  ;;  %5388 = vmatprep.mubr.bf16.mxu1 %v8224_v27  ;;  %v1604_v5 = vmul.f32 %v1572_v10, %v8328_v18  ;;  %v1588_v35 = vmul.f32 0.044715, %v8341_v16  ;;  %v8363_v27 = vadd.f32 %v1519_v36, %v8108_v43  ;;  %v8377_v56 = vadd.f32 %v1523_v25, %v8108_v43  ;;  %v1525_v52 = vpop.f32.mrb[15].mxu1  ;;  %v6828_v23 = vld [vmem:[%s7933_s27 + $0x480] ss:$16 sps:$4 sm:$0xff]  }
 0x20e   : > { %v1605_v54 = vmul.f32 %v1573_v24, %v8336_v4  ;;  %v1589_v37 = vmul.f32 0.044715, %v8347_v38  ;;  %v1575_v55 = vmul.f32 0.044715, %v8370_v44  ;;  %v8383_v58 = vadd.f32 %v1525_v52, %v8116_v29  ;;  %v6836_v34 = vld [vmem:[%s7933_s27 + $0x4a4] ss:$16 sps:$4 sm:$0xff]  }
 0x20f   : > { %5015 = vmatpush1.bf16.msra.mxu0 %v6810_v3  ;;  %5359 = vmatpush1.bf16.msra.mxu1 %v6813_v9  ;;  %v1636_v11 = vmul.f32 %v1604_v5, %v8328_v18  ;;  %v1620_v41 = vmul.f32 %v1588_v35, %v8341_v16  ;;  %v1574_v48 = vmul.f32 0.044715, %v8363_v27  ;;  %v1590_v30 = vmul.f32 0.044715, %v8377_v56  ;;  %v6839_v5 = vld [vmem:[%s7933_s27 + $0x4ac] ss:$16 sps:$4 sm:$0xff]  }
 0x210   : > { %5016 = vmatprep.subr.bf16.mxu0 %v6818_v33  ;;  %5360 = vmatprep.subr.bf16.mxu1 %v6821_v28  ;;  %v1637_v22 = vmul.f32 %v1605_v54, %v8336_v4  ;;  %v1621_v45 = vmul.f32 %v1589_v37, %v8347_v38  ;;  %v1607_v29 = vmul.f32 %v1575_v55, %v8370_v44  ;;  %v1591_v63 = vmul.f32 0.044715, %v8383_v58  ;;  %v6831_v33 = vld [vmem:[%s7933_s27 + $0x488] ss:$16 sps:$4 sm:$0xff]   ;;  %v6851_v52 = vld [vmem:[%s7933_s27 + $0x4ec] ss:$16 sps:$4 sm:$0xff]  }
 0x211   : > { %v1668_v0 = vadd.f32 %v1636_v11, %v8328_v18  ;;  %v1652_v49 = vmul.f32 %v1620_v41, %v8341_v16  ;;  %v1606_v43 = vmul.f32 %v1574_v48, %v8363_v27  ;;  %v1622_v32 = vmul.f32 %v1590_v30, %v8377_v56  ;;  %v6834_v11 = vld [vmem:[%s7933_s27 + $0x4a0] ss:$16 sps:$4 sm:$0xff]   ;;  %v6837_v12 = vld [vmem:[%s7933_s27 + $0x4a8] ss:$16 sps:$4 sm:$0xff]  }
 0x212   : > { %v1653_v57 = vmul.f32 %v1621_v45, %v8347_v38  ;;  %v1669_v1 = vadd.f32 %v1637_v22, %v8336_v4  ;;  %v1639_v7 = vmul.f32 %v1607_v29, %v8370_v44  ;;  %v1623_v50 = vmul.f32 %v1591_v63, %v8383_v58  ;;  %v6840_v45 = vld [vmem:[%s7933_s27 + $0x4c0] ss:$16 sps:$4 sm:$0xff]   ;;  %v6857_v29 = vld [vmem:[%s7933_s27 + $0x50c] ss:$16 sps:$4 sm:$0xff]  }
 0x213   : > { %5017 = vmatpush1.bf16.msra.mxu0 %v6816_v39  ;;  %5361 = vmatpush1.bf16.msra.mxu1 %v6819_v40  ;;  %v1700_v42 = vmul.f32 0.7978846, %v1668_v0  ;;  %v1684_v8 = vadd.f32 %v1652_v49, %v8341_v16  ;;  %v1638_v3 = vmul.f32 %v1606_v43, %v8363_v27  ;;  %v1654_v24 = vmul.f32 %v1622_v32, %v8377_v56  ;;  %v6843_v0 = vld [vmem:[%s7933_s27 + $0x4c8] ss:$16 sps:$4 sm:$0xff]   ;;  %v6848_v49 = vld [vmem:[%s7933_s27 + $0x4e4] ss:$16 sps:$4 sm:$0xff]  }
 0x214   : > { %5018 = vmatprep.subr.bf16.mxu0 %v6824_v47  ;;  %5362 = vmatprep.subr.bf16.mxu1 %v6827_v59  ;;  %v1685_v2 = vadd.f32 %v1653_v57, %v8347_v38  ;;  %v1701_v9 = vmul.f32 0.7978846, %v1669_v1  ;;  %v1655_v35 = vmul.f32 %v1623_v50, %v8383_v58  ;;  %v1671_v36 = vadd.f32 %v1639_v7, %v8370_v44  ;;  %v6842_v47 = vld [vmem:[%s7933_s27 + $0x4c4] ss:$16 sps:$4 sm:$0xff]   ;;  %v6845_v59 = vld [vmem:[%s7933_s27 + $0x4cc] ss:$16 sps:$4 sm:$0xff]  }
 0x215   : > { %7428 = vtanh.f32 %v1700_v42  ;;  %v1716_v31 = vmul.f32 0.7978846, %v1684_v8  ;;  %v1670_v28 = vadd.f32 %v1638_v3, %v8363_v27  ;;  %v1686_v37 = vadd.f32 %v1654_v24, %v8377_v56  ;;  %v6849_v8 = vld [vmem:[%s7933_s27 + $0x4e8] ss:$16 sps:$4 sm:$0xff]  }
 0x216   : > { %v1717_v10 = vmul.f32 0.7978846, %v1685_v2  ;;  %v1687_v39 = vadd.f32 %v1655_v35, %v8383_v58  ;;  %v1703_v40 = vmul.f32 0.7978846, %v1671_v36  ;;  %v1540_v48 = vmul.f32 0.5, %v8328_v18 }
 0x217   : > { %5019 = vmatpush1.bf16.msra.mxu0 %v6822_v53  ;;  %5363 = vmatpush1.bf16.msra.mxu1 %v6825_v61  ;;  %7430 = vtanh.f32 %v1716_v31  ;;  %v1702_v54 = vmul.f32 0.7978846, %v1670_v28  ;;  %v1718_v41 = vmul.f32 0.7978846, %v1686_v37  ;;  %v1556_v53 = vmul.f32 0.5, %v8341_v16 }
 0x218   : > { %5020 = vmatprep.subr.bf16.mxu0 %v6830_v62  ;;  %5364 = vmatprep.subr.bf16.mxu1 %v6833_v6  ;;  %7432 = vtanh.f32 %v1701_v9  ;;  %v1719_v22 = vmul.f32 0.7978846, %v1687_v39  ;;  %v1541_v57 = vmul.f32 0.5, %v8336_v4  ;;  %v6846_v18 = vld [vmem:[%s7933_s27 + $0x4e0] ss:$16 sps:$4 sm:$0xff]   ;;  %v1557_v30 = vmul.f32 0.5, %v8347_v38 }
 0x219   : > { %7434 = vtanh.f32 %v1717_v10  ;;  %v6854_v16 = vld [vmem:[%s7933_s27 + $0x504] ss:$16 sps:$4 sm:$0xff]   ;;  %v1542_v31 = vmul.f32 0.5, %v8363_v27  ;;  %v1543_v38 = vmul.f32 0.5, %v8370_v44  ;;  %v6852_v10 = vld [vmem:[%s7933_s27 + $0x500] ss:$16 sps:$4 sm:$0xff]  }
 0x21a   : > { %7436 = vtanh.f32 %v1702_v54  ;;  %v1558_v24 = vmul.f32 0.5, %v8377_v56  ;;  %v6860_v27 = vld [vmem:[%s7933_s27 + $0x524] ss:$16 sps:$4 sm:$0xff]   ;;  %v1559_v44 = vmul.f32 0.5, %v8383_v58  ;;  %v6858_v56 = vld [vmem:[%s7933_s27 + $0x520] ss:$16 sps:$4 sm:$0xff]  }
 0x21b   : > { %5021 = vmatpush1.bf16.msra.mxu0 %v6828_v23  ;;  %5365 = vmatpush1.bf16.msra.mxu1 %v6831_v33  ;;  %7438 = vtanh.f32 %v1703_v40  ;;  %v6855_v23 = vld [vmem:[%s7933_s27 + $0x508] ss:$16 sps:$4 sm:$0xff]   ;;  %v6866_v58 = vld [vmem:[%s7933_s27 + $0x544] ss:$16 sps:$4 sm:$0xff]  }
 0x21c   : > { %5022 = vmatprep.subr.bf16.mxu0 %v6836_v34  ;;  %5366 = vmatprep.subr.bf16.mxu1 %v6839_v5  ;;  %7440 = vtanh.f32 %v1718_v41  ;;  %v6863_v34 = vld [vmem:[%s7933_s27 + $0x52c] ss:$16 sps:$4 sm:$0xff]   ;;  %v6861_v40 = vld [vmem:[%s7933_s27 + $0x528] ss:$16 sps:$4 sm:$0xff]  }
 0x21d   : > { %7442 = vtanh.f32 %v1719_v22  ;;  %v6864_v22 = vld [vmem:[%s7933_s27 + $0x540] ss:$16 sps:$4 sm:$0xff]  }
 0x21f   : > { %v7429_v25 = vpop.eup %7428  ;;  %5023 = vmatpush1.bf16.msra.mxu0 %v6834_v11  ;;  %5367 = vmatpush1.bf16.msra.mxu1 %v6837_v12  ;;  %v6869_v12 = vld [vmem:[%s7933_s27 + $0x54c] ss:$16 sps:$4 sm:$0xff]  }
 0x220   : > { %5024 = vmatprep.subr.bf16.mxu0 %v6842_v47  ;;  %5368 = vmatprep.subr.bf16.mxu1 %v6845_v59  ;;  %v1764_v1 = vadd.f32 1.0, %v7429_v25  ;;  %v6867_v25 = vld [vmem:[%s7933_s27 + $0x548] ss:$16 sps:$4 sm:$0xff]  }
 0x221   : > { %v7431_v55 = vpop.eup %7430 }
 0x222   : > { %v7433_v61 = vpop.eup %7432  ;;  %v1780_v42 = vadd.f32 1.0, %v7431_v55  ;;  %v1796_v6 = vmul.f32 %v1764_v1, %v1540_v48  ;;  %v6870_v48 = vld [vmem:[%s7933_s27 + $0x560] ss:$16 sps:$4 sm:$0xff]   ;;  %v6884_v1 = vld [vmem:[%s7933_s27 + $0x5a4] ss:$16 sps:$4 sm:$0xff]  }
 0x223   : > { %v7435_v43 = vpop.eup %7434  ;;  %5025 = vmatpush1.bf16.msra.mxu0 %v6840_v45  ;;  %5369 = vmatpush1.bf16.msra.mxu1 %v6843_v0  ;;  %v1765_v62 = vadd.f32 1.0, %v7433_v61  ;;  %v6872_v45 = vld [vmem:[%s7933_s27 + $0x564] ss:$16 sps:$4 sm:$0xff]   ;;  %v6875_v0 = vld [vmem:[%s7933_s27 + $0x56c] ss:$16 sps:$4 sm:$0xff]  }
 0x224   : > { %5026 = vmatprep.subr.bf16.mxu0 %v6848_v49  ;;  %5370 = vmatprep.subr.bf16.mxu1 %v6851_v52  ;;  %v1812_v63 = vmul.f32 %v1780_v42, %v1556_v53  ;;  %v7437_v4 = vpop.eup %7436  ;;  %v1781_v2 = vadd.f32 1.0, %v7435_v43  ;;  %v6873_v49 = vld [vmem:[%s7933_s27 + $0x568] ss:$16 sps:$4 sm:$0xff]   ;;  %v6878_v52 = vld [vmem:[%s7933_s27 + $0x584] ss:$16 sps:$4 sm:$0xff]  }
 0x225   : > { %v1797_v3 = vmul.f32 %v1765_v62, %v1541_v57  ;;  %v7439_v32 = vpop.eup %7438  ;;  %v1766_v50 = vadd.f32 1.0, %v7437_v4  ;;  %v6881_v53 = vld [vmem:[%s7933_s27 + $0x58c] ss:$16 sps:$4 sm:$0xff]   ;;  %v6876_v55 = vld [vmem:[%s7933_s27 + $0x580] ss:$16 sps:$4 sm:$0xff]  }
 0x226   : > { %v8426_v7 = vpack.c.bf16 %v1812_v63, %v1796_v6  ;;  %v7441_v9 = vpop.eup %7440  ;;  %v1813_v33 = vmul.f32 %v1781_v2, %v1557_v30  ;;  %v1767_v28 = vadd.f32 1.0, %v7439_v32  ;;  %v6879_v57 = vld [vmem:[%s7933_s27 + $0x588] ss:$16 sps:$4 sm:$0xff]   ;;  %v6887_v61 = vld [vmem:[%s7933_s27 + $0x5ac] ss:$16 sps:$4 sm:$0xff]  }
 0x227   : > { %5027 = vmatpush1.bf16.msra.mxu0 %v6846_v18  ;;  %5371 = vmatpush1.bf16.msra.mxu1 %v6849_v8  ;;  %v7443_v5 = vpop.eup %7442  ;;  %v1782_v36 = vadd.f32 1.0, %v7441_v9  ;;  %v1798_v54 = vmul.f32 %v1766_v50, %v1542_v31  ;;  %v6882_v42 = vld [vmem:[%s7933_s27 + $0x5a0] ss:$16 sps:$4 sm:$0xff]   ;;  %v6885_v43 = vld [vmem:[%s7933_s27 + $0x5a8] ss:$16 sps:$4 sm:$0xff]  }
 0x228   : > { %5028 = vmatprep.subr.bf16.mxu0 %v6854_v16  ;;  %5372 = vmatprep.subr.bf16.mxu1 %v6857_v29  ;;  %v8435_v35 = vpack.c.bf16 %v1813_v33, %v1797_v3  ;;  %v1783_v37 = vadd.f32 1.0, %v7443_v5  ;;  %v1799_v39 = vmul.f32 %v1767_v28, %v1543_v38  ;;  %v6890_v18 = vld [vmem:[%s7933_s27 + $0x5c4] ss:$16 sps:$4 sm:$0xff]   ;;  %v6893_v8 = vld [vmem:[%s7933_s27 + $0x5cc] ss:$16 sps:$4 sm:$0xff]  }
 0x229   : > { %v1814_v11 = vmul.f32 %v1782_v36, %v1558_v24  ;;  %v6888_v30 = vld [vmem:[%s7933_s27 + $0x5c0] ss:$16 sps:$4 sm:$0xff]   ;;  %v6891_v62 = vld [vmem:[%s7933_s27 + $0x5c8] ss:$16 sps:$4 sm:$0xff]   ;;  %v6896_v6 = vld [vmem:[%s7933_s27 + $0x5e4] ss:$16 sps:$4 sm:$0xff]  }
 0x22a   : > { %v1815_v41 = vmul.f32 %v1783_v37, %v1559_v44  ;;  %v6899_v16 = vld [vmem:[%s7933_s27 + $0x5ec] ss:$16 sps:$4 sm:$0xff]   ;;  %v6894_v29 = vld [vmem:[%s7933_s27 + $0x5e0] ss:$16 sps:$4 sm:$0xff]   ;;  %v6897_v63 = vld [vmem:[%s7933_s27 + $0x5e8] ss:$16 sps:$4 sm:$0xff]  }
 0x22b   : > { %5029 = vmatpush1.bf16.msra.mxu0 %v6852_v10  ;;  %5373 = vmatpush1.bf16.msra.mxu1 %v6855_v23  ;;  %v8441_v47 = vpack.c.bf16 %v1814_v11, %v1798_v54  ;;  %v6902_v4 = vld [vmem:[%s7933_s27 + $0x604] ss:$16 sps:$4 sm:$0xff]   ;;  %v6905_v2 = vld [vmem:[%s7933_s27 + $0x60c] ss:$16 sps:$4 sm:$0xff]   ;;  %v6900_v3 = vld [vmem:[%s7933_s27 + $0x600] ss:$16 sps:$4 sm:$0xff]  }
 0x22c   : > { %5030 = vmatprep.subr.bf16.mxu0 %v6860_v27  ;;  %5374 = vmatprep.subr.bf16.mxu1 %v6863_v34  ;;  %v8443_v59 = vpack.c.bf16 %v1815_v41, %v1799_v39  ;;  %v6903_v31 = vld [vmem:[%s7933_s27 + $0x608] ss:$16 sps:$4 sm:$0xff]   ;;  %v6908_v32 = vld [vmem:[%s7933_s27 + $0x624] ss:$16 sps:$4 sm:$0xff]   ;;  %v6911_v38 = vld [vmem:[%s7933_s27 + $0x62c] ss:$16 sps:$4 sm:$0xff]  }
 0x22d   : > { %v6906_v50 = vld [vmem:[%s7933_s27 + $0x620] ss:$16 sps:$4 sm:$0xff]   ;;  %v6909_v9 = vld [vmem:[%s7933_s27 + $0x628] ss:$16 sps:$4 sm:$0xff]   ;;  %v6914_v10 = vld [vmem:[%s7933_s27 + $0x644] ss:$16 sps:$4 sm:$0xff]  }
 0x22e   : > { %v6917_v23 = vld [vmem:[%s7933_s27 + $0x64c] ss:$16 sps:$4 sm:$0xff]   ;;  %v6915_v33 = vld [vmem:[%s7933_s27 + $0x648] ss:$16 sps:$4 sm:$0xff]   ;;  %v6920_v28 = vld [vmem:[%s7933_s27 + $0x664] ss:$16 sps:$4 sm:$0xff]  }
 0x22f   : > { %5031 = vmatpush1.bf16.msra.mxu0 %v6858_v56  ;;  %5375 = vmatpush1.bf16.msra.mxu1 %v6861_v40  ;;  %v6923_v24 = vld [vmem:[%s7933_s27 + $0x66c] ss:$16 sps:$4 sm:$0xff]   ;;  %v6921_v27 = vld [vmem:[%s7933_s27 + $0x668] ss:$16 sps:$4 sm:$0xff]   ;;  %v6926_v34 = vld [vmem:[%s7933_s27 + $0x684] ss:$16 sps:$4 sm:$0xff]  }
 0x230   : > { %5032 = vmatprep.subr.bf16.mxu0 %v6866_v58  ;;  %5376 = vmatprep.subr.bf16.mxu1 %v6869_v12  ;;  %v6929_v44 = vld [vmem:[%s7933_s27 + $0x68c] ss:$16 sps:$4 sm:$0xff]   ;;  %v6924_v5 = vld [vmem:[%s7933_s27 + $0x680] ss:$16 sps:$4 sm:$0xff]   ;;  %v6927_v36 = vld [vmem:[%s7933_s27 + $0x688] ss:$16 sps:$4 sm:$0xff]  }
 0x231   : > { %v6932_v54 = vld [vmem:[%s7933_s27 + $0x6a4] ss:$16 sps:$4 sm:$0xff]   ;;  %v6935_v37 = vld [vmem:[%s7933_s27 + $0x6ac] ss:$16 sps:$4 sm:$0xff]   ;;  %v6930_v39 = vld [vmem:[%s7933_s27 + $0x6a0] ss:$16 sps:$4 sm:$0xff]  }
 0x232   : > { %v6933_v56 = vld [vmem:[%s7933_s27 + $0x6a8] ss:$16 sps:$4 sm:$0xff]   ;;  %v6938_v40 = vld [vmem:[%s7933_s27 + $0x6c4] ss:$16 sps:$4 sm:$0xff]   ;;  %v6941_v11 = vld [vmem:[%s7933_s27 + $0x6cc] ss:$16 sps:$4 sm:$0xff]  }
 0x233   : > { %5033 = vmatpush1.bf16.msra.mxu0 %v6864_v22  ;;  %5377 = vmatpush1.bf16.msra.mxu1 %v6867_v25  ;;  %v6936_v58 = vld [vmem:[%s7933_s27 + $0x6c0] ss:$16 sps:$4 sm:$0xff]   ;;  %v6939_v12 = vld [vmem:[%s7933_s27 + $0x6c8] ss:$16 sps:$4 sm:$0xff]   ;;  %v6944_v41 = vld [vmem:[%s7933_s27 + $0x6e4] ss:$16 sps:$4 sm:$0xff]  }
 0x234   : > { %5034 = vmatprep.subr.bf16.mxu0 %v6872_v45  ;;  %5378 = vmatprep.subr.bf16.mxu1 %v6875_v0  ;;  %v6947_v22 = vld [vmem:[%s7933_s27 + $0x6ec] ss:$16 sps:$4 sm:$0xff]   ;;  %v6942_v25 = vld [vmem:[%s7933_s27 + $0x6e0] ss:$16 sps:$4 sm:$0xff]   ;;  %v6945_v45 = vld [vmem:[%s7933_s27 + $0x6e8] ss:$16 sps:$4 sm:$0xff]  }
 0x235   : > { %v6950_v0 = vld [vmem:[%s7933_s27 + $0x704] ss:$16 sps:$4 sm:$0xff]  }
 0x237   : > { %5035 = vmatpush1.bf16.msra.mxu0 %v6870_v48  ;;  %5379 = vmatpush1.bf16.msra.mxu1 %v6873_v49  ;;  %v6953_v48 = vld [vmem:[%s7933_s27 + $0x70c] ss:$16 sps:$4 sm:$0xff]   ;;  %v6948_v49 = vld [vmem:[%s7933_s27 + $0x700] ss:$16 sps:$4 sm:$0xff]  }
 0x238   : > { %5036 = vmatprep.subr.bf16.mxu0 %v6878_v52  ;;  %5380 = vmatprep.subr.bf16.mxu1 %v6881_v53  ;;  %v6951_v52 = vld [vmem:[%s7933_s27 + $0x708] ss:$16 sps:$4 sm:$0xff]   ;;  %v6956_v53 = vld [vmem:[%s7933_s27 + $0x724] ss:$16 sps:$4 sm:$0xff]  }
 0x23b   : > { %5037 = vmatpush1.bf16.msra.mxu0 %v6876_v55  ;;  %5381 = vmatpush1.bf16.msra.mxu1 %v6879_v57  ;;  %v6959_v55 = vld [vmem:[%s7933_s27 + $0x72c] ss:$16 sps:$4 sm:$0xff]   ;;  %v6954_v57 = vld [vmem:[%s7933_s27 + $0x720] ss:$16 sps:$4 sm:$0xff]  }
 0x23c   : > { %5038 = vmatprep.subr.bf16.mxu0 %v6884_v1  ;;  %5382 = vmatprep.subr.bf16.mxu1 %v6887_v61  ;;  %v6957_v1 = vld [vmem:[%s7933_s27 + $0x728] ss:$16 sps:$4 sm:$0xff]   ;;  %v6962_v61 = vld [vmem:[%s7933_s27 + $0x744] ss:$16 sps:$4 sm:$0xff]  }
 0x23f   : > { %5039 = vmatpush1.bf16.msra.mxu0 %v6882_v42  ;;  %5383 = vmatpush1.bf16.msra.mxu1 %v6885_v43  ;;  %v6965_v42 = vld [vmem:[%s7933_s27 + $0x74c] ss:$16 sps:$4 sm:$0xff]   ;;  %v6960_v43 = vld [vmem:[%s7933_s27 + $0x740] ss:$16 sps:$4 sm:$0xff]  }
 0x240   : > { %5040 = vmatprep.subr.bf16.mxu0 %v6890_v18  ;;  %5384 = vmatprep.subr.bf16.mxu1 %v6893_v8  ;;  %v6963_v18 = vld [vmem:[%s7933_s27 + $0x748] ss:$16 sps:$4 sm:$0xff]   ;;  %v6968_v8 = vld [vmem:[%s7933_s27 + $0x764] ss:$16 sps:$4 sm:$0xff]  }
 0x243   : > { %5041 = vmatpush1.bf16.msra.mxu0 %v6888_v30  ;;  %5385 = vmatpush1.bf16.msra.mxu1 %v6891_v62  ;;  %v6971_v30 = vld [vmem:[%s7933_s27 + $0x76c] ss:$16 sps:$4 sm:$0xff]   ;;  %v6966_v62 = vld [vmem:[%s7933_s27 + $0x760] ss:$16 sps:$4 sm:$0xff]  }
 0x244   : > { %5042 = vmatprep.subr.bf16.mxu0 %v6896_v6  ;;  %5386 = vmatprep.subr.bf16.mxu1 %v6899_v16  ;;  %v6969_v6 = vld [vmem:[%s7933_s27 + $0x768] ss:$16 sps:$4 sm:$0xff]   ;;  %v6974_v16 = vld [vmem:[%s7933_s27 + $0x784] ss:$16 sps:$4 sm:$0xff]  }
 0x247   : > { %5043 = vmatpush1.bf16.msra.mxu0 %v6894_v29  ;;  %5387 = vmatpush1.bf16.msra.mxu1 %v6897_v63  ;;  %v6977_v29 = vld [vmem:[%s7933_s27 + $0x78c] ss:$16 sps:$4 sm:$0xff]   ;;  %v6972_v63 = vld [vmem:[%s7933_s27 + $0x780] ss:$16 sps:$4 sm:$0xff]  }
 0x248   : > { %5055 = vmatprep.subr.bf16.mxu0 %v6902_v4  ;;  %5399 = vmatprep.subr.bf16.mxu1 %v6905_v2  ;;  %v6975_v4 = vld [vmem:[%s7933_s27 + $0x788] ss:$16 sps:$4 sm:$0xff]   ;;  %v6980_v2 = vld [vmem:[%s7933_s27 + $0x7a4] ss:$16 sps:$4 sm:$0xff]  }
 0x24a   : > { %5045 = vmatmul.mubr.bf16.vlgmr.msra.gmra.mrb[16].mxu0 %v8219_v15  ;;  %5389 = vmatmul.mubr.bf16.vlgmr.msra.gmra.mrb[16].mxu1 %v8219_v15  ;;  %v6912_v15 = vld [vmem:[%s7933_s27 + $0x640] ss:$16 sps:$4 sm:$0xff]  }
 0x24b   : > { %5056 = vmatpush1.bf16.msra.mxu0 %v6900_v3  ;;  %5087 = vmatprep.mubr.bf16.mxu0 %v8251_v60  ;;  %v6983_v3 = vld [vmem:[%s7933_s27 + $0x7ac] ss:$16 sps:$4 sm:$0xff]  }
 0x24c   : > { %5400 = vmatpush1.bf16.msra.mxu1 %v6903_v31  ;;  %5431 = vmatprep.mubr.bf16.mxu1 %v8251_v60  ;;  %v6918_v60 = vld [vmem:[%s7933_s27 + $0x660] ss:$16 sps:$4 sm:$0xff]  }
 0x24d   : > { %5057 = vmatprep.subr.bf16.mxu0 %v6908_v32  ;;  %5401 = vmatprep.subr.bf16.mxu1 %v6911_v38  ;;  %v6978_v31 = vld [vmem:[%s7933_s27 + $0x7a0] ss:$16 sps:$4 sm:$0xff]   ;;  %v6981_v32 = vld [vmem:[%s7933_s27 + $0x7a8] ss:$16 sps:$4 sm:$0xff]   ;;  %v6986_v38 = vld [vmem:[%s7933_s27 + $0x7c4] ss:$16 sps:$4 sm:$0xff]  }
 0x24f   : > { %5058 = vmatpush1.bf16.msra.mxu0 %v6906_v50  ;;  %v6989_v50 = vld [vmem:[%s7933_s27 + $0x7cc] ss:$16 sps:$4 sm:$0xff]  }
 0x250   : > { %5402 = vmatpush1.bf16.msra.mxu1 %v6909_v9  ;;  %5059 = vmatprep.subr.bf16.mxu0 %v6914_v10  ;;  %v6984_v9 = vld [vmem:[%s7933_s27 + $0x7c0] ss:$16 sps:$4 sm:$0xff]   ;;  %v6987_v10 = vld [vmem:[%s7933_s27 + $0x7c8] ss:$16 sps:$4 sm:$0xff]  }
 0x251   : > { %5403 = vmatprep.subr.bf16.mxu1 %v6917_v23  ;;  %v6992_v23 = vld [vmem:[%s7933_s27 + $0x7e4] ss:$16 sps:$4 sm:$0xff]  }
 0x253   : > { %5060 = vmatpush1.bf16.msra.mxu0 %v6912_v15  ;;  %v6995_v15 = vld [vmem:[%s7933_s27 + $0x7ec] ss:$16 sps:$4 sm:$0xff]  }
 0x254   : > { %5404 = vmatpush1.bf16.msra.mxu1 %v6915_v33  ;;  %5061 = vmatprep.subr.bf16.mxu0 %v6920_v28  ;;  %v6990_v33 = vld [vmem:[%s7933_s27 + $0x7e0] ss:$16 sps:$4 sm:$0xff]   ;;  %v6993_v28 = vld [vmem:[%s7933_s27 + $0x7e8] ss:$16 sps:$4 sm:$0xff]  }
 0x255   : > { %5405 = vmatprep.subr.bf16.mxu1 %v6923_v24  ;;  %v6998_v24 = vld [vmem:[%s7933_s27 + $0x804] ss:$16 sps:$4 sm:$0xff]  }
 0x257   : > { %5062 = vmatpush1.bf16.msra.mxu0 %v6918_v60  ;;  %v7001_v60 = vld [vmem:[%s7933_s27 + $0x80c] ss:$16 sps:$4 sm:$0xff]  }
 0x258   : > { %5406 = vmatpush1.bf16.msra.mxu1 %v6921_v27  ;;  %5063 = vmatprep.subr.bf16.mxu0 %v6926_v34  ;;  %v6996_v27 = vld [vmem:[%s7933_s27 + $0x800] ss:$16 sps:$4 sm:$0xff]   ;;  %v6999_v34 = vld [vmem:[%s7933_s27 + $0x808] ss:$16 sps:$4 sm:$0xff]  }
 0x259   : > { %5407 = vmatprep.subr.bf16.mxu1 %v6929_v44  ;;  %v7004_v44 = vld [vmem:[%s7933_s27 + $0x824] ss:$16 sps:$4 sm:$0xff]  }
 0x25b   : > { %5064 = vmatpush1.bf16.msra.mxu0 %v6924_v5  ;;  %v7007_v5 = vld [vmem:[%s7933_s27 + $0x82c] ss:$16 sps:$4 sm:$0xff]  }
 0x25c   : > { %5408 = vmatpush1.bf16.msra.mxu1 %v6927_v36  ;;  %5065 = vmatprep.subr.bf16.mxu0 %v6932_v54  ;;  %v7002_v36 = vld [vmem:[%s7933_s27 + $0x820] ss:$16 sps:$4 sm:$0xff]   ;;  %v7005_v54 = vld [vmem:[%s7933_s27 + $0x828] ss:$16 sps:$4 sm:$0xff]  }
 0x25d   : > { %5409 = vmatprep.subr.bf16.mxu1 %v6935_v37  ;;  %v7010_v37 = vld [vmem:[%s7933_s27 + $0x844] ss:$16 sps:$4 sm:$0xff]  }
 0x25f   : > { %5066 = vmatpush1.bf16.msra.mxu0 %v6930_v39  ;;  %v7013_v39 = vld [vmem:[%s7933_s27 + $0x84c] ss:$16 sps:$4 sm:$0xff]  }
 0x260   : > { %5410 = vmatpush1.bf16.msra.mxu1 %v6933_v56  ;;  %5067 = vmatprep.subr.bf16.mxu0 %v6938_v40  ;;  %v7011_v56 = vld [vmem:[%s7933_s27 + $0x848] ss:$16 sps:$4 sm:$0xff]   ;;  %v7016_v40 = vld [vmem:[%s7933_s27 + $0x864] ss:$16 sps:$4 sm:$0xff]  }
 0x261   : > { %5411 = vmatprep.subr.bf16.mxu1 %v6941_v11  ;;  %v7019_v11 = vld [vmem:[%s7933_s27 + $0x86c] ss:$16 sps:$4 sm:$0xff]  }
 0x263   : > { %5068 = vmatpush1.bf16.msra.mxu0 %v6936_v58  ;;  %v7017_v58 = vld [vmem:[%s7933_s27 + $0x868] ss:$16 sps:$4 sm:$0xff]  }
 0x264   : > { %5412 = vmatpush1.bf16.msra.mxu1 %v6939_v12  ;;  %5069 = vmatprep.subr.bf16.mxu0 %v6944_v41  ;;  %v7022_v12 = vld [vmem:[%s7933_s27 + $0x884] ss:$16 sps:$4 sm:$0xff]   ;;  %v7025_v41 = vld [vmem:[%s7933_s27 + $0x88c] ss:$16 sps:$4 sm:$0xff]  }
 0x265   : > { %5413 = vmatprep.subr.bf16.mxu1 %v6947_v22  ;;  %v7020_v22 = vld [vmem:[%s7933_s27 + $0x880] ss:$16 sps:$4 sm:$0xff]  }
 0x267   : > { %5070 = vmatpush1.bf16.msra.mxu0 %v6942_v25  ;;  %v7023_v25 = vld [vmem:[%s7933_s27 + $0x888] ss:$16 sps:$4 sm:$0xff]  }
 0x268   : > { %5414 = vmatpush1.bf16.msra.mxu1 %v6945_v45  ;;  %5071 = vmatprep.subr.bf16.mxu0 %v6950_v0  ;;  %v7028_v45 = vld [vmem:[%s7933_s27 + $0x8a4] ss:$16 sps:$4 sm:$0xff]   ;;  %v7031_v0 = vld [vmem:[%s7933_s27 + $0x8ac] ss:$16 sps:$4 sm:$0xff]  }
 0x269   : > { %5415 = vmatprep.subr.bf16.mxu1 %v6953_v48  ;;  %v7026_v48 = vld [vmem:[%s7933_s27 + $0x8a0] ss:$16 sps:$4 sm:$0xff]  }
 0x26b   : > { %5072 = vmatpush1.bf16.msra.mxu0 %v6948_v49  ;;  %v7029_v49 = vld [vmem:[%s7933_s27 + $0x8a8] ss:$16 sps:$4 sm:$0xff]  }
 0x26c   : > { %5416 = vmatpush1.bf16.msra.mxu1 %v6951_v52  ;;  %5073 = vmatprep.subr.bf16.mxu0 %v6956_v53  ;;  %v7034_v52 = vld [vmem:[%s7933_s27 + $0x8c4] ss:$16 sps:$4 sm:$0xff]   ;;  %v7037_v53 = vld [vmem:[%s7933_s27 + $0x8cc] ss:$16 sps:$4 sm:$0xff]  }
 0x26d   : > { %5417 = vmatprep.subr.bf16.mxu1 %v6959_v55  ;;  %v7032_v55 = vld [vmem:[%s7933_s27 + $0x8c0] ss:$16 sps:$4 sm:$0xff]  }
 0x26f   : > { %5074 = vmatpush1.bf16.msra.mxu0 %v6954_v57  ;;  %v7035_v57 = vld [vmem:[%s7933_s27 + $0x8c8] ss:$16 sps:$4 sm:$0xff]  }
 0x270   : > { %5418 = vmatpush1.bf16.msra.mxu1 %v6957_v1  ;;  %5075 = vmatprep.subr.bf16.mxu0 %v6962_v61  ;;  %v7040_v1 = vld [vmem:[%s7933_s27 + $0x8e4] ss:$16 sps:$4 sm:$0xff]   ;;  %v7043_v61 = vld [vmem:[%s7933_s27 + $0x8ec] ss:$16 sps:$4 sm:$0xff]  }
 0x271   : > { %5419 = vmatprep.subr.bf16.mxu1 %v6965_v42  ;;  %v7038_v42 = vld [vmem:[%s7933_s27 + $0x8e0] ss:$16 sps:$4 sm:$0xff]  }
 0x273   : > { %5076 = vmatpush1.bf16.msra.mxu0 %v6960_v43  ;;  %v7041_v43 = vld [vmem:[%s7933_s27 + $0x8e8] ss:$16 sps:$4 sm:$0xff]  }
 0x274   : > { %5420 = vmatpush1.bf16.msra.mxu1 %v6963_v18  ;;  %5077 = vmatprep.subr.bf16.mxu0 %v6968_v8  ;;  %v7046_v18 = vld [vmem:[%s7933_s27 + $0x904] ss:$16 sps:$4 sm:$0xff]   ;;  %v7049_v8 = vld [vmem:[%s7933_s27 + $0x90c] ss:$16 sps:$4 sm:$0xff]  }
 0x275   : > { %5421 = vmatprep.subr.bf16.mxu1 %v6971_v30  ;;  %v7044_v30 = vld [vmem:[%s7933_s27 + $0x900] ss:$16 sps:$4 sm:$0xff]  }
 0x277   : > { %5078 = vmatpush1.bf16.msra.mxu0 %v6966_v62  ;;  %v7047_v62 = vld [vmem:[%s7933_s27 + $0x908] ss:$16 sps:$4 sm:$0xff]  }
 0x278   : > { %5422 = vmatpush1.bf16.msra.mxu1 %v6969_v6  ;;  %5079 = vmatprep.subr.bf16.mxu0 %v6974_v16  ;;  %v7052_v6 = vld [vmem:[%s7933_s27 + $0x924] ss:$16 sps:$4 sm:$0xff]   ;;  %v7055_v16 = vld [vmem:[%s7933_s27 + $0x92c] ss:$16 sps:$4 sm:$0xff]  }
 0x279   : > { %5423 = vmatprep.subr.bf16.mxu1 %v6977_v29  ;;  %v7050_v29 = vld [vmem:[%s7933_s27 + $0x920] ss:$16 sps:$4 sm:$0xff]  }
 0x27b   : > { %5080 = vmatpush1.bf16.msra.mxu0 %v6972_v63  ;;  %v7053_v63 = vld [vmem:[%s7933_s27 + $0x928] ss:$16 sps:$4 sm:$0xff]  }
 0x27c   : > { %5424 = vmatpush1.bf16.msra.mxu1 %v6975_v4  ;;  %5081 = vmatprep.subr.bf16.mxu0 %v6980_v2  ;;  %v7058_v4 = vld [vmem:[%s7933_s27 + $0x944] ss:$16 sps:$4 sm:$0xff]   ;;  %v7061_v2 = vld [vmem:[%s7933_s27 + $0x94c] ss:$16 sps:$4 sm:$0xff]  }
 0x27d   : > { %5425 = vmatprep.subr.bf16.mxu1 %v6983_v3  ;;  %v7056_v3 = vld [vmem:[%s7933_s27 + $0x940] ss:$16 sps:$4 sm:$0xff]  }
 0x27f   : > { %5082 = vmatpush1.bf16.msra.mxu0 %v6978_v31  ;;  %v7059_v31 = vld [vmem:[%s7933_s27 + $0x948] ss:$16 sps:$4 sm:$0xff]  }
 0x280   : > { %5426 = vmatpush1.bf16.msra.mxu1 %v6981_v32  ;;  %5083 = vmatprep.subr.bf16.mxu0 %v6986_v38  ;;  %v7064_v32 = vld [vmem:[%s7933_s27 + $0x964] ss:$16 sps:$4 sm:$0xff]   ;;  %v7067_v38 = vld [vmem:[%s7933_s27 + $0x96c] ss:$16 sps:$4 sm:$0xff]  }
 0x281   : > { %5427 = vmatprep.subr.bf16.mxu1 %v6989_v50  ;;  %v7062_v50 = vld [vmem:[%s7933_s27 + $0x960] ss:$16 sps:$4 sm:$0xff]  }
 0x283   : > { %5084 = vmatpush1.bf16.msra.mxu0 %v6984_v9  ;;  %v7065_v9 = vld [vmem:[%s7933_s27 + $0x968] ss:$16 sps:$4 sm:$0xff]  }
 0x284   : > { %5428 = vmatpush1.bf16.msra.mxu1 %v6987_v10  ;;  %5085 = vmatprep.subr.bf16.mxu0 %v6992_v23  ;;  %v7070_v10 = vld [vmem:[%s7933_s27 + $0x984] ss:$16 sps:$4 sm:$0xff]   ;;  %v7073_v23 = vld [vmem:[%s7933_s27 + $0x98c] ss:$16 sps:$4 sm:$0xff]  }
 0x285   : > { %5429 = vmatprep.subr.bf16.mxu1 %v6995_v15  ;;  %v7068_v15 = vld [vmem:[%s7933_s27 + $0x980] ss:$16 sps:$4 sm:$0xff]  }
 0x287   : > { %5086 = vmatpush1.bf16.msra.mxu0 %v6990_v33  ;;  %v7071_v33 = vld [vmem:[%s7933_s27 + $0x988] ss:$16 sps:$4 sm:$0xff]  }
 0x288   : > { %5430 = vmatpush1.bf16.msra.mxu1 %v6993_v28  ;;  %5098 = vmatprep.subr.bf16.mxu0 %v6998_v24  ;;  %v7076_v28 = vld [vmem:[%s7933_s27 + $0x9a4] ss:$16 sps:$4 sm:$0xff]   ;;  %v7079_v24 = vld [vmem:[%s7933_s27 + $0x9ac] ss:$16 sps:$4 sm:$0xff]  }
 0x289   : > { %5442 = vmatprep.subr.bf16.mxu1 %v7001_v60  ;;  %v7074_v60 = vld [vmem:[%s7933_s27 + $0x9a0] ss:$16 sps:$4 sm:$0xff]  }
 0x28a   : > { %5088 = vmatmul.mubr.bf16.vlgmr.msra.gmra.mrb[16].mxu0 %v8247_v46 }
 0x28b   : > { %5432 = vmatmul.mubr.bf16.vlgmr.msra.gmra.mrb[16].mxu1 %v8247_v46  ;;  %5099 = vmatpush1.bf16.msra.mxu0 %v6996_v27  ;;  %v7008_v46 = vld [vmem:[%s7933_s27 + $0x840] ss:$16 sps:$4 sm:$0xff]   ;;  %v7077_v27 = vld [vmem:[%s7933_s27 + $0x9a8] ss:$16 sps:$4 sm:$0xff]  }
 0x28c   : > { %5130 = vmatprep.mubr.bf16.mxu0 %v8330_v21  ;;  %5443 = vmatpush1.bf16.msra.mxu1 %v6999_v34  ;;  %v7082_v34 = vld [vmem:[%s7933_s27 + $0x9c4] ss:$16 sps:$4 sm:$0xff]  }
 0x28d   : > { %5474 = vmatprep.mubr.bf16.mxu1 %v8330_v21  ;;  %5100 = vmatprep.subr.bf16.mxu0 %v7004_v44  ;;  %v7014_v21 = vld [vmem:[%s7933_s27 + $0x860] ss:$16 sps:$4 sm:$0xff]   ;;  %v7085_v44 = vld [vmem:[%s7933_s27 + $0x9cc] ss:$16 sps:$4 sm:$0xff]  }
 0x28e   : > { %5444 = vmatprep.subr.bf16.mxu1 %v7007_v5  ;;  %v7080_v5 = vld [vmem:[%s7933_s27 + $0x9c0] ss:$16 sps:$4 sm:$0xff]  }
 0x28f   : > { %5101 = vmatpush1.bf16.msra.mxu0 %v7002_v36  ;;  %v7083_v36 = vld [vmem:[%s7933_s27 + $0x9c8] ss:$16 sps:$4 sm:$0xff]  }
 0x290   : > { %5445 = vmatpush1.bf16.msra.mxu1 %v7005_v54  ;;  %5102 = vmatprep.subr.bf16.mxu0 %v7010_v37  ;;  %v7088_v54 = vld [vmem:[%s7933_s27 + $0x9e4] ss:$16 sps:$4 sm:$0xff]   ;;  %v7091_v37 = vld [vmem:[%s7933_s27 + $0x9ec] ss:$16 sps:$4 sm:$0xff]  }
 0x291   : > { %5446 = vmatprep.subr.bf16.mxu1 %v7013_v39  ;;  %v7086_v39 = vld [vmem:[%s7933_s27 + $0x9e0] ss:$16 sps:$4 sm:$0xff]  }
 0x293   : > { %5103 = vmatpush1.bf16.msra.mxu0 %v7008_v46  ;;  %v7089_v46 = vld [vmem:[%s7933_s27 + $0x9e8] ss:$16 sps:$4 sm:$0xff]  }
 0x294   : > { %5447 = vmatpush1.bf16.msra.mxu1 %v7011_v56  ;;  %5104 = vmatprep.subr.bf16.mxu0 %v7016_v40  ;;  %v7094_v56 = vld [vmem:[%s7933_s27 + $0xa04] ss:$16 sps:$4 sm:$0xff]   ;;  %v7097_v40 = vld [vmem:[%s7933_s27 + $0xa0c] ss:$16 sps:$4 sm:$0xff]  }
 0x295   : > { %5448 = vmatprep.subr.bf16.mxu1 %v7019_v11  ;;  %v7092_v11 = vld [vmem:[%s7933_s27 + $0xa00] ss:$16 sps:$4 sm:$0xff]  }
 0x297   : > { %5105 = vmatpush1.bf16.msra.mxu0 %v7014_v21  ;;  %v7095_v21 = vld [vmem:[%s7933_s27 + $0xa08] ss:$16 sps:$4 sm:$0xff]  }
 0x298   : > { %5449 = vmatpush1.bf16.msra.mxu1 %v7017_v58  ;;  %5106 = vmatprep.subr.bf16.mxu0 %v7022_v12  ;;  %v7100_v58 = vld [vmem:[%s7933_s27 + $0xa24] ss:$16 sps:$4 sm:$0xff]   ;;  %v7103_v12 = vld [vmem:[%s7933_s27 + $0xa2c] ss:$16 sps:$4 sm:$0xff]  }
 0x299   : > { %5450 = vmatprep.subr.bf16.mxu1 %v7025_v41  ;;  %v7098_v41 = vld [vmem:[%s7933_s27 + $0xa20] ss:$16 sps:$4 sm:$0xff]  }
 0x29b   : > { %5107 = vmatpush1.bf16.msra.mxu0 %v7020_v22  ;;  %v7101_v22 = vld [vmem:[%s7933_s27 + $0xa28] ss:$16 sps:$4 sm:$0xff]  }
 0x29c   : > { %5451 = vmatpush1.bf16.msra.mxu1 %v7023_v25  ;;  %5108 = vmatprep.subr.bf16.mxu0 %v7028_v45  ;;  %v7106_v25 = vld [vmem:[%s7933_s27 + $0xa44] ss:$16 sps:$4 sm:$0xff]   ;;  %v7109_v45 = vld [vmem:[%s7933_s27 + $0xa4c] ss:$16 sps:$4 sm:$0xff]  }
 0x29d   : > { %5452 = vmatprep.subr.bf16.mxu1 %v7031_v0  ;;  %v7107_v0 = vld [vmem:[%s7933_s27 + $0xa48] ss:$16 sps:$4 sm:$0xff]  }
 0x29f   : > { %5109 = vmatpush1.bf16.msra.mxu0 %v7026_v48  ;;  %v7112_v48 = vld [vmem:[%s7933_s27 + $0xa64] ss:$16 sps:$4 sm:$0xff]  }
 0x2a0   : > { %5453 = vmatpush1.bf16.msra.mxu1 %v7029_v49  ;;  %5110 = vmatprep.subr.bf16.mxu0 %v7034_v52  ;;  %v7115_v49 = vld [vmem:[%s7933_s27 + $0xa6c] ss:$16 sps:$4 sm:$0xff]   ;;  %v7113_v52 = vld [vmem:[%s7933_s27 + $0xa68] ss:$16 sps:$4 sm:$0xff]  }
 0x2a1   : > { %5454 = vmatprep.subr.bf16.mxu1 %v7037_v53  ;;  %v7118_v53 = vld [vmem:[%s7933_s27 + $0xa84] ss:$16 sps:$4 sm:$0xff]  }
 0x2a3   : > { %5111 = vmatpush1.bf16.msra.mxu0 %v7032_v55  ;;  %v7121_v55 = vld [vmem:[%s7933_s27 + $0xa8c] ss:$16 sps:$4 sm:$0xff]  }
 0x2a4   : > { %5455 = vmatpush1.bf16.msra.mxu1 %v7035_v57  ;;  %5112 = vmatprep.subr.bf16.mxu0 %v7040_v1  ;;  %v7116_v57 = vld [vmem:[%s7933_s27 + $0xa80] ss:$16 sps:$4 sm:$0xff]   ;;  %v7119_v1 = vld [vmem:[%s7933_s27 + $0xa88] ss:$16 sps:$4 sm:$0xff]  }
 0x2a5   : > { %5456 = vmatprep.subr.bf16.mxu1 %v7043_v61  ;;  %v7124_v61 = vld [vmem:[%s7933_s27 + $0xaa4] ss:$16 sps:$4 sm:$0xff]  }
 0x2a7   : > { %5113 = vmatpush1.bf16.msra.mxu0 %v7038_v42  ;;  %v7127_v42 = vld [vmem:[%s7933_s27 + $0xaac] ss:$16 sps:$4 sm:$0xff]  }
 0x2a8   : > { %5457 = vmatpush1.bf16.msra.mxu1 %v7041_v43  ;;  %5114 = vmatprep.subr.bf16.mxu0 %v7046_v18  ;;  %v7122_v43 = vld [vmem:[%s7933_s27 + $0xaa0] ss:$16 sps:$4 sm:$0xff]   ;;  %v7125_v18 = vld [vmem:[%s7933_s27 + $0xaa8] ss:$16 sps:$4 sm:$0xff]  }
 0x2a9   : > { %5458 = vmatprep.subr.bf16.mxu1 %v7049_v8  ;;  %v7130_v8 = vld [vmem:[%s7933_s27 + $0xac4] ss:$16 sps:$4 sm:$0xff]  }
 0x2ab   : > { %5115 = vmatpush1.bf16.msra.mxu0 %v7044_v30  ;;  %v7133_v30 = vld [vmem:[%s7933_s27 + $0xacc] ss:$16 sps:$4 sm:$0xff]  }
 0x2ac   : > { %5459 = vmatpush1.bf16.msra.mxu1 %v7047_v62  ;;  %5116 = vmatprep.subr.bf16.mxu0 %v7052_v6  ;;  %v7128_v62 = vld [vmem:[%s7933_s27 + $0xac0] ss:$16 sps:$4 sm:$0xff]   ;;  %v7131_v6 = vld [vmem:[%s7933_s27 + $0xac8] ss:$16 sps:$4 sm:$0xff]  }
 0x2ad   : > { %5460 = vmatprep.subr.bf16.mxu1 %v7055_v16  ;;  %v7136_v16 = vld [vmem:[%s7933_s27 + $0xae4] ss:$16 sps:$4 sm:$0xff]  }
 0x2af   : > { %5117 = vmatpush1.bf16.msra.mxu0 %v7050_v29  ;;  %v7139_v29 = vld [vmem:[%s7933_s27 + $0xaec] ss:$16 sps:$4 sm:$0xff]  }
 0x2b0   : > { %5461 = vmatpush1.bf16.msra.mxu1 %v7053_v63  ;;  %5118 = vmatprep.subr.bf16.mxu0 %v7058_v4  ;;  %v7134_v63 = vld [vmem:[%s7933_s27 + $0xae0] ss:$16 sps:$4 sm:$0xff]   ;;  %v7137_v4 = vld [vmem:[%s7933_s27 + $0xae8] ss:$16 sps:$4 sm:$0xff]  }
 0x2b1   : > { %5462 = vmatprep.subr.bf16.mxu1 %v7061_v2  ;;  %v7142_v2 = vld [vmem:[%s7933_s27 + $0xb04] ss:$16 sps:$4 sm:$0xff]  }
 0x2b3   : > { %5119 = vmatpush1.bf16.msra.mxu0 %v7056_v3  ;;  %v7145_v3 = vld [vmem:[%s7933_s27 + $0xb0c] ss:$16 sps:$4 sm:$0xff]  }
 0x2b4   : > { %5463 = vmatpush1.bf16.msra.mxu1 %v7059_v31  ;;  %5120 = vmatprep.subr.bf16.mxu0 %v7064_v32  ;;  %v7140_v31 = vld [vmem:[%s7933_s27 + $0xb00] ss:$16 sps:$4 sm:$0xff]   ;;  %v7143_v32 = vld [vmem:[%s7933_s27 + $0xb08] ss:$16 sps:$4 sm:$0xff]  }
 0x2b5   : > { %5464 = vmatprep.subr.bf16.mxu1 %v7067_v38  ;;  %v7148_v38 = vld [vmem:[%s7933_s27 + $0xb24] ss:$16 sps:$4 sm:$0xff]  }
 0x2b7   : > { %5121 = vmatpush1.bf16.msra.mxu0 %v7062_v50  ;;  %v7151_v50 = vld [vmem:[%s7933_s27 + $0xb2c] ss:$16 sps:$4 sm:$0xff]  }
 0x2b8   : > { %5465 = vmatpush1.bf16.msra.mxu1 %v7065_v9  ;;  %5122 = vmatprep.subr.bf16.mxu0 %v7070_v10  ;;  %v7146_v9 = vld [vmem:[%s7933_s27 + $0xb20] ss:$16 sps:$4 sm:$0xff]   ;;  %v7149_v10 = vld [vmem:[%s7933_s27 + $0xb28] ss:$16 sps:$4 sm:$0xff]  }
 0x2b9   : > { %5466 = vmatprep.subr.bf16.mxu1 %v7073_v23  ;;  %v7154_v23 = vld [vmem:[%s7933_s27 + $0xb44] ss:$16 sps:$4 sm:$0xff]  }
 0x2bb   : > { %5123 = vmatpush1.bf16.msra.mxu0 %v7068_v15  ;;  %v7157_v15 = vld [vmem:[%s7933_s27 + $0xb4c] ss:$16 sps:$4 sm:$0xff]  }
 0x2bc   : > { %5467 = vmatpush1.bf16.msra.mxu1 %v7071_v33  ;;  %5124 = vmatprep.subr.bf16.mxu0 %v7076_v28  ;;  %v7152_v33 = vld [vmem:[%s7933_s27 + $0xb40] ss:$16 sps:$4 sm:$0xff]   ;;  %v7155_v28 = vld [vmem:[%s7933_s27 + $0xb48] ss:$16 sps:$4 sm:$0xff]  }
 0x2bd   : > { %5468 = vmatprep.subr.bf16.mxu1 %v7079_v24  ;;  %v7160_v24 = vld [vmem:[%s7933_s27 + $0xb64] ss:$16 sps:$4 sm:$0xff]  }
 0x2bf   : > { %5125 = vmatpush1.bf16.msra.mxu0 %v7074_v60  ;;  %v7163_v60 = vld [vmem:[%s7933_s27 + $0xb6c] ss:$16 sps:$4 sm:$0xff]  }
 0x2c0   : > { %5469 = vmatpush1.bf16.msra.mxu1 %v7077_v27  ;;  %5126 = vmatprep.subr.bf16.mxu0 %v7082_v34  ;;  %v7158_v27 = vld [vmem:[%s7933_s27 + $0xb60] ss:$16 sps:$4 sm:$0xff]   ;;  %v7161_v34 = vld [vmem:[%s7933_s27 + $0xb68] ss:$16 sps:$4 sm:$0xff]  }
 0x2c1   : > { %5470 = vmatprep.subr.bf16.mxu1 %v7085_v44  ;;  %v7166_v44 = vld [vmem:[%s7933_s27 + $0xb84] ss:$16 sps:$4 sm:$0xff]  }
 0x2c3   : > { %5127 = vmatpush1.bf16.msra.mxu0 %v7080_v5  ;;  %v7169_v5 = vld [vmem:[%s7933_s27 + $0xb8c] ss:$16 sps:$4 sm:$0xff]  }
 0x2c4   : > { %5471 = vmatpush1.bf16.msra.mxu1 %v7083_v36  ;;  %5128 = vmatprep.subr.bf16.mxu0 %v7088_v54  ;;  %v7164_v36 = vld [vmem:[%s7933_s27 + $0xb80] ss:$16 sps:$4 sm:$0xff]   ;;  %v7167_v54 = vld [vmem:[%s7933_s27 + $0xb88] ss:$16 sps:$4 sm:$0xff]  }
 0x2c5   : > { %5472 = vmatprep.subr.bf16.mxu1 %v7091_v37  ;;  %v7172_v37 = vld [vmem:[%s7933_s27 + $0xba4] ss:$16 sps:$4 sm:$0xff]  }
 0x2c7   : > { %5129 = vmatpush1.bf16.msra.mxu0 %v7086_v39  ;;  %v7175_v39 = vld [vmem:[%s7933_s27 + $0xbac] ss:$16 sps:$4 sm:$0xff]  }
 0x2c8   : > { %5473 = vmatpush1.bf16.msra.mxu1 %v7089_v46  ;;  %5141 = vmatprep.subr.bf16.mxu0 %v7094_v56  ;;  %v7170_v46 = vld [vmem:[%s7933_s27 + $0xba0] ss:$16 sps:$4 sm:$0xff]   ;;  %v7173_v56 = vld [vmem:[%s7933_s27 + $0xba8] ss:$16 sps:$4 sm:$0xff]  }
 0x2c9   : > { %5485 = vmatprep.subr.bf16.mxu1 %v7097_v40  ;;  %v7178_v40 = vld [vmem:[%s7933_s27 + $0xbc4] ss:$16 sps:$4 sm:$0xff]  }
 0x2ca   : > { %5131 = vmatmul.mubr.bf16.vlgmr.msra.gmra.mrb[16].mxu0 %v8319_v51 }
 0x2cb   : > { %5475 = vmatmul.mubr.bf16.vlgmr.msra.gmra.mrb[16].mxu1 %v8319_v51  ;;  %5142 = vmatpush1.bf16.msra.mxu0 %v7092_v11  ;;  %v7104_v51 = vld [vmem:[%s7933_s27 + $0xa40] ss:$16 sps:$4 sm:$0xff]   ;;  %v7181_v11 = vld [vmem:[%s7933_s27 + $0xbcc] ss:$16 sps:$4 sm:$0xff]  }
 0x2cc   : > { %5173 = vmatprep.mubr.bf16.mxu0 %v8357_v20  ;;  %5486 = vmatpush1.bf16.msra.mxu1 %v7095_v21  ;;  %v7176_v21 = vld [vmem:[%s7933_s27 + $0xbc0] ss:$16 sps:$4 sm:$0xff]  }
 0x2cd   : > { %5517 = vmatprep.mubr.bf16.mxu1 %v8357_v20  ;;  %5143 = vmatprep.subr.bf16.mxu0 %v7100_v58  ;;  %v7110_v20 = vld [vmem:[%s7933_s27 + $0xa60] ss:$16 sps:$4 sm:$0xff]   ;;  %v7179_v58 = vld [vmem:[%s7933_s27 + $0xbc8] ss:$16 sps:$4 sm:$0xff]  }
 0x2ce   : > { %5487 = vmatprep.subr.bf16.mxu1 %v7103_v12  ;;  %v7184_v12 = vld [vmem:[%s7933_s27 + $0xbe4] ss:$16 sps:$4 sm:$0xff]  }
 0x2cf   : > { %5144 = vmatpush1.bf16.msra.mxu0 %v7098_v41  ;;  %v7187_v41 = vld [vmem:[%s7933_s27 + $0xbec] ss:$16 sps:$4 sm:$0xff]  }
 0x2d0   : > { %5488 = vmatpush1.bf16.msra.mxu1 %v7101_v22  ;;  %5145 = vmatprep.subr.bf16.mxu0 %v7106_v25  ;;  %v7182_v22 = vld [vmem:[%s7933_s27 + $0xbe0] ss:$16 sps:$4 sm:$0xff]   ;;  %v7185_v25 = vld [vmem:[%s7933_s27 + $0xbe8] ss:$16 sps:$4 sm:$0xff]  }
 0x2d1   : > { %5489 = vmatprep.subr.bf16.mxu1 %v7109_v45  ;;  %v7190_v45 = vld [vmem:[%s7933_s27 + $0xc04] ss:$16 sps:$4 sm:$0xff]  }
 0x2d3   : > { %5146 = vmatpush1.bf16.msra.mxu0 %v7104_v51  ;;  %v7193_v51 = vld [vmem:[%s7933_s27 + $0xc0c] ss:$16 sps:$4 sm:$0xff]  }
 0x2d4   : > { %5490 = vmatpush1.bf16.msra.mxu1 %v7107_v0  ;;  %5147 = vmatprep.subr.bf16.mxu0 %v7112_v48  ;;  %v7188_v0 = vld [vmem:[%s7933_s27 + $0xc00] ss:$16 sps:$4 sm:$0xff]   ;;  %v7191_v48 = vld [vmem:[%s7933_s27 + $0xc08] ss:$16 sps:$4 sm:$0xff]  }
 0x2d5   : > { %5491 = vmatprep.subr.bf16.mxu1 %v7115_v49  ;;  %v7196_v49 = vld [vmem:[%s7933_s27 + $0xc24] ss:$16 sps:$4 sm:$0xff]  }
 0x2d7   : > { %5148 = vmatpush1.bf16.msra.mxu0 %v7110_v20  ;;  %v7199_v20 = vld [vmem:[%s7933_s27 + $0xc2c] ss:$16 sps:$4 sm:$0xff]  }
 0x2d8   : > { %5492 = vmatpush1.bf16.msra.mxu1 %v7113_v52  ;;  %5149 = vmatprep.subr.bf16.mxu0 %v7118_v53  ;;  %v7194_v52 = vld [vmem:[%s7933_s27 + $0xc20] ss:$16 sps:$4 sm:$0xff]   ;;  %v7197_v53 = vld [vmem:[%s7933_s27 + $0xc28] ss:$16 sps:$4 sm:$0xff]  }
 0x2d9   : > { %5493 = vmatprep.subr.bf16.mxu1 %v7121_v55  ;;  %v7202_v55 = vld [vmem:[%s7933_s27 + $0xc44] ss:$16 sps:$4 sm:$0xff]  }
 0x2db   : > { %5150 = vmatpush1.bf16.msra.mxu0 %v7116_v57  ;;  %v7205_v57 = vld [vmem:[%s7933_s27 + $0xc4c] ss:$16 sps:$4 sm:$0xff]  }
 0x2dc   : > { %5494 = vmatpush1.bf16.msra.mxu1 %v7119_v1  ;;  %5151 = vmatprep.subr.bf16.mxu0 %v7124_v61  ;;  %v7203_v1 = vld [vmem:[%s7933_s27 + $0xc48] ss:$16 sps:$4 sm:$0xff]   ;;  %v7208_v61 = vld [vmem:[%s7933_s27 + $0xc64] ss:$16 sps:$4 sm:$0xff]  }
 0x2dd   : > { %5495 = vmatprep.subr.bf16.mxu1 %v7127_v42  ;;  %v7211_v42 = vld [vmem:[%s7933_s27 + $0xc6c] ss:$16 sps:$4 sm:$0xff]  }
 0x2df   : > { %5152 = vmatpush1.bf16.msra.mxu0 %v7122_v43  ;;  %v7209_v43 = vld [vmem:[%s7933_s27 + $0xc68] ss:$16 sps:$4 sm:$0xff]  }
 0x2e0   : > { %5496 = vmatpush1.bf16.msra.mxu1 %v7125_v18  ;;  %5153 = vmatprep.subr.bf16.mxu0 %v7130_v8  ;;  %v7214_v18 = vld [vmem:[%s7933_s27 + $0xc84] ss:$16 sps:$4 sm:$0xff]   ;;  %v7217_v8 = vld [vmem:[%s7933_s27 + $0xc8c] ss:$16 sps:$4 sm:$0xff]  }
 0x2e1   : > { %5497 = vmatprep.subr.bf16.mxu1 %v7133_v30  ;;  %v7212_v30 = vld [vmem:[%s7933_s27 + $0xc80] ss:$16 sps:$4 sm:$0xff]  }
 0x2e3   : > { %5154 = vmatpush1.bf16.msra.mxu0 %v7128_v62  ;;  %v7215_v62 = vld [vmem:[%s7933_s27 + $0xc88] ss:$16 sps:$4 sm:$0xff]  }
 0x2e4   : > { %5498 = vmatpush1.bf16.msra.mxu1 %v7131_v6  ;;  %5155 = vmatprep.subr.bf16.mxu0 %v7136_v16  ;;  %v7220_v6 = vld [vmem:[%s7933_s27 + $0xca4] ss:$16 sps:$4 sm:$0xff]   ;;  %v7223_v16 = vld [vmem:[%s7933_s27 + $0xcac] ss:$16 sps:$4 sm:$0xff]  }
 0x2e5   : > { %5499 = vmatprep.subr.bf16.mxu1 %v7139_v29  ;;  %v7218_v29 = vld [vmem:[%s7933_s27 + $0xca0] ss:$16 sps:$4 sm:$0xff]  }
 0x2e7   : > { %5156 = vmatpush1.bf16.msra.mxu0 %v7134_v63  ;;  %v7221_v63 = vld [vmem:[%s7933_s27 + $0xca8] ss:$16 sps:$4 sm:$0xff]  }
 0x2e8   : > { %5500 = vmatpush1.bf16.msra.mxu1 %v7137_v4  ;;  %5157 = vmatprep.subr.bf16.mxu0 %v7142_v2  ;;  %v7226_v4 = vld [vmem:[%s7933_s27 + $0xcc4] ss:$16 sps:$4 sm:$0xff]   ;;  %v7229_v2 = vld [vmem:[%s7933_s27 + $0xccc] ss:$16 sps:$4 sm:$0xff]  }
 0x2e9   : > { %5501 = vmatprep.subr.bf16.mxu1 %v7145_v3  ;;  %v7224_v3 = vld [vmem:[%s7933_s27 + $0xcc0] ss:$16 sps:$4 sm:$0xff]  }
 0x2eb   : > { %5158 = vmatpush1.bf16.msra.mxu0 %v7140_v31  ;;  %v7227_v31 = vld [vmem:[%s7933_s27 + $0xcc8] ss:$16 sps:$4 sm:$0xff]  }
 0x2ec   : > { %5502 = vmatpush1.bf16.msra.mxu1 %v7143_v32  ;;  %5159 = vmatprep.subr.bf16.mxu0 %v7148_v38  ;;  %v7232_v32 = vld [vmem:[%s7933_s27 + $0xce4] ss:$16 sps:$4 sm:$0xff]   ;;  %v7235_v38 = vld [vmem:[%s7933_s27 + $0xcec] ss:$16 sps:$4 sm:$0xff]  }
 0x2ed   : > { %5503 = vmatprep.subr.bf16.mxu1 %v7151_v50  ;;  %v7230_v50 = vld [vmem:[%s7933_s27 + $0xce0] ss:$16 sps:$4 sm:$0xff]  }
 0x2ef   : > { %5160 = vmatpush1.bf16.msra.mxu0 %v7146_v9  ;;  %v7233_v9 = vld [vmem:[%s7933_s27 + $0xce8] ss:$16 sps:$4 sm:$0xff]  }
 0x2f0   : > { %5504 = vmatpush1.bf16.msra.mxu1 %v7149_v10  ;;  %5161 = vmatprep.subr.bf16.mxu0 %v7154_v23  ;;  %v7238_v10 = vld [vmem:[%s7933_s27 + $0xd04] ss:$16 sps:$4 sm:$0xff]   ;;  %v7241_v23 = vld [vmem:[%s7933_s27 + $0xd0c] ss:$16 sps:$4 sm:$0xff]  }
 0x2f1   : > { %5505 = vmatprep.subr.bf16.mxu1 %v7157_v15  ;;  %v7236_v15 = vld [vmem:[%s7933_s27 + $0xd00] ss:$16 sps:$4 sm:$0xff]  }
 0x2f3   : > { %5162 = vmatpush1.bf16.msra.mxu0 %v7152_v33  ;;  %v7239_v33 = vld [vmem:[%s7933_s27 + $0xd08] ss:$16 sps:$4 sm:$0xff]  }
 0x2f4   : > { %5506 = vmatpush1.bf16.msra.mxu1 %v7155_v28  ;;  %5163 = vmatprep.subr.bf16.mxu0 %v7160_v24  ;;  %v7244_v28 = vld [vmem:[%s7933_s27 + $0xd24] ss:$16 sps:$4 sm:$0xff]   ;;  %v7247_v24 = vld [vmem:[%s7933_s27 + $0xd2c] ss:$16 sps:$4 sm:$0xff]  }
 0x2f5   : > { %5507 = vmatprep.subr.bf16.mxu1 %v7163_v60  ;;  %v7242_v60 = vld [vmem:[%s7933_s27 + $0xd20] ss:$16 sps:$4 sm:$0xff]  }
 0x2f7   : > { %5164 = vmatpush1.bf16.msra.mxu0 %v7158_v27  ;;  %v7245_v27 = vld [vmem:[%s7933_s27 + $0xd28] ss:$16 sps:$4 sm:$0xff]  }
 0x2f8   : > { %5508 = vmatpush1.bf16.msra.mxu1 %v7161_v34  ;;  %5165 = vmatprep.subr.bf16.mxu0 %v7166_v44  ;;  %v7250_v34 = vld [vmem:[%s7933_s27 + $0xd44] ss:$16 sps:$4 sm:$0xff]   ;;  %v7253_v44 = vld [vmem:[%s7933_s27 + $0xd4c] ss:$16 sps:$4 sm:$0xff]  }
 0x2f9   : > { %5509 = vmatprep.subr.bf16.mxu1 %v7169_v5  ;;  %v7248_v5 = vld [vmem:[%s7933_s27 + $0xd40] ss:$16 sps:$4 sm:$0xff]  }
 0x2fb   : > { %5166 = vmatpush1.bf16.msra.mxu0 %v7164_v36  ;;  %v7251_v36 = vld [vmem:[%s7933_s27 + $0xd48] ss:$16 sps:$4 sm:$0xff]  }
 0x2fc   : > { %5510 = vmatpush1.bf16.msra.mxu1 %v7167_v54  ;;  %5167 = vmatprep.subr.bf16.mxu0 %v7172_v37  ;;  %v7256_v54 = vld [vmem:[%s7933_s27 + $0xd64] ss:$16 sps:$4 sm:$0xff]   ;;  %v7259_v37 = vld [vmem:[%s7933_s27 + $0xd6c] ss:$16 sps:$4 sm:$0xff]  }
 0x2fd   : > { %5511 = vmatprep.subr.bf16.mxu1 %v7175_v39  ;;  %v7254_v39 = vld [vmem:[%s7933_s27 + $0xd60] ss:$16 sps:$4 sm:$0xff]  }
 0x2ff   : > { %5168 = vmatpush1.bf16.msra.mxu0 %v7170_v46  ;;  %v7257_v46 = vld [vmem:[%s7933_s27 + $0xd68] ss:$16 sps:$4 sm:$0xff]  }
 0x300   : > { %5512 = vmatpush1.bf16.msra.mxu1 %v7173_v56  ;;  %5169 = vmatprep.subr.bf16.mxu0 %v7178_v40  ;;  %v7262_v56 = vld [vmem:[%s7933_s27 + $0xd84] ss:$16 sps:$4 sm:$0xff]   ;;  %v7265_v40 = vld [vmem:[%s7933_s27 + $0xd8c] ss:$16 sps:$4 sm:$0xff]  }
 0x301   : > { %5513 = vmatprep.subr.bf16.mxu1 %v7181_v11  ;;  %v7260_v11 = vld [vmem:[%s7933_s27 + $0xd80] ss:$16 sps:$4 sm:$0xff]  }
 0x303   : > { %5170 = vmatpush1.bf16.msra.mxu0 %v7176_v21  ;;  %v7263_v21 = vld [vmem:[%s7933_s27 + $0xd88] ss:$16 sps:$4 sm:$0xff]  }
 0x304   : > { %5514 = vmatpush1.bf16.msra.mxu1 %v7179_v58  ;;  %5171 = vmatprep.subr.bf16.mxu0 %v7184_v12  ;;  %v7268_v58 = vld [vmem:[%s7933_s27 + $0xda4] ss:$16 sps:$4 sm:$0xff]   ;;  %v7271_v12 = vld [vmem:[%s7933_s27 + $0xdac] ss:$16 sps:$4 sm:$0xff]  }
 0x305   : > { %5515 = vmatprep.subr.bf16.mxu1 %v7187_v41  ;;  %v7266_v41 = vld [vmem:[%s7933_s27 + $0xda0] ss:$16 sps:$4 sm:$0xff]  }
 0x307   : > { %5172 = vmatpush1.bf16.msra.mxu0 %v7182_v22  ;;  %v7269_v22 = vld [vmem:[%s7933_s27 + $0xda8] ss:$16 sps:$4 sm:$0xff]  }
 0x308   : > { %5516 = vmatpush1.bf16.msra.mxu1 %v7185_v25  ;;  %5184 = vmatprep.subr.bf16.mxu0 %v7190_v45  ;;  %v7274_v25 = vld [vmem:[%s7933_s27 + $0xdc4] ss:$16 sps:$4 sm:$0xff]   ;;  %v7277_v45 = vld [vmem:[%s7933_s27 + $0xdcc] ss:$16 sps:$4 sm:$0xff]  }
 0x309   : > { %5528 = vmatprep.subr.bf16.mxu1 %v7193_v51  ;;  %v7272_v51 = vld [vmem:[%s7933_s27 + $0xdc0] ss:$16 sps:$4 sm:$0xff]  }
 0x30a   : > { %5174 = vmatmul.mubr.bf16.vlgmr.msra.gmra.mrb[16].mxu0 %v8349_v26 }
 0x30b   : > { %5518 = vmatmul.mubr.bf16.vlgmr.msra.gmra.mrb[16].mxu1 %v8349_v26  ;;  %5185 = vmatpush1.bf16.msra.mxu0 %v7188_v0  ;;  %v7200_v26 = vld [vmem:[%s7933_s27 + $0xc40] ss:$16 sps:$4 sm:$0xff]   ;;  %v7275_v0 = vld [vmem:[%s7933_s27 + $0xdc8] ss:$16 sps:$4 sm:$0xff]  }
 0x30c   : > { %5216 = vmatprep.mubr.bf16.mxu0 %v8435_v35  ;;  %5529 = vmatpush1.bf16.msra.mxu1 %v7191_v48  ;;  %v7280_v48 = vld [vmem:[%s7933_s27 + $0xde4] ss:$16 sps:$4 sm:$0xff]  }
 0x30d   : > { %5560 = vmatprep.mubr.bf16.mxu1 %v8435_v35  ;;  %5186 = vmatprep.subr.bf16.mxu0 %v7196_v49  ;;  %v7206_v35 = vld [vmem:[%s7933_s27 + $0xc60] ss:$16 sps:$4 sm:$0xff]   ;;  %v7283_v49 = vld [vmem:[%s7933_s27 + $0xdec] ss:$16 sps:$4 sm:$0xff]  }
 0x30e   : > { %5530 = vmatprep.subr.bf16.mxu1 %v7199_v20  ;;  %v7278_v20 = vld [vmem:[%s7933_s27 + $0xde0] ss:$16 sps:$4 sm:$0xff]  }
 0x30f   : > { %5187 = vmatpush1.bf16.msra.mxu0 %v7194_v52  ;;  %v7281_v52 = vld [vmem:[%s7933_s27 + $0xde8] ss:$16 sps:$4 sm:$0xff]  }
 0x310   : > { %5531 = vmatpush1.bf16.msra.mxu1 %v7197_v53  ;;  %5188 = vmatprep.subr.bf16.mxu0 %v7202_v55  ;;  %v7286_v53 = vld [vmem:[%s7933_s27 + $0xe04] ss:$16 sps:$4 sm:$0xff]   ;;  %v7289_v55 = vld [vmem:[%s7933_s27 + $0xe0c] ss:$16 sps:$4 sm:$0xff]  }
 0x311   : > { %5532 = vmatprep.subr.bf16.mxu1 %v7205_v57  ;;  %v7284_v57 = vld [vmem:[%s7933_s27 + $0xe00] ss:$16 sps:$4 sm:$0xff]  }
 0x313   : > { %5189 = vmatpush1.bf16.msra.mxu0 %v7200_v26  ;;  %v7287_v26 = vld [vmem:[%s7933_s27 + $0xe08] ss:$16 sps:$4 sm:$0xff]  }
 0x314   : > { %5533 = vmatpush1.bf16.msra.mxu1 %v7203_v1  ;;  %5190 = vmatprep.subr.bf16.mxu0 %v7208_v61  ;;  %v7292_v1 = vld [vmem:[%s7933_s27 + $0xe24] ss:$16 sps:$4 sm:$0xff]   ;;  %v7295_v61 = vld [vmem:[%s7933_s27 + $0xe2c] ss:$16 sps:$4 sm:$0xff]  }
 0x315   : > { %5534 = vmatprep.subr.bf16.mxu1 %v7211_v42  ;;  %v7290_v42 = vld [vmem:[%s7933_s27 + $0xe20] ss:$16 sps:$4 sm:$0xff]  }
 0x317   : > { %5191 = vmatpush1.bf16.msra.mxu0 %v7206_v35  ;;  %v7293_v35 = vld [vmem:[%s7933_s27 + $0xe28] ss:$16 sps:$4 sm:$0xff]  }
 0x318   : > { %5535 = vmatpush1.bf16.msra.mxu1 %v7209_v43  ;;  %5192 = vmatprep.subr.bf16.mxu0 %v7214_v18  ;;  %v7298_v43 = vld [vmem:[%s7933_s27 + $0xe44] ss:$16 sps:$4 sm:$0xff]   ;;  %v7301_v18 = vld [vmem:[%s7933_s27 + $0xe4c] ss:$16 sps:$4 sm:$0xff]  }
 0x319   : > { %5536 = vmatprep.subr.bf16.mxu1 %v7217_v8  ;;  %v7299_v8 = vld [vmem:[%s7933_s27 + $0xe48] ss:$16 sps:$4 sm:$0xff]  }
 0x31b   : > { %5193 = vmatpush1.bf16.msra.mxu0 %v7212_v30  ;;  %v7304_v30 = vld [vmem:[%s7933_s27 + $0xe64] ss:$16 sps:$4 sm:$0xff]  }
 0x31c   : > { %5537 = vmatpush1.bf16.msra.mxu1 %v7215_v62  ;;  %5194 = vmatprep.subr.bf16.mxu0 %v7220_v6  ;;  %v7307_v62 = vld [vmem:[%s7933_s27 + $0xe6c] ss:$16 sps:$4 sm:$0xff]   ;;  %v7305_v6 = vld [vmem:[%s7933_s27 + $0xe68] ss:$16 sps:$4 sm:$0xff]  }
 0x31d   : > { %5538 = vmatprep.subr.bf16.mxu1 %v7223_v16  ;;  %v7310_v16 = vld [vmem:[%s7933_s27 + $0xe84] ss:$16 sps:$4 sm:$0xff]  }
 0x31f   : > { %5195 = vmatpush1.bf16.msra.mxu0 %v7218_v29  ;;  %v7313_v29 = vld [vmem:[%s7933_s27 + $0xe8c] ss:$16 sps:$4 sm:$0xff]  }
 0x320   : > { %5539 = vmatpush1.bf16.msra.mxu1 %v7221_v63  ;;  %5196 = vmatprep.subr.bf16.mxu0 %v7226_v4  ;;  %v7308_v63 = vld [vmem:[%s7933_s27 + $0xe80] ss:$16 sps:$4 sm:$0xff]   ;;  %v7311_v4 = vld [vmem:[%s7933_s27 + $0xe88] ss:$16 sps:$4 sm:$0xff]  }
 0x321   : > { %5540 = vmatprep.subr.bf16.mxu1 %v7229_v2  ;;  %v7316_v2 = vld [vmem:[%s7933_s27 + $0xea4] ss:$16 sps:$4 sm:$0xff]  }
 0x323   : > { %5197 = vmatpush1.bf16.msra.mxu0 %v7224_v3  ;;  %v7319_v3 = vld [vmem:[%s7933_s27 + $0xeac] ss:$16 sps:$4 sm:$0xff]  }
 0x324   : > { %5541 = vmatpush1.bf16.msra.mxu1 %v7227_v31  ;;  %5198 = vmatprep.subr.bf16.mxu0 %v7232_v32  ;;  %v7314_v31 = vld [vmem:[%s7933_s27 + $0xea0] ss:$16 sps:$4 sm:$0xff]   ;;  %v7317_v32 = vld [vmem:[%s7933_s27 + $0xea8] ss:$16 sps:$4 sm:$0xff]  }
 0x325   : > { %5542 = vmatprep.subr.bf16.mxu1 %v7235_v38  ;;  %v7322_v38 = vld [vmem:[%s7933_s27 + $0xec4] ss:$16 sps:$4 sm:$0xff]  }
 0x327   : > { %5199 = vmatpush1.bf16.msra.mxu0 %v7230_v50  ;;  %v7325_v50 = vld [vmem:[%s7933_s27 + $0xecc] ss:$16 sps:$4 sm:$0xff]  }
 0x328   : > { %5543 = vmatpush1.bf16.msra.mxu1 %v7233_v9  ;;  %5200 = vmatprep.subr.bf16.mxu0 %v7238_v10  ;;  %v7320_v9 = vld [vmem:[%s7933_s27 + $0xec0] ss:$16 sps:$4 sm:$0xff]   ;;  %v7323_v10 = vld [vmem:[%s7933_s27 + $0xec8] ss:$16 sps:$4 sm:$0xff]  }
 0x329   : > { %5544 = vmatprep.subr.bf16.mxu1 %v7241_v23  ;;  %v7328_v23 = vld [vmem:[%s7933_s27 + $0xee4] ss:$16 sps:$4 sm:$0xff]  }
 0x32b   : > { %5201 = vmatpush1.bf16.msra.mxu0 %v7236_v15  ;;  %v7331_v15 = vld [vmem:[%s7933_s27 + $0xeec] ss:$16 sps:$4 sm:$0xff]  }
 0x32c   : > { %5545 = vmatpush1.bf16.msra.mxu1 %v7239_v33  ;;  %5202 = vmatprep.subr.bf16.mxu0 %v7244_v28  ;;  %v7326_v33 = vld [vmem:[%s7933_s27 + $0xee0] ss:$16 sps:$4 sm:$0xff]   ;;  %v7329_v28 = vld [vmem:[%s7933_s27 + $0xee8] ss:$16 sps:$4 sm:$0xff]  }
 0x32d   : > { %5546 = vmatprep.subr.bf16.mxu1 %v7247_v24  ;;  %v7334_v24 = vld [vmem:[%s7933_s27 + $0xf04] ss:$16 sps:$4 sm:$0xff]  }
 0x32f   : > { %5203 = vmatpush1.bf16.msra.mxu0 %v7242_v60  ;;  %v7337_v60 = vld [vmem:[%s7933_s27 + $0xf0c] ss:$16 sps:$4 sm:$0xff]  }
 0x330   : > { %5547 = vmatpush1.bf16.msra.mxu1 %v7245_v27  ;;  %5204 = vmatprep.subr.bf16.mxu0 %v7250_v34  ;;  %v7332_v27 = vld [vmem:[%s7933_s27 + $0xf00] ss:$16 sps:$4 sm:$0xff]   ;;  %v7335_v34 = vld [vmem:[%s7933_s27 + $0xf08] ss:$16 sps:$4 sm:$0xff]  }
 0x331   : > { %5548 = vmatprep.subr.bf16.mxu1 %v7253_v44  ;;  %v7340_v44 = vld [vmem:[%s7933_s27 + $0xf24] ss:$16 sps:$4 sm:$0xff]  }
 0x333   : > { %5205 = vmatpush1.bf16.msra.mxu0 %v7248_v5  ;;  %v7343_v5 = vld [vmem:[%s7933_s27 + $0xf2c] ss:$16 sps:$4 sm:$0xff]  }
 0x334   : > { %5549 = vmatpush1.bf16.msra.mxu1 %v7251_v36  ;;  %5206 = vmatprep.subr.bf16.mxu0 %v7256_v54  ;;  %v7338_v36 = vld [vmem:[%s7933_s27 + $0xf20] ss:$16 sps:$4 sm:$0xff]   ;;  %v7341_v54 = vld [vmem:[%s7933_s27 + $0xf28] ss:$16 sps:$4 sm:$0xff]  }
 0x335   : > { %5550 = vmatprep.subr.bf16.mxu1 %v7259_v37  ;;  %v7346_v37 = vld [vmem:[%s7933_s27 + $0xf44] ss:$16 sps:$4 sm:$0xff]  }
 0x337   : > { %5207 = vmatpush1.bf16.msra.mxu0 %v7254_v39  ;;  %v7349_v39 = vld [vmem:[%s7933_s27 + $0xf4c] ss:$16 sps:$4 sm:$0xff]  }
 0x338   : > { %5551 = vmatpush1.bf16.msra.mxu1 %v7257_v46  ;;  %5208 = vmatprep.subr.bf16.mxu0 %v7262_v56  ;;  %v7344_v46 = vld [vmem:[%s7933_s27 + $0xf40] ss:$16 sps:$4 sm:$0xff]   ;;  %v7347_v56 = vld [vmem:[%s7933_s27 + $0xf48] ss:$16 sps:$4 sm:$0xff]  }
 0x339   : > { %5552 = vmatprep.subr.bf16.mxu1 %v7265_v40  ;;  %v7352_v40 = vld [vmem:[%s7933_s27 + $0xf64] ss:$16 sps:$4 sm:$0xff]  }
 0x33b   : > { %5209 = vmatpush1.bf16.msra.mxu0 %v7260_v11  ;;  %v7355_v11 = vld [vmem:[%s7933_s27 + $0xf6c] ss:$16 sps:$4 sm:$0xff]  }
 0x33c   : > { %5553 = vmatpush1.bf16.msra.mxu1 %v7263_v21  ;;  %5210 = vmatprep.subr.bf16.mxu0 %v7268_v58  ;;  %v7350_v21 = vld [vmem:[%s7933_s27 + $0xf60] ss:$16 sps:$4 sm:$0xff]   ;;  %v7353_v58 = vld [vmem:[%s7933_s27 + $0xf68] ss:$16 sps:$4 sm:$0xff]  }
 0x33d   : > { %5554 = vmatprep.subr.bf16.mxu1 %v7271_v12  ;;  %v7358_v12 = vld [vmem:[%s7933_s27 + $0xf84] ss:$16 sps:$4 sm:$0xff]  }
 0x33f   : > { %5211 = vmatpush1.bf16.msra.mxu0 %v7266_v41  ;;  %v7361_v41 = vld [vmem:[%s7933_s27 + $0xf8c] ss:$16 sps:$4 sm:$0xff]  }
 0x340   : > { %5555 = vmatpush1.bf16.msra.mxu1 %v7269_v22  ;;  %5212 = vmatprep.subr.bf16.mxu0 %v7274_v25  ;;  %v7356_v22 = vld [vmem:[%s7933_s27 + $0xf80] ss:$16 sps:$4 sm:$0xff]   ;;  %v7359_v25 = vld [vmem:[%s7933_s27 + $0xf88] ss:$16 sps:$4 sm:$0xff]  }
 0x341   : > { %5556 = vmatprep.subr.bf16.mxu1 %v7277_v45  ;;  %v7364_v45 = vld [vmem:[%s7933_s27 + $0xfa4] ss:$16 sps:$4 sm:$0xff]  }
 0x343   : > { %5213 = vmatpush1.bf16.msra.mxu0 %v7272_v51  ;;  %v7367_v51 = vld [vmem:[%s7933_s27 + $0xfac] ss:$16 sps:$4 sm:$0xff]  }
 0x344   : > { %5557 = vmatpush1.bf16.msra.mxu1 %v7275_v0  ;;  %5214 = vmatprep.subr.bf16.mxu0 %v7280_v48  ;;  %v7362_v0 = vld [vmem:[%s7933_s27 + $0xfa0] ss:$16 sps:$4 sm:$0xff]   ;;  %v7365_v48 = vld [vmem:[%s7933_s27 + $0xfa8] ss:$16 sps:$4 sm:$0xff]  }
 0x345   : > { %5558 = vmatprep.subr.bf16.mxu1 %v7283_v49  ;;  %v7370_v49 = vld [vmem:[%s7933_s27 + $0xfc4] ss:$16 sps:$4 sm:$0xff]  }
 0x347   : > { %5215 = vmatpush1.bf16.msra.mxu0 %v7278_v20  ;;  %v7373_v20 = vld [vmem:[%s7933_s27 + $0xfcc] ss:$16 sps:$4 sm:$0xff]  }
 0x348   : > { %5559 = vmatpush1.bf16.msra.mxu1 %v7281_v52  ;;  %5227 = vmatprep.subr.bf16.mxu0 %v7286_v53  ;;  %v7368_v52 = vld [vmem:[%s7933_s27 + $0xfc0] ss:$16 sps:$4 sm:$0xff]   ;;  %v7371_v53 = vld [vmem:[%s7933_s27 + $0xfc8] ss:$16 sps:$4 sm:$0xff]  }
 0x349   : > { %5571 = vmatprep.subr.bf16.mxu1 %v7289_v55  ;;  %v7376_v55 = vld [vmem:[%s7933_s27 + $0xfe4] ss:$16 sps:$4 sm:$0xff]  }
 0x34a   : > { %5217 = vmatmul.mubr.bf16.vlgmr.msra.gmra.mrb[16].mxu0 %v8426_v7 }
 0x34b   : > { %5561 = vmatmul.mubr.bf16.vlgmr.msra.gmra.mrb[16].mxu1 %v8426_v7  ;;  %5228 = vmatpush1.bf16.msra.mxu0 %v7284_v57  ;;  %v7296_v7 = vld [vmem:[%s7933_s27 + $0xe40] ss:$16 sps:$4 sm:$0xff]   ;;  %v7379_v57 = vld [vmem:[%s7933_s27 + $0xfec] ss:$16 sps:$4 sm:$0xff]  }
 0x34c   : > { %5259 = vmatprep.mubr.bf16.mxu0 %v8443_v59  ;;  %5572 = vmatpush1.bf16.msra.mxu1 %v7287_v26  ;;  %v7374_v26 = vld [vmem:[%s7933_s27 + $0xfe0] ss:$16 sps:$4 sm:$0xff]  }
 0x34d   : > { %5603 = vmatprep.mubr.bf16.mxu1 %v8443_v59  ;;  %5229 = vmatprep.subr.bf16.mxu0 %v7292_v1  ;;  %v7302_v59 = vld [vmem:[%s7933_s27 + $0xe60] ss:$16 sps:$4 sm:$0xff]   ;;  %v7377_v1 = vld [vmem:[%s7933_s27 + $0xfe8] ss:$16 sps:$4 sm:$0xff]  }
 0x34e   : > { %5573 = vmatprep.subr.bf16.mxu1 %v7295_v61  ;;  %v2344_v61 = vld [vmem:[%s288_s23] sm:$0xf] }
 0x34f   : > { %5230 = vmatpush1.bf16.msra.mxu0 %v7290_v42  ;;  %v2349_v42 = vrot.slane %v2344_v61, %v8026_v13 }
 0x350   : > { %5574 = vmatpush1.bf16.msra.mxu1 %v7293_v35  ;;  %5231 = vmatprep.subr.bf16.mxu0 %v7298_v43  ;;  %v2357_v35 = vrot.slane %v2344_v61, %v8036_v17  ;;  %v2353_v43 = vrot.slane %v2344_v61, %v8029_v14 }
 0x351   : > { %5575 = vmatprep.subr.bf16.mxu1 %v7301_v18  ;;  %v2361_v18 = vrot.slane %v2344_v61, %v8039_v19 }
 0x353   : > { %5232 = vmatpush1.bf16.msra.mxu0 %v7296_v7 }
 0x354   : > { %5576 = vmatpush1.bf16.msra.mxu1 %v7299_v8  ;;  %5233 = vmatprep.subr.bf16.mxu0 %v7304_v30 }
 0x355   : > { %5577 = vmatprep.subr.bf16.mxu1 %v7307_v62 }
 0x357   : > { %5234 = vmatpush1.bf16.msra.mxu0 %v7302_v59 }
 0x358   : > { %5578 = vmatpush1.bf16.msra.mxu1 %v7305_v6  ;;  %5235 = vmatprep.subr.bf16.mxu0 %v7310_v16 }
 0x359   : > { %5579 = vmatprep.subr.bf16.mxu1 %v7313_v29 }
 0x35b   : > { %5236 = vmatpush1.bf16.msra.mxu0 %v7308_v63 }
 0x35c   : > { %5580 = vmatpush1.bf16.msra.mxu1 %v7311_v4  ;;  %5237 = vmatprep.subr.bf16.mxu0 %v7316_v2 }
 0x35d   : > { %5581 = vmatprep.subr.bf16.mxu1 %v7319_v3 }
 0x35f   : > { %5238 = vmatpush1.bf16.msra.mxu0 %v7314_v31 }
 0x360   : > { %5582 = vmatpush1.bf16.msra.mxu1 %v7317_v32  ;;  %5239 = vmatprep.subr.bf16.mxu0 %v7322_v38 }
 0x361   : > { %5583 = vmatprep.subr.bf16.mxu1 %v7325_v50 }
 0x363   : > { %5240 = vmatpush1.bf16.msra.mxu0 %v7320_v9 }
 0x364   : > { %5584 = vmatpush1.bf16.msra.mxu1 %v7323_v10  ;;  %5241 = vmatprep.subr.bf16.mxu0 %v7328_v23 }
 0x365   : > { %5585 = vmatprep.subr.bf16.mxu1 %v7331_v15 }
 0x367   : > { %5242 = vmatpush1.bf16.msra.mxu0 %v7326_v33 }
 0x368   : > { %5586 = vmatpush1.bf16.msra.mxu1 %v7329_v28  ;;  %5243 = vmatprep.subr.bf16.mxu0 %v7334_v24 }
 0x369   : > { %5587 = vmatprep.subr.bf16.mxu1 %v7337_v60 }
 0x36b   : > { %5244 = vmatpush1.bf16.msra.mxu0 %v7332_v27 }
 0x36c   : > { %5588 = vmatpush1.bf16.msra.mxu1 %v7335_v34  ;;  %5245 = vmatprep.subr.bf16.mxu0 %v7340_v44 }
 0x36d   : > { %5589 = vmatprep.subr.bf16.mxu1 %v7343_v5 }
 0x36f   : > { %5246 = vmatpush1.bf16.msra.mxu0 %v7338_v36 }
 0x370   : > { %5590 = vmatpush1.bf16.msra.mxu1 %v7341_v54  ;;  %5247 = vmatprep.subr.bf16.mxu0 %v7346_v37 }
 0x371   : > { %5591 = vmatprep.subr.bf16.mxu1 %v7349_v39 }
 0x373   : > { %5248 = vmatpush1.bf16.msra.mxu0 %v7344_v46 }
 0x374   : > { %5592 = vmatpush1.bf16.msra.mxu1 %v7347_v56  ;;  %5249 = vmatprep.subr.bf16.mxu0 %v7352_v40 }
 0x375   : > { %5593 = vmatprep.subr.bf16.mxu1 %v7355_v11 }
 0x377   : > { %5250 = vmatpush1.bf16.msra.mxu0 %v7350_v21 }
 0x378   : > { %5594 = vmatpush1.bf16.msra.mxu1 %v7353_v58  ;;  %5251 = vmatprep.subr.bf16.mxu0 %v7358_v12 }
 0x379   : > { %5595 = vmatprep.subr.bf16.mxu1 %v7361_v41 }
 0x37b   : > { %5252 = vmatpush1.bf16.msra.mxu0 %v7356_v22 }
 0x37c   : > { %5596 = vmatpush1.bf16.msra.mxu1 %v7359_v25  ;;  %5253 = vmatprep.subr.bf16.mxu0 %v7364_v45 }
 0x37d   : > { %5597 = vmatprep.subr.bf16.mxu1 %v7367_v51 }
 0x37f   : > { %5254 = vmatpush1.bf16.msra.mxu0 %v7362_v0 }
 0x380   : > { %5598 = vmatpush1.bf16.msra.mxu1 %v7365_v48  ;;  %5255 = vmatprep.subr.bf16.mxu0 %v7370_v49 }
 0x381   : > { %5599 = vmatprep.subr.bf16.mxu1 %v7373_v20 }
 0x383   : > { %5256 = vmatpush1.bf16.msra.mxu0 %v7368_v52 }
 0x384   : > { %5600 = vmatpush1.bf16.msra.mxu1 %v7371_v53  ;;  %5257 = vmatprep.subr.bf16.mxu0 %v7376_v55 }
 0x385   : > { %5601 = vmatprep.subr.bf16.mxu1 %v7379_v57 }
 0x387   : > { %5258 = vmatpush1.bf16.msra.mxu0 %v7374_v26 }
 0x388   : > { %5602 = vmatpush1.bf16.msra.mxu1 %v7377_v1 }
 0x38a   : > { %5260 = vmatmul.mubr.bf16.vlgmr.msra.gmra.mrb[16].mxu0 %v8441_v47 }
 0x38b   : > { %5604 = vmatmul.mubr.bf16.vlgmr.msra.gmra.mrb[16].mxu1 %v8441_v47 }
 0x45d   : > { %v5261_v7 = vpop.f32.mrb[16].mxu0 }
 0x45e   : > { %v6456_v8 = vadd.f32 %v5261_v7, %v2349_v42  ;;  %v5605_v30 = vpop.f32.mrb[16].mxu1  ;;  %v5263_v62 = vpop.f32.mrb[17].mxu0 }
 0x45f   : > { %v6460_v59 = vadd.f32 %v5605_v30, %v2357_v35  ;;  %v6457_v6 = vadd.f32 %v5263_v62, %v2353_v43  ;;  %v5607_v47 = vpop.f32.mrb[17].mxu1  ;;  %v5265_v16 = vpop.f32.mrb[18].mxu0 }
 0x460   : > { %v6461_v29 = vadd.f32 %v5607_v47, %v2361_v18  ;;  %v6458_v63 = vadd.f32 %v5265_v16, %v2349_v42  ;;  %v5609_v13 = vpop.f32.mrb[18].mxu1  ;;  %v5267_v4 = vpop.f32.mrb[19].mxu0 }
 0x461   : > { %v6451_v14 = vpack.c.bf16 %v6457_v6, %v6456_v8  ;;  %v6462_v17 = vadd.f32 %v5609_v13, %v2357_v35  ;;  %v6459_v19 = vadd.f32 %v5267_v4, %v2353_v43  ;;  %v5611_v2 = vpop.f32.mrb[19].mxu1 }
 0x462   : > { %v6452_v3 = vpack.c.bf16 %v6461_v29, %v6460_v59  ;;  %v6463_v31 = vadd.f32 %v5611_v2, %v2361_v18 }
 0x463   : > { %5638 = vst [vmem:[%s319_s17] sm:$0xff] %v6451_v14  ;;  %v6453_v32 = vpack.c.bf16 %v6459_v19, %v6458_v63 }
 0x464   : > { %5639 = vst [vmem:[%s319_s17 + $0x8] sm:$0xff] %v6452_v3  ;;  %v6454_v38 = vpack.c.bf16 %v6463_v31, %v6462_v17 }
 0x465   : > { %5640 = vst [vmem:[%s319_s17 + $0x10] sm:$0xff] %v6453_v32 }
 0x466   : > { %5641 = vst [vmem:[%s319_s17 + $0x18] sm:$0xff] %v6454_v38 }
 0x467   : > { %7602 = shalt.err (!%p7599_p2)
}
 0x468   : > { %s7603_s8 = scalar_lea.hbm %s8821_s1, 512  ;;  %s7607_s7 = scalar_lea.hbm %s8869_s5, 2048 }
 0x469   : > { %p7604_p10 = scmp.ne.s32.totalorder %s8821_s1, %s7603_s8  ;;  %p7608_p5 = scmp.lt.u32.totalorder %s8821_s1, %s8869_s5 }
 0x46a   : > { %p7609_p13 = scmp.lt.u32.totalorder %s7607_s7, %s7603_s8  ;;  %p7611_p3 = scmp.lt.u32.totalorder %s7603_s8, %s8821_s1 }
 0x46b   : > { %p7605_p4 = pnand %p7604_p10, %p8911_p8 }
 0x46c   : > { %p7610_p12 = por %p7609_p13, %p7608_p5 }
 0x46d   : > { %p7606_p6 = pneg %p7605_p4 }
 0x46e   : > { %p7612_p9 = por %p7611_p3, %p7610_p12 }
 0x470   : > { %p7613_p7 = pnand %p7612_p9, %p7606_p6 }
 0x472   : > { %7616 = shalt.err (!%p7613_p7)
}
 0x473   : > { %s7677_s29 = smov 256   ;;  %s7678_s23 = smov 1024  }
 0x474   : > { %s7679_s11 = smov 16  }
 0x475   : > { %6536 = dma.vmem_to_hbm [thread:$0]  (%p8911_p8), %s8816_s28, 512, %s8821_s1, %s5643_s22, %s7677_s29, %s7678_s23, %s7679_s11  }
 0x476 PF: > { %p6566_p11 = scmp.ge.s32.totalorder %s7663_s21, 2  ;;  %s5671_s17 = sand.u32 1, %s7651_s18  }
 0x477   : > { %p8912_p0 = scmp.ne.s32.totalorder %s8890_s6, 0  ;;  %s5672_s12 = scalar_lea.sflag [#allocation4], %s5671_s17 }
 0x479   : > { %p6556_p1 = pnand %p6566_p11, %p8912_p0 }
 0x47b   : > { %7646 = dma.done.wait (!%p6556_p1), %s5672_s12, 512  }
 0x47c   : > { %7648 = vsyncadd (!%p6556_p1), %s5672_s12, 4294966784  ;;  %s8913_s21 = sld [smem:[#allocation16_spill]]  ;;  %s8914_s10 = sld [smem:[#allocation17_spill]] }
 0x47d   : > { %s8915_s18 = smov %s7655_s19  ;;  %s8916_s19 = smov %s7659_s20 }
 0x482   : > { %p20_p2 = scmp.ge.s32.totalorder %s8913_s21, 6   ;;  %s8917_s20 = smov %s8914_s10 }
 0x484   :  { %22 = sbr.rel (!%p20_p2) target bundleno = 10 (0xa), region = 109 }
 0x48b   :  { %5677 = vsyncpa [#allocation3], 1 }
 0x48c   :  { %5679 = vsyncpa [#allocation3 + $0x1], 1 }
 0x48d   :  { %5680 = vsyncpa [#allocation6], 1 }
 0x48e   :  { %5681 = vsyncpa [#allocation9], 1 }
 0x48f   :  { %5683 = vsyncpa [#allocation9 + $0x1], 1 }
 0x490   :  { %5684 = vsyncpa [#allocation4], 1 }
 0x491   :  { %5686 = vsyncpa [#allocation4 + $0x1], 1 }

</bundles_post_ra>
